<compile_context>
chip_gen: v7x
topology: tpu7x:2x2x1
jax: 0.10.0
libtpu: 0.0.40
codegen_flags: <defaults>
</compile_context>

<pallas_src>
import math

import jax
import jax.numpy as jnp
from jax.experimental import pallas as pl
from jax.experimental.pallas import tpu as pltpu

# ----- small synthetic config consistent with the module -----
UVS = 6            # number of users
IVS = 10           # number of items (== mask/padding value)
DIM = 32           # embedding dim (args.dim)
K = 4              # interest channels (args.k)
D_SUB = DIM // K   # per-channel dim
MAXLEN = 8         # sequence length (args.maxlen)
BLOCKS = 2         # transformer blocks (args.block)
HEAD_NUM = 4       # attention heads (args.head_num)
HEAD_DIM = DIM // HEAD_NUM
LAYERS = 2         # GCN layers (args.layers)
ITER_TIME = 2      # capsule routing iterations (args.iter_time)
BS = 2             # batch size
V = UVS + IVS      # graph nodes
LN_EPS = 1e-8      # matches torch.nn.LayerNorm(dim, eps=1e-08)

assert LAYERS == 2  # the in-kernel propagation schedule below is specialized for layers=2


def _dot(a, b):
    return jnp.dot(a, b, preferred_element_type=jnp.float32)


def _dot_t(a, b):
    # a @ b.T without materializing the transpose.
    return jax.lax.dot_general(a, b, (((1,), (1,)), ((), ())),
                               preferred_element_type=jnp.float32)


def _layer_norm(x, g, bias):
    mu = jnp.mean(x, axis=-1, keepdims=True)
    xc = x - mu
    var = jnp.mean(xc * xc, axis=-1, keepdims=True)
    return xc * jax.lax.rsqrt(var + LN_EPS) * g + bias


def _sdhid_kernel(
    # graph (full + pre-sliced views to avoid unaligned in-kernel slices)
    adj_ref, adj_ci_ref, adj_ri_ref, adj_ru_ref,
    # embedding / channel / capsule weights
    item_emb_ref, init_w_ref, init_b_ref, caps_w_ref, seg_ref, segT_ref,
    # transformer constants
    pos_tab_ref, attn_mask_ref, cum_blk_ref,
    # per-block transformer weights (stacked on a leading BLOCKS axis)
    w_qkv_ref, ffn_w1_ref, ffn_b1_ref, ffn_w2_ref, ffn_b2_ref,
    fwd_g_ref, fwd_b_ref, fwd_w1_ref, fwd_b1_ref, fwd_w2_ref, fwd_b2_ref,
    last_g_ref, last_b_ref,
    # rating head
    mlp_w1_ref, mlp_b1_ref, mlp_w2_ref, mlp_b2_ref,
    # input-dependent one-hot / selection matrices
    seq_oh_ref, pos_oh_ref, user_oh_ref, last_sel_ref,
    # outputs
    x_out_ref, logits_out_ref, sg_last_out_ref, dual_out_ref, mi_out_ref,
):
    f32 = jnp.float32
    seg = seg_ref[...]       # (K, DIM): seg[c, e] = 1 iff lane e belongs to channel c
    segT = segT_ref[...]     # (DIM, K)
    seq_oh = seq_oh_ref[...]

    # ---- K per-channel init linears + L2 normalize (channels packed along lanes) ----
    ie = _dot(item_emb_ref[...], init_w_ref[...]) + init_b_ref[...]      # (IVS, DIM)
    sq = _dot(ie * ie, segT)                                             # per-channel ||.||^2
    inv = 1.0 / jnp.maximum(jnp.sqrt(sq), 1e-12)                         # F.normalize eps
    ie = ie * _dot(inv, seg)

    # multi-interest sequence embedding: F.pad(ie)[seq]  (padding -> zero one-hot row)
    mi_out_ref[...] = _dot(seq_oh, ie)

    # ---- channel GCN propagation (layers=2): mean(initial, step2), item rows only ----
    e1 = _dot(adj_ci_ref[...], ie)                                       # adj @ [0; ie]
    e2_items = _dot(adj_ri_ref[...], e1)                                 # item rows of step 2
    cie = 0.5 * (ie + e2_items)                                          # (IVS, DIM)

    # ---- capsule dynamic routing (packed: lanes ordered (next-capsule, out-dim)) ----
    caps_w = caps_w_ref[...]
    p = [_dot(cie[:, ki * D_SUB:(ki + 1) * D_SUB],
              caps_w[ki * D_SUB:(ki + 1) * D_SUB, :]) for ki in range(K)]   # each (IVS, DIM)
    b = [jnp.zeros((IVS, K), f32) for _ in range(K)]
    q = jnp.zeros((IVS, DIM), f32)
    for _ in range(ITER_TIME):
        c = [jax.nn.softmax(b[ki], axis=-1) for ki in range(K)]
        q = jnp.zeros((IVS, DIM), f32)
        for ki in range(K):
            q = q + p[ki] * _dot(c[ki], seg)                             # 'bkKD,bkK->bKD'
        s2 = _dot(q * q, segT)                                           # squash (per capsule)
        scale = (s2 / (1.0 + s2)) / jnp.sqrt(s2 + 1e-8)
        q = q * _dot(scale, seg)
        for ki in range(K):
            b[ki] = b[ki] + _dot(p[ki] * q, segT)                        # 'bkKD,bKD->bkK'
    X = q                                                                # (IVS, DIM)
    x_out_ref[...] = X

    # ---- dual (user) GCN propagation (3 steps): mean(step1, step3), user rows only ----
    d1 = _dot(adj_ci_ref[...], X)                                        # adj @ [0; X]
    d2 = _dot(adj_ref[...], d1)
    d3_users = _dot(adj_ru_ref[...], d2)
    user_emb = 0.5 * (d1[:UVS, :] + d3_users)
    dual_out_ref[...] = _dot(user_oh_ref[...], user_emb)

    # ---- sequence / positive item embedding lookups (one-hot matmuls) ----
    seq_emb = _dot(seq_oh, X)                                            # (BS*MAXLEN, DIM)
    pos_emb = _dot(pos_oh_ref[...], X)
    keep = jnp.sum(seq_oh, axis=-1, keepdims=True)                       # 0 on padded steps

    # ---- Log2feats transformer ----
    seqs = (seq_emb + pos_tab_ref[...]) * keep
    mask = attn_mask_ref[...]
    att_scale = 1.0 / math.sqrt(HEAD_DIM)

    for blk in range(BLOCKS):
        qkv = _dot(seqs, w_qkv_ref[blk])                                 # (BS*MAXLEN, 3*DIM)
        qh = qkv[:, 0:DIM]
        kh = qkv[:, DIM:2 * DIM]
        vh = qkv[:, 2 * DIM:3 * DIM]
        rows = []
        for bi in range(BS):
            r0 = bi * MAXLEN
            heads = []
            for h in range(HEAD_NUM):
                c0 = h * HEAD_DIM
                qb = qh[r0:r0 + MAXLEN, c0:c0 + HEAD_DIM]
                kb = kh[r0:r0 + MAXLEN, c0:c0 + HEAD_DIM]
                vb = vh[r0:r0 + MAXLEN, c0:c0 + HEAD_DIM]
                s = _dot_t(qb, kb) * att_scale + mask
                s = s - jnp.max(s, axis=-1, keepdims=True)
                es = jnp.exp(s)
                pr = es / jnp.sum(es, axis=-1, keepdims=True)
                heads.append(_dot(pr, vb))
            rows.append(jnp.concatenate(heads, axis=-1))
        att = jnp.concatenate(rows, axis=0)                              # (BS*MAXLEN, DIM)

        h1 = _dot(att, ffn_w1_ref[blk]) + ffn_b1_ref[blk]                # FFN (SiLU)
        h1 = h1 * jax.nn.sigmoid(h1)
        mha_out = _dot(h1, ffn_w2_ref[blk]) + ffn_b2_ref[blk]

        seqs = seqs + mha_out
        seqs = _layer_norm(seqs, fwd_g_ref[blk], fwd_b_ref[blk])
        h2 = jnp.maximum(_dot(seqs, fwd_w1_ref[blk]) + fwd_b1_ref[blk], 0.0)
        seqs = _dot(h2, fwd_w2_ref[blk]) + fwd_b2_ref[blk]
        seqs = seqs * keep

    lf = _layer_norm(seqs, last_g_ref[...], last_b_ref[...])

    # ---- cumsum / (t+1) via block-diagonal lower-triangular matmul ----
    sg = _dot(cum_blk_ref[...], lf)                                      # (BS*MAXLEN, DIM)
    sg_last_out_ref[...] = _dot(last_sel_ref[...], sg)                   # (BS, DIM)

    # ---- rating MLP head (logits as a lane reduction, no 1-wide matmul) ----
    mlp_in = jnp.concatenate([sg, pos_emb], axis=-1)                     # (BS*MAXLEN, 2*DIM)
    hh = jnp.maximum(_dot(mlp_in, mlp_w1_ref[...]) + mlp_b1_ref[...], 0.0)
    logits_out_ref[...] = (jnp.sum(hh * mlp_w2_ref[...], axis=-1, keepdims=True)
                           + mlp_b2_ref[...])


# ---------------- wrapper: weight packing + one fused pallas_call ----------------

def sdhid_forward(params, graph, user, seq, pos):
    f32 = jnp.float32

    # ---- weight packing (tiny reshape/concat glue) ----
    init_w = jnp.concatenate(params["init_w"], axis=1)                   # (DIM, K*D_SUB)
    init_b = jnp.concatenate(params["init_b"], axis=0).reshape(1, DIM)
    # caps W (k, K, d, D) -> per-k (d, K*D) stacked along rows -> (K*D_SUB, DIM)
    caps_w = jnp.transpose(params["caps_W"], (0, 2, 1, 3)).reshape(DIM, DIM)

    seg = (jnp.arange(K)[:, None] == (jnp.arange(DIM)[None, :] // D_SUB)).astype(f32)
    segT = seg.T

    pos_tab = jnp.tile(params["pos_emb"], (BS, 1))                       # (BS*MAXLEN, DIM)

    tril = jnp.tril(jnp.ones((MAXLEN, MAXLEN), bool))
    attn_mask = jnp.where(tril, 0.0, -jnp.inf).astype(f32)

    r = jnp.arange(MAXLEN, dtype=f32)
    cum = jnp.tril(jnp.ones((MAXLEN, MAXLEN), f32)) / (r[:, None] + 1.0)
    cum_blk = jnp.kron(jnp.eye(BS, dtype=f32), cum)                      # (BS*MAXLEN, BS*MAXLEN)

    def stack(name, as_row_bias=False):
        a = jnp.stack([blk[name] for blk in params["blocks"]], axis=0)
        if as_row_bias:
            a = a.reshape(BLOCKS, 1, -1)
        return a

    w_qkv = stack("w_qkv")
    ffn_w1 = stack("ffn_w1"); ffn_b1 = stack("ffn_b1", True)
    ffn_w2 = stack("ffn_w2"); ffn_b2 = stack("ffn_b2", True)
    fwd_g = stack("fwd_ln_g", True); fwd_b = stack("fwd_ln_b", True)
    fwd_w1 = stack("fwd_w1"); fwd_b1 = stack("fwd_b1", True)
    fwd_w2 = stack("fwd_w2"); fwd_b2 = stack("fwd_b2", True)

    last_g = params["last_ln_g"].reshape(1, DIM)
    last_b = params["last_ln_b"].reshape(1, DIM)
    mlp_w1 = params["mlp_w1"]
    mlp_b1 = params["mlp_b1"].reshape(1, DIM)
    mlp_w2 = params["mlp_w2"].reshape(1, DIM)                            # (DIM,1) -> row vector
    mlp_b2 = params["mlp_b2"].reshape(1, 1)

    adj = graph
    adj_ci = graph[:, UVS:]         # columns of item nodes
    adj_ri = graph[UVS:, :]         # rows of item nodes
    adj_ru = graph[:UVS, :]         # rows of user nodes

    # ---- input-dependent one-hot / selection matrices (plain-JAX glue) ----
    seq_oh = jax.nn.one_hot(seq.reshape(-1), IVS, dtype=f32)             # pad (==IVS) -> zero row
    pos_oh = jax.nn.one_hot(pos.reshape(-1), IVS, dtype=f32)
    user_oh = jax.nn.one_hot(user, UVS, dtype=f32)
    seq_len = jnp.sum(seq != IVS, axis=-1).astype(jnp.int32)
    last_idx = jnp.mod(seq_len - 1, MAXLEN)                              # torch's -1 wrap
    last_sel = jax.nn.one_hot(jnp.arange(BS) * MAXLEN + last_idx, BS * MAXLEN, dtype=f32)

    inputs = (adj, adj_ci, adj_ri, adj_ru,
              params["item_emb"], init_w, init_b, caps_w, seg, segT,
              pos_tab, attn_mask, cum_blk,
              w_qkv, ffn_w1, ffn_b1, ffn_w2, ffn_b2,
              fwd_g, fwd_b, fwd_w1, fwd_b1, fwd_w2, fwd_b2,
              last_g, last_b,
              mlp_w1, mlp_b1, mlp_w2, mlp_b2,
              seq_oh, pos_oh, user_oh, last_sel)

    out_shape = (
        jax.ShapeDtypeStruct((IVS, DIM), f32),            # X (padded outside, as torch returns it)
        jax.ShapeDtypeStruct((BS * MAXLEN, 1), f32),      # logits (flat)
        jax.ShapeDtypeStruct((BS, DIM), f32),             # sg at last valid position
        jax.ShapeDtypeStruct((BS, DIM), f32),             # seq_emb_dual
        jax.ShapeDtypeStruct((BS * MAXLEN, DIM), f32),    # multi-interest (channels packed)
    )

    in_specs = [pl.BlockSpec(a.shape, (lambda i, _nd=a.ndim: (0,) * _nd)) for a in inputs]
    out_specs = tuple(pl.BlockSpec(s.shape, (lambda i, _nd=len(s.shape): (0,) * _nd))
                      for s in out_shape)

    X, logits_flat, sg_last, seq_emb_dual, mi_flat = pl.pallas_call(
        _sdhid_kernel,
        out_shape=out_shape,
        grid=(1,),
        in_specs=in_specs,
        out_specs=out_specs,
        compiler_params=pltpu.CompilerParams(dimension_semantics=("arbitrary",)),
    )(*inputs)

    X_padded = jnp.pad(X, ((0, 1), (0, 0)))                              # F.pad(X, (0,0,0,1))
    logits = logits_flat.reshape(BS, MAXLEN)
    mi = mi_flat.reshape(BS, MAXLEN, K, D_SUB)
    multi_interest = [mi[:, :, i, :] for i in range(K)]
    return X_padded, logits, sg_last, seq_emb_dual, multi_interest


# ---------------- deterministic parameter / input construction ----------------

def xavier(key, shape):
    fan_in, fan_out = shape[0], shape[-1]
    std = math.sqrt(2.0 / (fan_in + fan_out))
    return (std * jax.random.normal(key, shape)).astype(jnp.float32)


def init_params(key):
    ks = iter(jax.random.split(key, 64))
    params = {
        "item_emb": xavier(next(ks), (IVS, DIM)),
        "init_w": [xavier(next(ks), (DIM, D_SUB)) for _ in range(K)],
        "init_b": [jnp.zeros((D_SUB,), jnp.float32) for _ in range(K)],
        "caps_W": jax.random.normal(next(ks), (K, K, D_SUB, D_SUB), jnp.float32),
        "pos_emb": xavier(next(ks), (MAXLEN, DIM)),
        "blocks": [],
        "last_ln_g": jnp.ones((DIM,), jnp.float32),
        "last_ln_b": jnp.zeros((DIM,), jnp.float32),
        "mlp_w1": xavier(next(ks), (2 * DIM, DIM)),
        "mlp_b1": jnp.zeros((DIM,), jnp.float32),
        "mlp_w2": xavier(next(ks), (DIM, 1)),
        "mlp_b2": jnp.zeros((1,), jnp.float32),
    }
    for _ in range(BLOCKS):
        params["blocks"].append({
            "w_qkv": xavier(next(ks), (DIM, 3 * DIM)),
            "ffn_w1": xavier(next(ks), (DIM, 2 * DIM)),
            "ffn_b1": jnp.zeros((2 * DIM,), jnp.float32),
            "ffn_w2": xavier(next(ks), (2 * DIM, DIM)),
            "ffn_b2": jnp.zeros((DIM,), jnp.float32),
            "fwd_ln_g": jnp.ones((DIM,), jnp.float32),
            "fwd_ln_b": jnp.zeros((DIM,), jnp.float32),
            "fwd_w1": xavier(next(ks), (DIM, 2 * DIM)),
            "fwd_b1": jnp.zeros((2 * DIM,), jnp.float32),
            "fwd_w2": xavier(next(ks), (2 * DIM, DIM)),
            "fwd_b2": jnp.zeros((DIM,), jnp.float32),
        })
    return params


def build_graph(key):
    # Dense D^-1/2 A D^-1/2 over the bipartite user-item graph (get_norm_adj_mat).
    inter = jax.random.bernoulli(key, 0.35, (UVS, IVS)).astype(jnp.float32)
    A = jnp.zeros((V, V), jnp.float32)
    A = A.at[:UVS, UVS:].set(inter)
    A = A.at[UVS:, :UVS].set(inter.T)
    deg = jnp.sum(A, axis=1) + 1e-7
    dinv = deg ** -0.5
    return dinv[:, None] * A * dinv[None, :]


if __name__ == "__main__":
    root = jax.random.PRNGKey(0)
    k_params, k_graph, k_user, k_seq, k_pos = jax.random.split(root, 5)
    params = init_params(k_params)
    graph = build_graph(k_graph)

    user = jax.random.randint(k_user, (BS,), 0, UVS)
    seq = jax.random.randint(k_seq, (BS, MAXLEN), 0, IVS)
    pad_len = jnp.array([2, 3])                      # trailing padding per row
    col = jnp.arange(MAXLEN)[None, :]
    seq = jnp.where(col >= (MAXLEN - pad_len)[:, None], IVS, seq)
    pos = jax.random.randint(k_pos, (BS, MAXLEN), 0, IVS)

    fwd = jax.jit(sdhid_forward)
    outs = fwd(params, graph, user, seq, pos)
    jax.block_until_ready(outs)
    print("KERNEL_OK")
</pallas_src>

<mosaic_0001>
module attributes {stable_mosaic.version = 11 : i64} {
  func.func @_sdhid_kernel(%arg0: i32, %arg1: memref<16x16xf32, #tpu.memory_space<vmem>>, %arg2: memref<16x10xf32, #tpu.memory_space<vmem>>, %arg3: memref<10x16xf32, #tpu.memory_space<vmem>>, %arg4: memref<6x16xf32, #tpu.memory_space<vmem>>, %arg5: memref<10x32xf32, #tpu.memory_space<vmem>>, %arg6: memref<32x32xf32, #tpu.memory_space<vmem>>, %arg7: memref<1x32xf32, #tpu.memory_space<vmem>>, %arg8: memref<32x32xf32, #tpu.memory_space<vmem>>, %arg9: memref<4x32xf32, #tpu.memory_space<vmem>>, %arg10: memref<32x4xf32, #tpu.memory_space<vmem>>, %arg11: memref<16x32xf32, #tpu.memory_space<vmem>>, %arg12: memref<8x8xf32, #tpu.memory_space<vmem>>, %arg13: memref<16x16xf32, #tpu.memory_space<vmem>>, %arg14: memref<2x32x96xf32, #tpu.memory_space<vmem>>, %arg15: memref<2x32x64xf32, #tpu.memory_space<vmem>>, %arg16: memref<2x1x64xf32, #tpu.memory_space<vmem>>, %arg17: memref<2x64x32xf32, #tpu.memory_space<vmem>>, %arg18: memref<2x1x32xf32, #tpu.memory_space<vmem>>, %arg19: memref<2x1x32xf32, #tpu.memory_space<vmem>>, %arg20: memref<2x1x32xf32, #tpu.memory_space<vmem>>, %arg21: memref<2x32x64xf32, #tpu.memory_space<vmem>>, %arg22: memref<2x1x64xf32, #tpu.memory_space<vmem>>, %arg23: memref<2x64x32xf32, #tpu.memory_space<vmem>>, %arg24: memref<2x1x32xf32, #tpu.memory_space<vmem>>, %arg25: memref<1x32xf32, #tpu.memory_space<vmem>>, %arg26: memref<1x32xf32, #tpu.memory_space<vmem>>, %arg27: memref<64x32xf32, #tpu.memory_space<vmem>>, %arg28: memref<1x32xf32, #tpu.memory_space<vmem>>, %arg29: memref<1x32xf32, #tpu.memory_space<vmem>>, %arg30: memref<1x1xf32, #tpu.memory_space<vmem>>, %arg31: memref<16x10xf32, #tpu.memory_space<vmem>>, %arg32: memref<16x10xf32, #tpu.memory_space<vmem>>, %arg33: memref<2x6xf32, #tpu.memory_space<vmem>>, %arg34: memref<2x16xf32, #tpu.memory_space<vmem>>, %arg35: memref<10x32xf32, #tpu.memory_space<vmem>>, %arg36: memref<16x1xf32, #tpu.memory_space<vmem>>, %arg37: memref<2x32xf32, #tpu.memory_space<vmem>>, %arg38: memref<2x32xf32, #tpu.memory_space<vmem>>, %arg39: memref<16x32xf32, #tpu.memory_space<vmem>>) attributes {dimension_semantics = [#tpu.dimension_semantics<arbitrary>], iteration_bounds = array<i64: 1>, scalar_prefetch = 0 : i64, scratch_operands = 0 : i64, tpu.core_type = #tpu.core_type<tc>, window_params = [{pipeline_mode = #tpu.pipeline_mode<synchronous>, transform_indices = @transform_0, window_bounds = array<i64: 16, 16>}, {pipeline_mode = #tpu.pipeline_mode<synchronous>, transform_indices = @transform_1, window_bounds = array<i64: 16, 10>}, {pipeline_mode = #tpu.pipeline_mode<synchronous>, transform_indices = @transform_2, window_bounds = array<i64: 10, 16>}, {pipeline_mode = #tpu.pipeline_mode<synchronous>, transform_indices = @transform_3, window_bounds = array<i64: 6, 16>}, {pipeline_mode = #tpu.pipeline_mode<synchronous>, transform_indices = @transform_4, window_bounds = array<i64: 10, 32>}, {pipeline_mode = #tpu.pipeline_mode<synchronous>, transform_indices = @transform_5, window_bounds = array<i64: 32, 32>}, {pipeline_mode = #tpu.pipeline_mode<synchronous>, transform_indices = @transform_6, window_bounds = array<i64: 1, 32>}, {pipeline_mode = #tpu.pipeline_mode<synchronous>, transform_indices = @transform_7, window_bounds = array<i64: 32, 32>}, {pipeline_mode = #tpu.pipeline_mode<synchronous>, transform_indices = @transform_8, window_bounds = array<i64: 4, 32>}, {pipeline_mode = #tpu.pipeline_mode<synchronous>, transform_indices = @transform_9, window_bounds = array<i64: 32, 4>}, {pipeline_mode = #tpu.pipeline_mode<synchronous>, transform_indices = @transform_10, window_bounds = array<i64: 16, 32>}, {pipeline_mode = #tpu.pipeline_mode<synchronous>, transform_indices = @transform_11, window_bounds = array<i64: 8, 8>}, {pipeline_mode = #tpu.pipeline_mode<synchronous>, transform_indices = @transform_12, window_bounds = array<i64: 16, 16>}, {pipeline_mode = #tpu.pipeline_mode<synchronous>, transform_indices = @transform_13, window_bounds = array<i64: 2, 32, 96>}, {pipeline_mode = #tpu.pipeline_mode<synchronous>, transform_indices = @transform_14, window_bounds = array<i64: 2, 32, 64>}, {pipeline_mode = #tpu.pipeline_mode<synchronous>, transform_indices = @transform_15, window_bounds = array<i64: 2, 1, 64>}, {pipeline_mode = #tpu.pipeline_mode<synchronous>, transform_indices = @transform_16, window_bounds = array<i64: 2, 64, 32>}, {pipeline_mode = #tpu.pipeline_mode<synchronous>, transform_indices = @transform_17, window_bounds = array<i64: 2, 1, 32>}, {pipeline_mode = #tpu.pipeline_mode<synchronous>, transform_indices = @transform_18, window_bounds = array<i64: 2, 1, 32>}, {pipeline_mode = #tpu.pipeline_mode<synchronous>, transform_indices = @transform_19, window_bounds = array<i64: 2, 1, 32>}, {pipeline_mode = #tpu.pipeline_mode<synchronous>, transform_indices = @transform_20, window_bounds = array<i64: 2, 32, 64>}, {pipeline_mode = #tpu.pipeline_mode<synchronous>, transform_indices = @transform_21, window_bounds = array<i64: 2, 1, 64>}, {pipeline_mode = #tpu.pipeline_mode<synchronous>, transform_indices = @transform_22, window_bounds = array<i64: 2, 64, 32>}, {pipeline_mode = #tpu.pipeline_mode<synchronous>, transform_indices = @transform_23, window_bounds = array<i64: 2, 1, 32>}, {pipeline_mode = #tpu.pipeline_mode<synchronous>, transform_indices = @transform_24, window_bounds = array<i64: 1, 32>}, {pipeline_mode = #tpu.pipeline_mode<synchronous>, transform_indices = @transform_25, window_bounds = array<i64: 1, 32>}, {pipeline_mode = #tpu.pipeline_mode<synchronous>, transform_indices = @transform_26, window_bounds = array<i64: 64, 32>}, {pipeline_mode = #tpu.pipeline_mode<synchronous>, transform_indices = @transform_27, window_bounds = array<i64: 1, 32>}, {pipeline_mode = #tpu.pipeline_mode<synchronous>, transform_indices = @transform_28, window_bounds = array<i64: 1, 32>}, {pipeline_mode = #tpu.pipeline_mode<synchronous>, transform_indices = @transform_29, window_bounds = array<i64: 1, 1>}, {pipeline_mode = #tpu.pipeline_mode<synchronous>, transform_indices = @transform_30, window_bounds = array<i64: 16, 10>}, {pipeline_mode = #tpu.pipeline_mode<synchronous>, transform_indices = @transform_31, window_bounds = array<i64: 16, 10>}, {pipeline_mode = #tpu.pipeline_mode<synchronous>, transform_indices = @transform_32, window_bounds = array<i64: 2, 6>}, {pipeline_mode = #tpu.pipeline_mode<synchronous>, transform_indices = @transform_33, window_bounds = array<i64: 2, 16>}, {pipeline_mode = #tpu.pipeline_mode<synchronous>, transform_indices = @transform_34, window_bounds = array<i64: 10, 32>}, {pipeline_mode = #tpu.pipeline_mode<synchronous>, transform_indices = @transform_35, window_bounds = array<i64: 16, 1>}, {pipeline_mode = #tpu.pipeline_mode<synchronous>, transform_indices = @transform_36, window_bounds = array<i64: 2, 32>}, {pipeline_mode = #tpu.pipeline_mode<synchronous>, transform_indices = @transform_37, window_bounds = array<i64: 2, 32>}, {pipeline_mode = #tpu.pipeline_mode<synchronous>, transform_indices = @transform_38, window_bounds = array<i64: 16, 32>}]} {
    %c0 = arith.constant 0 : index
    %c0_0 = arith.constant 0 : index
    %0 = vector.load %arg9[%c0, %c0_0] : memref<4x32xf32, #tpu.memory_space<vmem>>, vector<4x32xf32>
    %c0_1 = arith.constant 0 : index
    %c0_2 = arith.constant 0 : index
    %1 = vector.load %arg10[%c0_1, %c0_2] : memref<32x4xf32, #tpu.memory_space<vmem>>, vector<32x4xf32>
    %c0_3 = arith.constant 0 : index
    %c0_4 = arith.constant 0 : index
    %2 = vector.load %arg31[%c0_3, %c0_4] : memref<16x10xf32, #tpu.memory_space<vmem>>, vector<16x10xf32>
    %c0_5 = arith.constant 0 : index
    %c0_6 = arith.constant 0 : index
    %3 = vector.load %arg5[%c0_5, %c0_6] : memref<10x32xf32, #tpu.memory_space<vmem>>, vector<10x32xf32>
    %c0_7 = arith.constant 0 : index
    %c0_8 = arith.constant 0 : index
    %4 = vector.load %arg6[%c0_7, %c0_8] : memref<32x32xf32, #tpu.memory_space<vmem>>, vector<32x32xf32>
    %cst = arith.constant dense<0.000000e+00> : vector<10x32xf32>
    %5 = tpu.matmul %3, %4, %cst {dimension_numbers = #tpu.dot_dimension_numbers<[1], [0], [0], [1], [0, 0, 1, 1], [], []>} : vector<10x32xf32>, vector<32x32xf32>, vector<10x32xf32> -> vector<10x32xf32>
    %c0_9 = arith.constant 0 : index
    %c0_10 = arith.constant 0 : index
    %6 = vector.load %arg7[%c0_9, %c0_10] : memref<1x32xf32, #tpu.memory_space<vmem>>, vector<1x32xf32>
    %7 = vector.broadcast %6 : vector<1x32xf32> to vector<10x32xf32>
    %8 = arith.addf %5, %7 : vector<10x32xf32>
    %9 = arith.mulf %8, %8 : vector<10x32xf32>
    %cst_11 = arith.constant dense<0.000000e+00> : vector<10x4xf32>
    %10 = tpu.matmul %9, %1, %cst_11 {dimension_numbers = #tpu.dot_dimension_numbers<[1], [0], [0], [1], [0, 0, 1, 1], [], []>} : vector<10x32xf32>, vector<32x4xf32>, vector<10x4xf32> -> vector<10x4xf32>
    %11 = math.sqrt %10 : vector<10x4xf32>
    %cst_12 = arith.constant 9.99999996E-13 : f32
    %12 = vector.broadcast %cst_12 : f32 to vector<10x4xf32>
    %13 = arith.maximumf %11, %12 : vector<10x4xf32>
    %cst_13 = arith.constant 1.000000e+00 : f32
    %14 = vector.broadcast %cst_13 : f32 to vector<10x4xf32>
    %15 = arith.divf %14, %13 : vector<10x4xf32>
    %cst_14 = arith.constant dense<0.000000e+00> : vector<10x32xf32>
    %16 = tpu.matmul %15, %0, %cst_14 {dimension_numbers = #tpu.dot_dimension_numbers<[1], [0], [0], [1], [0, 0, 1, 1], [], []>} : vector<10x4xf32>, vector<4x32xf32>, vector<10x32xf32> -> vector<10x32xf32>
    %17 = arith.mulf %8, %16 : vector<10x32xf32>
    %cst_15 = arith.constant dense<0.000000e+00> : vector<16x32xf32>
    %18 = tpu.matmul %2, %17, %cst_15 {dimension_numbers = #tpu.dot_dimension_numbers<[1], [0], [0], [1], [0, 0, 1, 1], [], []>} : vector<16x10xf32>, vector<10x32xf32>, vector<16x32xf32> -> vector<16x32xf32>
    %c0_16 = arith.constant 0 : index
    %c0_17 = arith.constant 0 : index
    %19 = vector.load %arg39[%c0_16, %c0_17] : memref<16x32xf32, #tpu.memory_space<vmem>>, vector<16x32xf32>
    tpu.vector_store %arg39[%c0_16, %c0_17], %18 {strides = array<i32>} : memref<16x32xf32, #tpu.memory_space<vmem>>, vector<16x32xf32>,
    %c0_18 = arith.constant 0 : index
    %c0_19 = arith.constant 0 : index
    %20 = vector.load %arg2[%c0_18, %c0_19] : memref<16x10xf32, #tpu.memory_space<vmem>>, vector<16x10xf32>
    %cst_20 = arith.constant dense<0.000000e+00> : vector<16x32xf32>
    %21 = tpu.matmul %20, %17, %cst_20 {dimension_numbers = #tpu.dot_dimension_numbers<[1], [0], [0], [1], [0, 0, 1, 1], [], []>} : vector<16x10xf32>, vector<10x32xf32>, vector<16x32xf32> -> vector<16x32xf32>
    %c0_21 = arith.constant 0 : index
    %c0_22 = arith.constant 0 : index
    %22 = vector.load %arg3[%c0_21, %c0_22] : memref<10x16xf32, #tpu.memory_space<vmem>>, vector<10x16xf32>
    %cst_23 = arith.constant dense<0.000000e+00> : vector<10x32xf32>
    %23 = tpu.matmul %22, %21, %cst_23 {dimension_numbers = #tpu.dot_dimension_numbers<[1], [0], [0], [1], [0, 0, 1, 1], [], []>} : vector<10x16xf32>, vector<16x32xf32>, vector<10x32xf32> -> vector<10x32xf32>
    %24 = arith.addf %17, %23 : vector<10x32xf32>
    %cst_24 = arith.constant 5.000000e-01 : f32
    %25 = vector.broadcast %cst_24 : f32 to vector<10x32xf32>
    %26 = arith.mulf %25, %24 : vector<10x32xf32>
    %c0_25 = arith.constant 0 : index
    %c0_26 = arith.constant 0 : index
    %27 = vector.load %arg8[%c0_25, %c0_26] : memref<32x32xf32, #tpu.memory_space<vmem>>, vector<32x32xf32>
    %28 = vector.extract_strided_slice %26 {offsets = [0, 0], sizes = [10, 8], strides = [1, 1]} : vector<10x32xf32> to vector<10x8xf32>
    %29 = vector.extract_strided_slice %27 {offsets = [0, 0], sizes = [8, 32], strides = [1, 1]} : vector<32x32xf32> to vector<8x32xf32>
    %cst_27 = arith.constant dense<0.000000e+00> : vector<10x32xf32>
    %30 = tpu.matmul %28, %29, %cst_27 {dimension_numbers = #tpu.dot_dimension_numbers<[1], [0], [0], [1], [0, 0, 1, 1], [], []>} : vector<10x8xf32>, vector<8x32xf32>, vector<10x32xf32> -> vector<10x32xf32>
    %31 = vector.extract_strided_slice %26 {offsets = [0, 8], sizes = [10, 8], strides = [1, 1]} : vector<10x32xf32> to vector<10x8xf32>
    %32 = vector.extract_strided_slice %27 {offsets = [8, 0], sizes = [8, 32], strides = [1, 1]} : vector<32x32xf32> to vector<8x32xf32>
    %cst_28 = arith.constant dense<0.000000e+00> : vector<10x32xf32>
    %33 = tpu.matmul %31, %32, %cst_28 {dimension_numbers = #tpu.dot_dimension_numbers<[1], [0], [0], [1], [0, 0, 1, 1], [], []>} : vector<10x8xf32>, vector<8x32xf32>, vector<10x32xf32> -> vector<10x32xf32>
    %34 = vector.extract_strided_slice %26 {offsets = [0, 16], sizes = [10, 8], strides = [1, 1]} : vector<10x32xf32> to vector<10x8xf32>
    %35 = vector.extract_strided_slice %27 {offsets = [16, 0], sizes = [8, 32], strides = [1, 1]} : vector<32x32xf32> to vector<8x32xf32>
    %cst_29 = arith.constant dense<0.000000e+00> : vector<10x32xf32>
    %36 = tpu.matmul %34, %35, %cst_29 {dimension_numbers = #tpu.dot_dimension_numbers<[1], [0], [0], [1], [0, 0, 1, 1], [], []>} : vector<10x8xf32>, vector<8x32xf32>, vector<10x32xf32> -> vector<10x32xf32>
    %37 = vector.extract_strided_slice %26 {offsets = [0, 24], sizes = [10, 8], strides = [1, 1]} : vector<10x32xf32> to vector<10x8xf32>
    %38 = vector.extract_strided_slice %27 {offsets = [24, 0], sizes = [8, 32], strides = [1, 1]} : vector<32x32xf32> to vector<8x32xf32>
    %cst_30 = arith.constant dense<0.000000e+00> : vector<10x32xf32>
    %39 = tpu.matmul %37, %38, %cst_30 {dimension_numbers = #tpu.dot_dimension_numbers<[1], [0], [0], [1], [0, 0, 1, 1], [], []>} : vector<10x8xf32>, vector<8x32xf32>, vector<10x32xf32> -> vector<10x32xf32>
    %cst_31 = arith.constant 0.000000e+00 : f32
    %40 = vector.broadcast %cst_31 : f32 to vector<10x4xf32>
    %cst_32 = arith.constant 0.000000e+00 : f32
    %41 = vector.broadcast %cst_32 : f32 to vector<10x4xf32>
    %cst_33 = arith.constant 0.000000e+00 : f32
    %42 = vector.broadcast %cst_33 : f32 to vector<10x4xf32>
    %cst_34 = arith.constant 0.000000e+00 : f32
    %43 = vector.broadcast %cst_34 : f32 to vector<10x4xf32>
    %cst_35 = arith.constant dense<0xFF800000> : vector<10xf32>
    %44 = vector.multi_reduction <maximumf>, %40, %cst_35 [1] : vector<10x4xf32> to vector<10xf32>
    %cst_36 = arith.constant 0xFF800000 : f32
    %45 = vector.broadcast %cst_36 : f32 to vector<10xf32>
    %46 = arith.maximumf %45, %44 : vector<10xf32>
    %47 = vector.shape_cast %46 : vector<10xf32> to vector<10x1xf32>
    %48 = vector.broadcast %47 : vector<10x1xf32> to vector<10x4xf32>
    %49 = arith.subf %40, %48 : vector<10x4xf32>
    %50 = math.exp %49 : vector<10x4xf32>
    %cst_37 = arith.constant dense<0.000000e+00> : vector<10xf32>
    %51 = vector.multi_reduction <add>, %50, %cst_37 [1] : vector<10x4xf32> to vector<10xf32>
    %52 = vector.shape_cast %51 : vector<10xf32> to vector<10x1xf32>
    %53 = vector.broadcast %52 : vector<10x1xf32> to vector<10x4xf32>
    %54 = arith.divf %50, %53 : vector<10x4xf32>
    %cst_38 = arith.constant dense<0xFF800000> : vector<10xf32>
    %55 = vector.multi_reduction <maximumf>, %41, %cst_38 [1] : vector<10x4xf32> to vector<10xf32>
    %cst_39 = arith.constant 0xFF800000 : f32
    %56 = vector.broadcast %cst_39 : f32 to vector<10xf32>
    %57 = arith.maximumf %56, %55 : vector<10xf32>
    %58 = vector.shape_cast %57 : vector<10xf32> to vector<10x1xf32>
    %59 = vector.broadcast %58 : vector<10x1xf32> to vector<10x4xf32>
    %60 = arith.subf %41, %59 : vector<10x4xf32>
    %61 = math.exp %60 : vector<10x4xf32>
    %cst_40 = arith.constant dense<0.000000e+00> : vector<10xf32>
    %62 = vector.multi_reduction <add>, %61, %cst_40 [1] : vector<10x4xf32> to vector<10xf32>
    %63 = vector.shape_cast %62 : vector<10xf32> to vector<10x1xf32>
    %64 = vector.broadcast %63 : vector<10x1xf32> to vector<10x4xf32>
    %65 = arith.divf %61, %64 : vector<10x4xf32>
    %cst_41 = arith.constant dense<0xFF800000> : vector<10xf32>
    %66 = vector.multi_reduction <maximumf>, %42, %cst_41 [1] : vector<10x4xf32> to vector<10xf32>
    %cst_42 = arith.constant 0xFF800000 : f32
    %67 = vector.broadcast %cst_42 : f32 to vector<10xf32>
    %68 = arith.maximumf %67, %66 : vector<10xf32>
    %69 = vector.shape_cast %68 : vector<10xf32> to vector<10x1xf32>
    %70 = vector.broadcast %69 : vector<10x1xf32> to vector<10x4xf32>
    %71 = arith.subf %42, %70 : vector<10x4xf32>
    %72 = math.exp %71 : vector<10x4xf32>
    %cst_43 = arith.constant dense<0.000000e+00> : vector<10xf32>
    %73 = vector.multi_reduction <add>, %72, %cst_43 [1] : vector<10x4xf32> to vector<10xf32>
    %74 = vector.shape_cast %73 : vector<10xf32> to vector<10x1xf32>
    %75 = vector.broadcast %74 : vector<10x1xf32> to vector<10x4xf32>
    %76 = arith.divf %72, %75 : vector<10x4xf32>
    %cst_44 = arith.constant dense<0xFF800000> : vector<10xf32>
    %77 = vector.multi_reduction <maximumf>, %43, %cst_44 [1] : vector<10x4xf32> to vector<10xf32>
    %cst_45 = arith.constant 0xFF800000 : f32
    %78 = vector.broadcast %cst_45 : f32 to vector<10xf32>
    %79 = arith.maximumf %78, %77 : vector<10xf32>
    %80 = vector.shape_cast %79 : vector<10xf32> to vector<10x1xf32>
    %81 = vector.broadcast %80 : vector<10x1xf32> to vector<10x4xf32>
    %82 = arith.subf %43, %81 : vector<10x4xf32>
    %83 = math.exp %82 : vector<10x4xf32>
    %cst_46 = arith.constant dense<0.000000e+00> : vector<10xf32>
    %84 = vector.multi_reduction <add>, %83, %cst_46 [1] : vector<10x4xf32> to vector<10xf32>
    %85 = vector.shape_cast %84 : vector<10xf32> to vector<10x1xf32>
    %86 = vector.broadcast %85 : vector<10x1xf32> to vector<10x4xf32>
    %87 = arith.divf %83, %86 : vector<10x4xf32>
    %cst_47 = arith.constant 0.000000e+00 : f32
    %88 = vector.broadcast %cst_47 : f32 to vector<10x32xf32>
    %cst_48 = arith.constant dense<0.000000e+00> : vector<10x32xf32>
    %89 = tpu.matmul %54, %0, %cst_48 {dimension_numbers = #tpu.dot_dimension_numbers<[1], [0], [0], [1], [0, 0, 1, 1], [], []>} : vector<10x4xf32>, vector<4x32xf32>, vector<10x32xf32> -> vector<10x32xf32>
    %90 = arith.mulf %30, %89 : vector<10x32xf32>
    %91 = arith.addf %88, %90 : vector<10x32xf32>
    %cst_49 = arith.constant dense<0.000000e+00> : vector<10x32xf32>
    %92 = tpu.matmul %65, %0, %cst_49 {dimension_numbers = #tpu.dot_dimension_numbers<[1], [0], [0], [1], [0, 0, 1, 1], [], []>} : vector<10x4xf32>, vector<4x32xf32>, vector<10x32xf32> -> vector<10x32xf32>
    %93 = arith.mulf %33, %92 : vector<10x32xf32>
    %94 = arith.addf %91, %93 : vector<10x32xf32>
    %cst_50 = arith.constant dense<0.000000e+00> : vector<10x32xf32>
    %95 = tpu.matmul %76, %0, %cst_50 {dimension_numbers = #tpu.dot_dimension_numbers<[1], [0], [0], [1], [0, 0, 1, 1], [], []>} : vector<10x4xf32>, vector<4x32xf32>, vector<10x32xf32> -> vector<10x32xf32>
    %96 = arith.mulf %36, %95 : vector<10x32xf32>
    %97 = arith.addf %94, %96 : vector<10x32xf32>
    %cst_51 = arith.constant dense<0.000000e+00> : vector<10x32xf32>
    %98 = tpu.matmul %87, %0, %cst_51 {dimension_numbers = #tpu.dot_dimension_numbers<[1], [0], [0], [1], [0, 0, 1, 1], [], []>} : vector<10x4xf32>, vector<4x32xf32>, vector<10x32xf32> -> vector<10x32xf32>
    %99 = arith.mulf %39, %98 : vector<10x32xf32>
    %100 = arith.addf %97, %99 : vector<10x32xf32>
    %101 = arith.mulf %100, %100 : vector<10x32xf32>
    %cst_52 = arith.constant dense<0.000000e+00> : vector<10x4xf32>
    %102 = tpu.matmul %101, %1, %cst_52 {dimension_numbers = #tpu.dot_dimension_numbers<[1], [0], [0], [1], [0, 0, 1, 1], [], []>} : vector<10x32xf32>, vector<32x4xf32>, vector<10x4xf32> -> vector<10x4xf32>
    %cst_53 = arith.constant 1.000000e+00 : f32
    %103 = vector.broadcast %cst_53 : f32 to vector<10x4xf32>
    %104 = arith.addf %103, %102 : vector<10x4xf32>
    %105 = arith.divf %102, %104 : vector<10x4xf32>
    %cst_54 = arith.constant 9.99999993E-9 : f32
    %106 = vector.broadcast %cst_54 : f32 to vector<10x4xf32>
    %107 = arith.addf %102, %106 : vector<10x4xf32>
    %108 = math.sqrt %107 : vector<10x4xf32>
    %109 = arith.divf %105, %108 : vector<10x4xf32>
    %cst_55 = arith.constant dense<0.000000e+00> : vector<10x32xf32>
    %110 = tpu.matmul %109, %0, %cst_55 {dimension_numbers = #tpu.dot_dimension_numbers<[1], [0], [0], [1], [0, 0, 1, 1], [], []>} : vector<10x4xf32>, vector<4x32xf32>, vector<10x32xf32> -> vector<10x32xf32>
    %111 = arith.mulf %100, %110 : vector<10x32xf32>
    %112 = arith.mulf %30, %111 : vector<10x32xf32>
    %cst_56 = arith.constant dense<0.000000e+00> : vector<10x4xf32>
    %113 = tpu.matmul %112, %1, %cst_56 {dimension_numbers = #tpu.dot_dimension_numbers<[1], [0], [0], [1], [0, 0, 1, 1], [], []>} : vector<10x32xf32>, vector<32x4xf32>, vector<10x4xf32> -> vector<10x4xf32>
    %114 = arith.addf %40, %113 : vector<10x4xf32>
    %115 = arith.mulf %33, %111 : vector<10x32xf32>
    %cst_57 = arith.constant dense<0.000000e+00> : vector<10x4xf32>
    %116 = tpu.matmul %115, %1, %cst_57 {dimension_numbers = #tpu.dot_dimension_numbers<[1], [0], [0], [1], [0, 0, 1, 1], [], []>} : vector<10x32xf32>, vector<32x4xf32>, vector<10x4xf32> -> vector<10x4xf32>
    %117 = arith.addf %41, %116 : vector<10x4xf32>
    %118 = arith.mulf %36, %111 : vector<10x32xf32>
    %cst_58 = arith.constant dense<0.000000e+00> : vector<10x4xf32>
    %119 = tpu.matmul %118, %1, %cst_58 {dimension_numbers = #tpu.dot_dimension_numbers<[1], [0], [0], [1], [0, 0, 1, 1], [], []>} : vector<10x32xf32>, vector<32x4xf32>, vector<10x4xf32> -> vector<10x4xf32>
    %120 = arith.addf %42, %119 : vector<10x4xf32>
    %121 = arith.mulf %39, %111 : vector<10x32xf32>
    %cst_59 = arith.constant dense<0.000000e+00> : vector<10x4xf32>
    %122 = tpu.matmul %121, %1, %cst_59 {dimension_numbers = #tpu.dot_dimension_numbers<[1], [0], [0], [1], [0, 0, 1, 1], [], []>} : vector<10x32xf32>, vector<32x4xf32>, vector<10x4xf32> -> vector<10x4xf32>
    %123 = arith.addf %43, %122 : vector<10x4xf32>
    %cst_60 = arith.constant dense<0xFF800000> : vector<10xf32>
    %124 = vector.multi_reduction <maximumf>, %114, %cst_60 [1] : vector<10x4xf32> to vector<10xf32>
    %cst_61 = arith.constant 0xFF800000 : f32
    %125 = vector.broadcast %cst_61 : f32 to vector<10xf32>
    %126 = arith.maximumf %125, %124 : vector<10xf32>
    %127 = vector.shape_cast %126 : vector<10xf32> to vector<10x1xf32>
    %128 = vector.broadcast %127 : vector<10x1xf32> to vector<10x4xf32>
    %129 = arith.subf %114, %128 : vector<10x4xf32>
    %130 = math.exp %129 : vector<10x4xf32>
    %cst_62 = arith.constant dense<0.000000e+00> : vector<10xf32>
    %131 = vector.multi_reduction <add>, %130, %cst_62 [1] : vector<10x4xf32> to vector<10xf32>
    %132 = vector.shape_cast %131 : vector<10xf32> to vector<10x1xf32>
    %133 = vector.broadcast %132 : vector<10x1xf32> to vector<10x4xf32>
    %134 = arith.divf %130, %133 : vector<10x4xf32>
    %cst_63 = arith.constant dense<0xFF800000> : vector<10xf32>
    %135 = vector.multi_reduction <maximumf>, %117, %cst_63 [1] : vector<10x4xf32> to vector<10xf32>
    %cst_64 = arith.constant 0xFF800000 : f32
    %136 = vector.broadcast %cst_64 : f32 to vector<10xf32>
    %137 = arith.maximumf %136, %135 : vector<10xf32>
    %138 = vector.shape_cast %137 : vector<10xf32> to vector<10x1xf32>
    %139 = vector.broadcast %138 : vector<10x1xf32> to vector<10x4xf32>
    %140 = arith.subf %117, %139 : vector<10x4xf32>
    %141 = math.exp %140 : vector<10x4xf32>
    %cst_65 = arith.constant dense<0.000000e+00> : vector<10xf32>
    %142 = vector.multi_reduction <add>, %141, %cst_65 [1] : vector<10x4xf32> to vector<10xf32>
    %143 = vector.shape_cast %142 : vector<10xf32> to vector<10x1xf32>
    %144 = vector.broadcast %143 : vector<10x1xf32> to vector<10x4xf32>
    %145 = arith.divf %141, %144 : vector<10x4xf32>
    %cst_66 = arith.constant dense<0xFF800000> : vector<10xf32>
    %146 = vector.multi_reduction <maximumf>, %120, %cst_66 [1] : vector<10x4xf32> to vector<10xf32>
    %cst_67 = arith.constant 0xFF800000 : f32
    %147 = vector.broadcast %cst_67 : f32 to vector<10xf32>
    %148 = arith.maximumf %147, %146 : vector<10xf32>
    %149 = vector.shape_cast %148 : vector<10xf32> to vector<10x1xf32>
    %150 = vector.broadcast %149 : vector<10x1xf32> to vector<10x4xf32>
    %151 = arith.subf %120, %150 : vector<10x4xf32>
    %152 = math.exp %151 : vector<10x4xf32>
    %cst_68 = arith.constant dense<0.000000e+00> : vector<10xf32>
    %153 = vector.multi_reduction <add>, %152, %cst_68 [1] : vector<10x4xf32> to vector<10xf32>
    %154 = vector.shape_cast %153 : vector<10xf32> to vector<10x1xf32>
    %155 = vector.broadcast %154 : vector<10x1xf32> to vector<10x4xf32>
    %156 = arith.divf %152, %155 : vector<10x4xf32>
    %cst_69 = arith.constant dense<0xFF800000> : vector<10xf32>
    %157 = vector.multi_reduction <maximumf>, %123, %cst_69 [1] : vector<10x4xf32> to vector<10xf32>
    %cst_70 = arith.constant 0xFF800000 : f32
    %158 = vector.broadcast %cst_70 : f32 to vector<10xf32>
    %159 = arith.maximumf %158, %157 : vector<10xf32>
    %160 = vector.shape_cast %159 : vector<10xf32> to vector<10x1xf32>
    %161 = vector.broadcast %160 : vector<10x1xf32> to vector<10x4xf32>
    %162 = arith.subf %123, %161 : vector<10x4xf32>
    %163 = math.exp %162 : vector<10x4xf32>
    %cst_71 = arith.constant dense<0.000000e+00> : vector<10xf32>
    %164 = vector.multi_reduction <add>, %163, %cst_71 [1] : vector<10x4xf32> to vector<10xf32>
    %165 = vector.shape_cast %164 : vector<10xf32> to vector<10x1xf32>
    %166 = vector.broadcast %165 : vector<10x1xf32> to vector<10x4xf32>
    %167 = arith.divf %163, %166 : vector<10x4xf32>
    %cst_72 = arith.constant 0.000000e+00 : f32
    %168 = vector.broadcast %cst_72 : f32 to vector<10x32xf32>
    %cst_73 = arith.constant dense<0.000000e+00> : vector<10x32xf32>
    %169 = tpu.matmul %134, %0, %cst_73 {dimension_numbers = #tpu.dot_dimension_numbers<[1], [0], [0], [1], [0, 0, 1, 1], [], []>} : vector<10x4xf32>, vector<4x32xf32>, vector<10x32xf32> -> vector<10x32xf32>
    %170 = arith.mulf %30, %169 : vector<10x32xf32>
    %171 = arith.addf %168, %170 : vector<10x32xf32>
    %cst_74 = arith.constant dense<0.000000e+00> : vector<10x32xf32>
    %172 = tpu.matmul %145, %0, %cst_74 {dimension_numbers = #tpu.dot_dimension_numbers<[1], [0], [0], [1], [0, 0, 1, 1], [], []>} : vector<10x4xf32>, vector<4x32xf32>, vector<10x32xf32> -> vector<10x32xf32>
    %173 = arith.mulf %33, %172 : vector<10x32xf32>
    %174 = arith.addf %171, %173 : vector<10x32xf32>
    %cst_75 = arith.constant dense<0.000000e+00> : vector<10x32xf32>
    %175 = tpu.matmul %156, %0, %cst_75 {dimension_numbers = #tpu.dot_dimension_numbers<[1], [0], [0], [1], [0, 0, 1, 1], [], []>} : vector<10x4xf32>, vector<4x32xf32>, vector<10x32xf32> -> vector<10x32xf32>
    %176 = arith.mulf %36, %175 : vector<10x32xf32>
    %177 = arith.addf %174, %176 : vector<10x32xf32>
    %cst_76 = arith.constant dense<0.000000e+00> : vector<10x32xf32>
    %178 = tpu.matmul %167, %0, %cst_76 {dimension_numbers = #tpu.dot_dimension_numbers<[1], [0], [0], [1], [0, 0, 1, 1], [], []>} : vector<10x4xf32>, vector<4x32xf32>, vector<10x32xf32> -> vector<10x32xf32>
    %179 = arith.mulf %39, %178 : vector<10x32xf32>
    %180 = arith.addf %177, %179 : vector<10x32xf32>
    %181 = arith.mulf %180, %180 : vector<10x32xf32>
    %cst_77 = arith.constant dense<0.000000e+00> : vector<10x4xf32>
    %182 = tpu.matmul %181, %1, %cst_77 {dimension_numbers = #tpu.dot_dimension_numbers<[1], [0], [0], [1], [0, 0, 1, 1], [], []>} : vector<10x32xf32>, vector<32x4xf32>, vector<10x4xf32> -> vector<10x4xf32>
    %cst_78 = arith.constant 1.000000e+00 : f32
    %183 = vector.broadcast %cst_78 : f32 to vector<10x4xf32>
    %184 = arith.addf %183, %182 : vector<10x4xf32>
    %185 = arith.divf %182, %184 : vector<10x4xf32>
    %cst_79 = arith.constant 9.99999993E-9 : f32
    %186 = vector.broadcast %cst_79 : f32 to vector<10x4xf32>
    %187 = arith.addf %182, %186 : vector<10x4xf32>
    %188 = math.sqrt %187 : vector<10x4xf32>
    %189 = arith.divf %185, %188 : vector<10x4xf32>
    %cst_80 = arith.constant dense<0.000000e+00> : vector<10x32xf32>
    %190 = tpu.matmul %189, %0, %cst_80 {dimension_numbers = #tpu.dot_dimension_numbers<[1], [0], [0], [1], [0, 0, 1, 1], [], []>} : vector<10x4xf32>, vector<4x32xf32>, vector<10x32xf32> -> vector<10x32xf32>
    %191 = arith.mulf %180, %190 : vector<10x32xf32>
    %c0_81 = arith.constant 0 : index
    %c0_82 = arith.constant 0 : index
    %192 = vector.load %arg35[%c0_81, %c0_82] : memref<10x32xf32, #tpu.memory_space<vmem>>, vector<10x32xf32>
    tpu.vector_store %arg35[%c0_81, %c0_82], %191 {strides = array<i32>} : memref<10x32xf32, #tpu.memory_space<vmem>>, vector<10x32xf32>,
    %c0_83 = arith.constant 0 : index
    %c0_84 = arith.constant 0 : index
    %193 = vector.load %arg2[%c0_83, %c0_84] : memref<16x10xf32, #tpu.memory_space<vmem>>, vector<16x10xf32>
    %cst_85 = arith.constant dense<0.000000e+00> : vector<16x32xf32>
    %194 = tpu.matmul %193, %191, %cst_85 {dimension_numbers = #tpu.dot_dimension_numbers<[1], [0], [0], [1], [0, 0, 1, 1], [], []>} : vector<16x10xf32>, vector<10x32xf32>, vector<16x32xf32> -> vector<16x32xf32>
    %c0_86 = arith.constant 0 : index
    %c0_87 = arith.constant 0 : index
    %195 = vector.load %arg1[%c0_86, %c0_87] : memref<16x16xf32, #tpu.memory_space<vmem>>, vector<16x16xf32>
    %cst_88 = arith.constant dense<0.000000e+00> : vector<16x32xf32>
    %196 = tpu.matmul %195, %194, %cst_88 {dimension_numbers = #tpu.dot_dimension_numbers<[1], [0], [0], [1], [0, 0, 1, 1], [], []>} : vector<16x16xf32>, vector<16x32xf32>, vector<16x32xf32> -> vector<16x32xf32>
    %c0_89 = arith.constant 0 : index
    %c0_90 = arith.constant 0 : index
    %197 = vector.load %arg4[%c0_89, %c0_90] : memref<6x16xf32, #tpu.memory_space<vmem>>, vector<6x16xf32>
    %cst_91 = arith.constant dense<0.000000e+00> : vector<6x32xf32>
    %198 = tpu.matmul %197, %196, %cst_91 {dimension_numbers = #tpu.dot_dimension_numbers<[1], [0], [0], [1], [0, 0, 1, 1], [], []>} : vector<6x16xf32>, vector<16x32xf32>, vector<6x32xf32> -> vector<6x32xf32>
    %199 = vector.extract_strided_slice %194 {offsets = [0, 0], sizes = [6, 32], strides = [1, 1]} : vector<16x32xf32> to vector<6x32xf32>
    %200 = arith.addf %199, %198 : vector<6x32xf32>
    %cst_92 = arith.constant 5.000000e-01 : f32
    %201 = vector.broadcast %cst_92 : f32 to vector<6x32xf32>
    %202 = arith.mulf %201, %200 : vector<6x32xf32>
    %c0_93 = arith.constant 0 : index
    %c0_94 = arith.constant 0 : index
    %203 = vector.load %arg33[%c0_93, %c0_94] : memref<2x6xf32, #tpu.memory_space<vmem>>, vector<2x6xf32>
    %cst_95 = arith.constant dense<0.000000e+00> : vector<2x32xf32>
    %204 = tpu.matmul %203, %202, %cst_95 {dimension_numbers = #tpu.dot_dimension_numbers<[1], [0], [0], [1], [0, 0, 1, 1], [], []>} : vector<2x6xf32>, vector<6x32xf32>, vector<2x32xf32> -> vector<2x32xf32>
    %c0_96 = arith.constant 0 : index
    %c0_97 = arith.constant 0 : index
    %205 = vector.load %arg38[%c0_96, %c0_97] : memref<2x32xf32, #tpu.memory_space<vmem>>, vector<2x32xf32>
    tpu.vector_store %arg38[%c0_96, %c0_97], %204 {strides = array<i32>} : memref<2x32xf32, #tpu.memory_space<vmem>>, vector<2x32xf32>,
    %cst_98 = arith.constant dense<0.000000e+00> : vector<16x32xf32>
    %206 = tpu.matmul %2, %191, %cst_98 {dimension_numbers = #tpu.dot_dimension_numbers<[1], [0], [0], [1], [0, 0, 1, 1], [], []>} : vector<16x10xf32>, vector<10x32xf32>, vector<16x32xf32> -> vector<16x32xf32>
    %c0_99 = arith.constant 0 : index
    %c0_100 = arith.constant 0 : index
    %207 = vector.load %arg32[%c0_99, %c0_100] : memref<16x10xf32, #tpu.memory_space<vmem>>, vector<16x10xf32>
    %cst_101 = arith.constant dense<0.000000e+00> : vector<16x32xf32>
    %208 = tpu.matmul %207, %191, %cst_101 {dimension_numbers = #tpu.dot_dimension_numbers<[1], [0], [0], [1], [0, 0, 1, 1], [], []>} : vector<16x10xf32>, vector<10x32xf32>, vector<16x32xf32> -> vector<16x32xf32>
    %cst_102 = arith.constant dense<0.000000e+00> : vector<16xf32>
    %209 = vector.multi_reduction <add>, %2, %cst_102 [1] : vector<16x10xf32> to vector<16xf32>
    %210 = vector.shape_cast %209 : vector<16xf32> to vector<16x1xf32>
    %c0_103 = arith.constant 0 : index
    %c0_104 = arith.constant 0 : index
    %211 = vector.load %arg11[%c0_103, %c0_104] : memref<16x32xf32, #tpu.memory_space<vmem>>, vector<16x32xf32>
    %212 = arith.addf %206, %211 : vector<16x32xf32>
    %213 = vector.broadcast %210 : vector<16x1xf32> to vector<16x32xf32>
    %214 = arith.mulf %212, %213 : vector<16x32xf32>
    %c0_105 = arith.constant 0 : index
    %c0_106 = arith.constant 0 : index
    %215 = vector.load %arg12[%c0_105, %c0_106] : memref<8x8xf32, #tpu.memory_space<vmem>>, vector<8x8xf32>
    %c0_107 = arith.constant 0 : index
    %c0_108 = arith.constant 0 : index
    %c0_109 = arith.constant 0 : index
    %216 = vector.load %arg14[%c0_107, %c0_108, %c0_109] : memref<2x32x96xf32, #tpu.memory_space<vmem>>, vector<1x32x96xf32>
    %217 = vector.shape_cast %216 : vector<1x32x96xf32> to vector<32x96xf32>
    %cst_110 = arith.constant dense<0.000000e+00> : vector<16x96xf32>
    %218 = tpu.matmul %214, %217, %cst_110 {dimension_numbers = #tpu.dot_dimension_numbers<[1], [0], [0], [1], [0, 0, 1, 1], [], []>} : vector<16x32xf32>, vector<32x96xf32>, vector<16x96xf32> -> vector<16x96xf32>
    %219 = vector.extract_strided_slice %218 {offsets = [0, 0], sizes = [16, 32], strides = [1, 1]} : vector<16x96xf32> to vector<16x32xf32>
    %220 = vector.extract_strided_slice %218 {offsets = [0, 32], sizes = [16, 32], strides = [1, 1]} : vector<16x96xf32> to vector<16x32xf32>
    %221 = vector.extract_strided_slice %218 {offsets = [0, 64], sizes = [16, 32], strides = [1, 1]} : vector<16x96xf32> to vector<16x32xf32>
    %222 = vector.extract_strided_slice %219 {offsets = [0, 0], sizes = [8, 8], strides = [1, 1]} : vector<16x32xf32> to vector<8x8xf32>
    %223 = vector.extract_strided_slice %220 {offsets = [0, 0], sizes = [8, 8], strides = [1, 1]} : vector<16x32xf32> to vector<8x8xf32>
    %224 = vector.extract_strided_slice %221 {offsets = [0, 0], sizes = [8, 8], strides = [1, 1]} : vector<16x32xf32> to vector<8x8xf32>
    %cst_111 = arith.constant dense<0.000000e+00> : vector<8x8xf32>
    %225 = tpu.matmul %222, %223, %cst_111 {dimension_numbers = #tpu.dot_dimension_numbers<[1], [1], [0], [0], [0, 0, 1, 0], [], []>} : vector<8x8xf32>, vector<8x8xf32>, vector<8x8xf32> -> vector<8x8xf32>
    %cst_112 = arith.constant 0.353553385 : f32
    %226 = vector.broadcast %cst_112 : f32 to vector<8x8xf32>
    %227 = arith.mulf %225, %226 : vector<8x8xf32>
    %228 = arith.addf %227, %215 : vector<8x8xf32>
    %cst_113 = arith.constant dense<0xFF800000> : vector<8xf32>
    %229 = vector.multi_reduction <maximumf>, %228, %cst_113 [1] : vector<8x8xf32> to vector<8xf32>
    %230 = vector.shape_cast %229 : vector<8xf32> to vector<8x1xf32>
    %231 = vector.broadcast %230 : vector<8x1xf32> to vector<8x8xf32>
    %232 = arith.subf %228, %231 : vector<8x8xf32>
    %233 = math.exp %232 : vector<8x8xf32>
    %cst_114 = arith.constant dense<0.000000e+00> : vector<8xf32>
    %234 = vector.multi_reduction <add>, %233, %cst_114 [1] : vector<8x8xf32> to vector<8xf32>
    %235 = vector.shape_cast %234 : vector<8xf32> to vector<8x1xf32>
    %236 = vector.broadcast %235 : vector<8x1xf32> to vector<8x8xf32>
    %237 = arith.divf %233, %236 : vector<8x8xf32>
    %cst_115 = arith.constant dense<0.000000e+00> : vector<8x8xf32>
    %238 = tpu.matmul %237, %224, %cst_115 {dimension_numbers = #tpu.dot_dimension_numbers<[1], [0], [0], [1], [0, 0, 1, 1], [], []>} : vector<8x8xf32>, vector<8x8xf32>, vector<8x8xf32> -> vector<8x8xf32>
    %239 = vector.extract_strided_slice %219 {offsets = [0, 8], sizes = [8, 8], strides = [1, 1]} : vector<16x32xf32> to vector<8x8xf32>
    %240 = vector.extract_strided_slice %220 {offsets = [0, 8], sizes = [8, 8], strides = [1, 1]} : vector<16x32xf32> to vector<8x8xf32>
    %241 = vector.extract_strided_slice %221 {offsets = [0, 8], sizes = [8, 8], strides = [1, 1]} : vector<16x32xf32> to vector<8x8xf32>
    %cst_116 = arith.constant dense<0.000000e+00> : vector<8x8xf32>
    %242 = tpu.matmul %239, %240, %cst_116 {dimension_numbers = #tpu.dot_dimension_numbers<[1], [1], [0], [0], [0, 0, 1, 0], [], []>} : vector<8x8xf32>, vector<8x8xf32>, vector<8x8xf32> -> vector<8x8xf32>
    %cst_117 = arith.constant 0.353553385 : f32
    %243 = vector.broadcast %cst_117 : f32 to vector<8x8xf32>
    %244 = arith.mulf %242, %243 : vector<8x8xf32>
    %245 = arith.addf %244, %215 : vector<8x8xf32>
    %cst_118 = arith.constant dense<0xFF800000> : vector<8xf32>
    %246 = vector.multi_reduction <maximumf>, %245, %cst_118 [1] : vector<8x8xf32> to vector<8xf32>
    %247 = vector.shape_cast %246 : vector<8xf32> to vector<8x1xf32>
    %248 = vector.broadcast %247 : vector<8x1xf32> to vector<8x8xf32>
    %249 = arith.subf %245, %248 : vector<8x8xf32>
    %250 = math.exp %249 : vector<8x8xf32>
    %cst_119 = arith.constant dense<0.000000e+00> : vector<8xf32>
    %251 = vector.multi_reduction <add>, %250, %cst_119 [1] : vector<8x8xf32> to vector<8xf32>
    %252 = vector.shape_cast %251 : vector<8xf32> to vector<8x1xf32>
    %253 = vector.broadcast %252 : vector<8x1xf32> to vector<8x8xf32>
    %254 = arith.divf %250, %253 : vector<8x8xf32>
    %cst_120 = arith.constant dense<0.000000e+00> : vector<8x8xf32>
    %255 = tpu.matmul %254, %241, %cst_120 {dimension_numbers = #tpu.dot_dimension_numbers<[1], [0], [0], [1], [0, 0, 1, 1], [], []>} : vector<8x8xf32>, vector<8x8xf32>, vector<8x8xf32> -> vector<8x8xf32>
    %256 = vector.extract_strided_slice %219 {offsets = [0, 16], sizes = [8, 8], strides = [1, 1]} : vector<16x32xf32> to vector<8x8xf32>
    %257 = vector.extract_strided_slice %220 {offsets = [0, 16], sizes = [8, 8], strides = [1, 1]} : vector<16x32xf32> to vector<8x8xf32>
    %258 = vector.extract_strided_slice %221 {offsets = [0, 16], sizes = [8, 8], strides = [1, 1]} : vector<16x32xf32> to vector<8x8xf32>
    %cst_121 = arith.constant dense<0.000000e+00> : vector<8x8xf32>
    %259 = tpu.matmul %256, %257, %cst_121 {dimension_numbers = #tpu.dot_dimension_numbers<[1], [1], [0], [0], [0, 0, 1, 0], [], []>} : vector<8x8xf32>, vector<8x8xf32>, vector<8x8xf32> -> vector<8x8xf32>
    %cst_122 = arith.constant 0.353553385 : f32
    %260 = vector.broadcast %cst_122 : f32 to vector<8x8xf32>
    %261 = arith.mulf %259, %260 : vector<8x8xf32>
    %262 = arith.addf %261, %215 : vector<8x8xf32>
    %cst_123 = arith.constant dense<0xFF800000> : vector<8xf32>
    %263 = vector.multi_reduction <maximumf>, %262, %cst_123 [1] : vector<8x8xf32> to vector<8xf32>
    %264 = vector.shape_cast %263 : vector<8xf32> to vector<8x1xf32>
    %265 = vector.broadcast %264 : vector<8x1xf32> to vector<8x8xf32>
    %266 = arith.subf %262, %265 : vector<8x8xf32>
    %267 = math.exp %266 : vector<8x8xf32>
    %cst_124 = arith.constant dense<0.000000e+00> : vector<8xf32>
    %268 = vector.multi_reduction <add>, %267, %cst_124 [1] : vector<8x8xf32> to vector<8xf32>
    %269 = vector.shape_cast %268 : vector<8xf32> to vector<8x1xf32>
    %270 = vector.broadcast %269 : vector<8x1xf32> to vector<8x8xf32>
    %271 = arith.divf %267, %270 : vector<8x8xf32>
    %cst_125 = arith.constant dense<0.000000e+00> : vector<8x8xf32>
    %272 = tpu.matmul %271, %258, %cst_125 {dimension_numbers = #tpu.dot_dimension_numbers<[1], [0], [0], [1], [0, 0, 1, 1], [], []>} : vector<8x8xf32>, vector<8x8xf32>, vector<8x8xf32> -> vector<8x8xf32>
    %273 = vector.extract_strided_slice %219 {offsets = [0, 24], sizes = [8, 8], strides = [1, 1]} : vector<16x32xf32> to vector<8x8xf32>
    %274 = vector.extract_strided_slice %220 {offsets = [0, 24], sizes = [8, 8], strides = [1, 1]} : vector<16x32xf32> to vector<8x8xf32>
    %275 = vector.extract_strided_slice %221 {offsets = [0, 24], sizes = [8, 8], strides = [1, 1]} : vector<16x32xf32> to vector<8x8xf32>
    %cst_126 = arith.constant dense<0.000000e+00> : vector<8x8xf32>
    %276 = tpu.matmul %273, %274, %cst_126 {dimension_numbers = #tpu.dot_dimension_numbers<[1], [1], [0], [0], [0, 0, 1, 0], [], []>} : vector<8x8xf32>, vector<8x8xf32>, vector<8x8xf32> -> vector<8x8xf32>
    %cst_127 = arith.constant 0.353553385 : f32
    %277 = vector.broadcast %cst_127 : f32 to vector<8x8xf32>
    %278 = arith.mulf %276, %277 : vector<8x8xf32>
    %279 = arith.addf %278, %215 : vector<8x8xf32>
    %cst_128 = arith.constant dense<0xFF800000> : vector<8xf32>
    %280 = vector.multi_reduction <maximumf>, %279, %cst_128 [1] : vector<8x8xf32> to vector<8xf32>
    %281 = vector.shape_cast %280 : vector<8xf32> to vector<8x1xf32>
    %282 = vector.broadcast %281 : vector<8x1xf32> to vector<8x8xf32>
    %283 = arith.subf %279, %282 : vector<8x8xf32>
    %284 = math.exp %283 : vector<8x8xf32>
    %cst_129 = arith.constant dense<0.000000e+00> : vector<8xf32>
    %285 = vector.multi_reduction <add>, %284, %cst_129 [1] : vector<8x8xf32> to vector<8xf32>
    %286 = vector.shape_cast %285 : vector<8xf32> to vector<8x1xf32>
    %287 = vector.broadcast %286 : vector<8x1xf32> to vector<8x8xf32>
    %288 = arith.divf %284, %287 : vector<8x8xf32>
    %cst_130 = arith.constant dense<0.000000e+00> : vector<8x8xf32>
    %289 = tpu.matmul %288, %275, %cst_130 {dimension_numbers = #tpu.dot_dimension_numbers<[1], [0], [0], [1], [0, 0, 1, 1], [], []>} : vector<8x8xf32>, vector<8x8xf32>, vector<8x8xf32> -> vector<8x8xf32>
    %290 = tpu.concatenate %238, %255, %272, %289 in 1 : vector<8x8xf32>, vector<8x8xf32>, vector<8x8xf32>, vector<8x8xf32> -> vector<8x32xf32>
    %291 = vector.extract_strided_slice %219 {offsets = [8, 0], sizes = [8, 8], strides = [1, 1]} : vector<16x32xf32> to vector<8x8xf32>
    %292 = vector.extract_strided_slice %220 {offsets = [8, 0], sizes = [8, 8], strides = [1, 1]} : vector<16x32xf32> to vector<8x8xf32>
    %293 = vector.extract_strided_slice %221 {offsets = [8, 0], sizes = [8, 8], strides = [1, 1]} : vector<16x32xf32> to vector<8x8xf32>
    %cst_131 = arith.constant dense<0.000000e+00> : vector<8x8xf32>
    %294 = tpu.matmul %291, %292, %cst_131 {dimension_numbers = #tpu.dot_dimension_numbers<[1], [1], [0], [0], [0, 0, 1, 0], [], []>} : vector<8x8xf32>, vector<8x8xf32>, vector<8x8xf32> -> vector<8x8xf32>
    %cst_132 = arith.constant 0.353553385 : f32
    %295 = vector.broadcast %cst_132 : f32 to vector<8x8xf32>
    %296 = arith.mulf %294, %295 : vector<8x8xf32>
    %297 = arith.addf %296, %215 : vector<8x8xf32>
    %cst_133 = arith.constant dense<0xFF800000> : vector<8xf32>
    %298 = vector.multi_reduction <maximumf>, %297, %cst_133 [1] : vector<8x8xf32> to vector<8xf32>
    %299 = vector.shape_cast %298 : vector<8xf32> to vector<8x1xf32>
    %300 = vector.broadcast %299 : vector<8x1xf32> to vector<8x8xf32>
    %301 = arith.subf %297, %300 : vector<8x8xf32>
    %302 = math.exp %301 : vector<8x8xf32>
    %cst_134 = arith.constant dense<0.000000e+00> : vector<8xf32>
    %303 = vector.multi_reduction <add>, %302, %cst_134 [1] : vector<8x8xf32> to vector<8xf32>
    %304 = vector.shape_cast %303 : vector<8xf32> to vector<8x1xf32>
    %305 = vector.broadcast %304 : vector<8x1xf32> to vector<8x8xf32>
    %306 = arith.divf %302, %305 : vector<8x8xf32>
    %cst_135 = arith.constant dense<0.000000e+00> : vector<8x8xf32>
    %307 = tpu.matmul %306, %293, %cst_135 {dimension_numbers = #tpu.dot_dimension_numbers<[1], [0], [0], [1], [0, 0, 1, 1], [], []>} : vector<8x8xf32>, vector<8x8xf32>, vector<8x8xf32> -> vector<8x8xf32>
    %308 = vector.extract_strided_slice %219 {offsets = [8, 8], sizes = [8, 8], strides = [1, 1]} : vector<16x32xf32> to vector<8x8xf32>
    %309 = vector.extract_strided_slice %220 {offsets = [8, 8], sizes = [8, 8], strides = [1, 1]} : vector<16x32xf32> to vector<8x8xf32>
    %310 = vector.extract_strided_slice %221 {offsets = [8, 8], sizes = [8, 8], strides = [1, 1]} : vector<16x32xf32> to vector<8x8xf32>
    %cst_136 = arith.constant dense<0.000000e+00> : vector<8x8xf32>
    %311 = tpu.matmul %308, %309, %cst_136 {dimension_numbers = #tpu.dot_dimension_numbers<[1], [1], [0], [0], [0, 0, 1, 0], [], []>} : vector<8x8xf32>, vector<8x8xf32>, vector<8x8xf32> -> vector<8x8xf32>
    %cst_137 = arith.constant 0.353553385 : f32
    %312 = vector.broadcast %cst_137 : f32 to vector<8x8xf32>
    %313 = arith.mulf %311, %312 : vector<8x8xf32>
    %314 = arith.addf %313, %215 : vector<8x8xf32>
    %cst_138 = arith.constant dense<0xFF800000> : vector<8xf32>
    %315 = vector.multi_reduction <maximumf>, %314, %cst_138 [1] : vector<8x8xf32> to vector<8xf32>
    %316 = vector.shape_cast %315 : vector<8xf32> to vector<8x1xf32>
    %317 = vector.broadcast %316 : vector<8x1xf32> to vector<8x8xf32>
    %318 = arith.subf %314, %317 : vector<8x8xf32>
    %319 = math.exp %318 : vector<8x8xf32>
    %cst_139 = arith.constant dense<0.000000e+00> : vector<8xf32>
    %320 = vector.multi_reduction <add>, %319, %cst_139 [1] : vector<8x8xf32> to vector<8xf32>
    %321 = vector.shape_cast %320 : vector<8xf32> to vector<8x1xf32>
    %322 = vector.broadcast %321 : vector<8x1xf32> to vector<8x8xf32>
    %323 = arith.divf %319, %322 : vector<8x8xf32>
    %cst_140 = arith.constant dense<0.000000e+00> : vector<8x8xf32>
    %324 = tpu.matmul %323, %310, %cst_140 {dimension_numbers = #tpu.dot_dimension_numbers<[1], [0], [0], [1], [0, 0, 1, 1], [], []>} : vector<8x8xf32>, vector<8x8xf32>, vector<8x8xf32> -> vector<8x8xf32>
    %325 = vector.extract_strided_slice %219 {offsets = [8, 16], sizes = [8, 8], strides = [1, 1]} : vector<16x32xf32> to vector<8x8xf32>
    %326 = vector.extract_strided_slice %220 {offsets = [8, 16], sizes = [8, 8], strides = [1, 1]} : vector<16x32xf32> to vector<8x8xf32>
    %327 = vector.extract_strided_slice %221 {offsets = [8, 16], sizes = [8, 8], strides = [1, 1]} : vector<16x32xf32> to vector<8x8xf32>
    %cst_141 = arith.constant dense<0.000000e+00> : vector<8x8xf32>
    %328 = tpu.matmul %325, %326, %cst_141 {dimension_numbers = #tpu.dot_dimension_numbers<[1], [1], [0], [0], [0, 0, 1, 0], [], []>} : vector<8x8xf32>, vector<8x8xf32>, vector<8x8xf32> -> vector<8x8xf32>
    %cst_142 = arith.constant 0.353553385 : f32
    %329 = vector.broadcast %cst_142 : f32 to vector<8x8xf32>
    %330 = arith.mulf %328, %329 : vector<8x8xf32>
    %331 = arith.addf %330, %215 : vector<8x8xf32>
    %cst_143 = arith.constant dense<0xFF800000> : vector<8xf32>
    %332 = vector.multi_reduction <maximumf>, %331, %cst_143 [1] : vector<8x8xf32> to vector<8xf32>
    %333 = vector.shape_cast %332 : vector<8xf32> to vector<8x1xf32>
    %334 = vector.broadcast %333 : vector<8x1xf32> to vector<8x8xf32>
    %335 = arith.subf %331, %334 : vector<8x8xf32>
    %336 = math.exp %335 : vector<8x8xf32>
    %cst_144 = arith.constant dense<0.000000e+00> : vector<8xf32>
    %337 = vector.multi_reduction <add>, %336, %cst_144 [1] : vector<8x8xf32> to vector<8xf32>
    %338 = vector.shape_cast %337 : vector<8xf32> to vector<8x1xf32>
    %339 = vector.broadcast %338 : vector<8x1xf32> to vector<8x8xf32>
    %340 = arith.divf %336, %339 : vector<8x8xf32>
    %cst_145 = arith.constant dense<0.000000e+00> : vector<8x8xf32>
    %341 = tpu.matmul %340, %327, %cst_145 {dimension_numbers = #tpu.dot_dimension_numbers<[1], [0], [0], [1], [0, 0, 1, 1], [], []>} : vector<8x8xf32>, vector<8x8xf32>, vector<8x8xf32> -> vector<8x8xf32>
    %342 = vector.extract_strided_slice %219 {offsets = [8, 24], sizes = [8, 8], strides = [1, 1]} : vector<16x32xf32> to vector<8x8xf32>
    %343 = vector.extract_strided_slice %220 {offsets = [8, 24], sizes = [8, 8], strides = [1, 1]} : vector<16x32xf32> to vector<8x8xf32>
    %344 = vector.extract_strided_slice %221 {offsets = [8, 24], sizes = [8, 8], strides = [1, 1]} : vector<16x32xf32> to vector<8x8xf32>
    %cst_146 = arith.constant dense<0.000000e+00> : vector<8x8xf32>
    %345 = tpu.matmul %342, %343, %cst_146 {dimension_numbers = #tpu.dot_dimension_numbers<[1], [1], [0], [0], [0, 0, 1, 0], [], []>} : vector<8x8xf32>, vector<8x8xf32>, vector<8x8xf32> -> vector<8x8xf32>
    %cst_147 = arith.constant 0.353553385 : f32
    %346 = vector.broadcast %cst_147 : f32 to vector<8x8xf32>
    %347 = arith.mulf %345, %346 : vector<8x8xf32>
    %348 = arith.addf %347, %215 : vector<8x8xf32>
    %cst_148 = arith.constant dense<0xFF800000> : vector<8xf32>
    %349 = vector.multi_reduction <maximumf>, %348, %cst_148 [1] : vector<8x8xf32> to vector<8xf32>
    %350 = vector.shape_cast %349 : vector<8xf32> to vector<8x1xf32>
    %351 = vector.broadcast %350 : vector<8x1xf32> to vector<8x8xf32>
    %352 = arith.subf %348, %351 : vector<8x8xf32>
    %353 = math.exp %352 : vector<8x8xf32>
    %cst_149 = arith.constant dense<0.000000e+00> : vector<8xf32>
    %354 = vector.multi_reduction <add>, %353, %cst_149 [1] : vector<8x8xf32> to vector<8xf32>
    %355 = vector.shape_cast %354 : vector<8xf32> to vector<8x1xf32>
    %356 = vector.broadcast %355 : vector<8x1xf32> to vector<8x8xf32>
    %357 = arith.divf %353, %356 : vector<8x8xf32>
    %cst_150 = arith.constant dense<0.000000e+00> : vector<8x8xf32>
    %358 = tpu.matmul %357, %344, %cst_150 {dimension_numbers = #tpu.dot_dimension_numbers<[1], [0], [0], [1], [0, 0, 1, 1], [], []>} : vector<8x8xf32>, vector<8x8xf32>, vector<8x8xf32> -> vector<8x8xf32>
    %359 = tpu.concatenate %307, %324, %341, %358 in 1 : vector<8x8xf32>, vector<8x8xf32>, vector<8x8xf32>, vector<8x8xf32> -> vector<8x32xf32>
    %360 = tpu.concatenate %290, %359 in 0 : vector<8x32xf32>, vector<8x32xf32> -> vector<16x32xf32>
    %c0_151 = arith.constant 0 : index
    %c0_152 = arith.constant 0 : index
    %c0_153 = arith.constant 0 : index
    %361 = vector.load %arg15[%c0_151, %c0_152, %c0_153] : memref<2x32x64xf32, #tpu.memory_space<vmem>>, vector<1x32x64xf32>
    %362 = vector.shape_cast %361 : vector<1x32x64xf32> to vector<32x64xf32>
    %cst_154 = arith.constant dense<0.000000e+00> : vector<16x64xf32>
    %363 = tpu.matmul %360, %362, %cst_154 {dimension_numbers = #tpu.dot_dimension_numbers<[1], [0], [0], [1], [0, 0, 1, 1], [], []>} : vector<16x32xf32>, vector<32x64xf32>, vector<16x64xf32> -> vector<16x64xf32>
    %c0_155 = arith.constant 0 : index
    %c0_156 = arith.constant 0 : index
    %c0_157 = arith.constant 0 : index
    %364 = vector.load %arg16[%c0_155, %c0_156, %c0_157] : memref<2x1x64xf32, #tpu.memory_space<vmem>>, vector<1x1x64xf32>
    %365 = vector.shape_cast %364 : vector<1x1x64xf32> to vector<1x64xf32>
    %366 = vector.broadcast %365 : vector<1x64xf32> to vector<16x64xf32>
    %367 = arith.addf %363, %366 : vector<16x64xf32>
    %368 = arith.negf %367 : vector<16x64xf32>
    %369 = math.exp %368 : vector<16x64xf32>
    %cst_158 = arith.constant 1.000000e+00 : f32
    %370 = vector.broadcast %cst_158 : f32 to vector<16x64xf32>
    %371 = arith.addf %370, %369 : vector<16x64xf32>
    %372 = arith.divf %370, %371 : vector<16x64xf32>
    %373 = arith.mulf %367, %372 : vector<16x64xf32>
    %c0_159 = arith.constant 0 : index
    %c0_160 = arith.constant 0 : index
    %c0_161 = arith.constant 0 : index
    %374 = vector.load %arg17[%c0_159, %c0_160, %c0_161] : memref<2x64x32xf32, #tpu.memory_space<vmem>>, vector<1x64x32xf32>
    %375 = vector.shape_cast %374 : vector<1x64x32xf32> to vector<64x32xf32>
    %cst_162 = arith.constant dense<0.000000e+00> : vector<16x32xf32>
    %376 = tpu.matmul %373, %375, %cst_162 {dimension_numbers = #tpu.dot_dimension_numbers<[1], [0], [0], [1], [0, 0, 1, 1], [], []>} : vector<16x64xf32>, vector<64x32xf32>, vector<16x32xf32> -> vector<16x32xf32>
    %c0_163 = arith.constant 0 : index
    %c0_164 = arith.constant 0 : index
    %c0_165 = arith.constant 0 : index
    %377 = vector.load %arg18[%c0_163, %c0_164, %c0_165] : memref<2x1x32xf32, #tpu.memory_space<vmem>>, vector<1x1x32xf32>
    %378 = vector.shape_cast %377 : vector<1x1x32xf32> to vector<1x32xf32>
    %379 = vector.broadcast %378 : vector<1x32xf32> to vector<16x32xf32>
    %380 = arith.addf %376, %379 : vector<16x32xf32>
    %381 = arith.addf %214, %380 : vector<16x32xf32>
    %c0_166 = arith.constant 0 : index
    %c0_167 = arith.constant 0 : index
    %c0_168 = arith.constant 0 : index
    %382 = vector.load %arg19[%c0_166, %c0_167, %c0_168] : memref<2x1x32xf32, #tpu.memory_space<vmem>>, vector<1x1x32xf32>
    %383 = vector.shape_cast %382 : vector<1x1x32xf32> to vector<1x32xf32>
    %c0_169 = arith.constant 0 : index
    %c0_170 = arith.constant 0 : index
    %c0_171 = arith.constant 0 : index
    %384 = vector.load %arg20[%c0_169, %c0_170, %c0_171] : memref<2x1x32xf32, #tpu.memory_space<vmem>>, vector<1x1x32xf32>
    %385 = vector.shape_cast %384 : vector<1x1x32xf32> to vector<1x32xf32>
    %cst_172 = arith.constant dense<0.000000e+00> : vector<16xf32>
    %386 = vector.multi_reduction <add>, %381, %cst_172 [1] : vector<16x32xf32> to vector<16xf32>
    %387 = vector.shape_cast %386 : vector<16xf32> to vector<16x1xf32>
    %cst_173 = arith.constant 3.200000e+01 : f32
    %388 = vector.broadcast %cst_173 : f32 to vector<16x1xf32>
    %389 = arith.divf %387, %388 : vector<16x1xf32>
    %390 = vector.broadcast %389 : vector<16x1xf32> to vector<16x32xf32>
    %391 = arith.subf %381, %390 : vector<16x32xf32>
    %392 = arith.mulf %391, %391 : vector<16x32xf32>
    %cst_174 = arith.constant dense<0.000000e+00> : vector<16xf32>
    %393 = vector.multi_reduction <add>, %392, %cst_174 [1] : vector<16x32xf32> to vector<16xf32>
    %394 = vector.shape_cast %393 : vector<16xf32> to vector<16x1xf32>
    %cst_175 = arith.constant 3.200000e+01 : f32
    %395 = vector.broadcast %cst_175 : f32 to vector<16x1xf32>
    %396 = arith.divf %394, %395 : vector<16x1xf32>
    %cst_176 = arith.constant 9.99999993E-9 : f32
    %397 = vector.broadcast %cst_176 : f32 to vector<16x1xf32>
    %398 = arith.addf %396, %397 : vector<16x1xf32>
    %399 = math.rsqrt %398 : vector<16x1xf32>
    %400 = vector.broadcast %399 : vector<16x1xf32> to vector<16x32xf32>
    %401 = arith.mulf %391, %400 : vector<16x32xf32>
    %402 = vector.broadcast %383 : vector<1x32xf32> to vector<16x32xf32>
    %403 = arith.mulf %401, %402 : vector<16x32xf32>
    %404 = vector.broadcast %385 : vector<1x32xf32> to vector<16x32xf32>
    %405 = arith.addf %403, %404 : vector<16x32xf32>
    %c0_177 = arith.constant 0 : index
    %c0_178 = arith.constant 0 : index
    %c0_179 = arith.constant 0 : index
    %406 = vector.load %arg21[%c0_177, %c0_178, %c0_179] : memref<2x32x64xf32, #tpu.memory_space<vmem>>, vector<1x32x64xf32>
    %407 = vector.shape_cast %406 : vector<1x32x64xf32> to vector<32x64xf32>
    %cst_180 = arith.constant dense<0.000000e+00> : vector<16x64xf32>
    %408 = tpu.matmul %405, %407, %cst_180 {dimension_numbers = #tpu.dot_dimension_numbers<[1], [0], [0], [1], [0, 0, 1, 1], [], []>} : vector<16x32xf32>, vector<32x64xf32>, vector<16x64xf32> -> vector<16x64xf32>
    %c0_181 = arith.constant 0 : index
    %c0_182 = arith.constant 0 : index
    %c0_183 = arith.constant 0 : index
    %409 = vector.load %arg22[%c0_181, %c0_182, %c0_183] : memref<2x1x64xf32, #tpu.memory_space<vmem>>, vector<1x1x64xf32>
    %410 = vector.shape_cast %409 : vector<1x1x64xf32> to vector<1x64xf32>
    %411 = vector.broadcast %410 : vector<1x64xf32> to vector<16x64xf32>
    %412 = arith.addf %408, %411 : vector<16x64xf32>
    %cst_184 = arith.constant 0.000000e+00 : f32
    %413 = vector.broadcast %cst_184 : f32 to vector<16x64xf32>
    %414 = arith.maximumf %412, %413 : vector<16x64xf32>
    %c0_185 = arith.constant 0 : index
    %c0_186 = arith.constant 0 : index
    %c0_187 = arith.constant 0 : index
    %415 = vector.load %arg23[%c0_185, %c0_186, %c0_187] : memref<2x64x32xf32, #tpu.memory_space<vmem>>, vector<1x64x32xf32>
    %416 = vector.shape_cast %415 : vector<1x64x32xf32> to vector<64x32xf32>
    %cst_188 = arith.constant dense<0.000000e+00> : vector<16x32xf32>
    %417 = tpu.matmul %414, %416, %cst_188 {dimension_numbers = #tpu.dot_dimension_numbers<[1], [0], [0], [1], [0, 0, 1, 1], [], []>} : vector<16x64xf32>, vector<64x32xf32>, vector<16x32xf32> -> vector<16x32xf32>
    %c0_189 = arith.constant 0 : index
    %c0_190 = arith.constant 0 : index
    %c0_191 = arith.constant 0 : index
    %418 = vector.load %arg24[%c0_189, %c0_190, %c0_191] : memref<2x1x32xf32, #tpu.memory_space<vmem>>, vector<1x1x32xf32>
    %419 = vector.shape_cast %418 : vector<1x1x32xf32> to vector<1x32xf32>
    %420 = vector.broadcast %419 : vector<1x32xf32> to vector<16x32xf32>
    %421 = arith.addf %417, %420 : vector<16x32xf32>
    %422 = vector.broadcast %210 : vector<16x1xf32> to vector<16x32xf32>
    %423 = arith.mulf %421, %422 : vector<16x32xf32>
    %c1 = arith.constant 1 : index
    %c0_192 = arith.constant 0 : index
    %c0_193 = arith.constant 0 : index
    %424 = vector.load %arg14[%c1, %c0_192, %c0_193] : memref<2x32x96xf32, #tpu.memory_space<vmem>>, vector<1x32x96xf32>
    %425 = vector.shape_cast %424 : vector<1x32x96xf32> to vector<32x96xf32>
    %cst_194 = arith.constant dense<0.000000e+00> : vector<16x96xf32>
    %426 = tpu.matmul %423, %425, %cst_194 {dimension_numbers = #tpu.dot_dimension_numbers<[1], [0], [0], [1], [0, 0, 1, 1], [], []>} : vector<16x32xf32>, vector<32x96xf32>, vector<16x96xf32> -> vector<16x96xf32>
    %427 = vector.extract_strided_slice %426 {offsets = [0, 0], sizes = [16, 32], strides = [1, 1]} : vector<16x96xf32> to vector<16x32xf32>
    %428 = vector.extract_strided_slice %426 {offsets = [0, 32], sizes = [16, 32], strides = [1, 1]} : vector<16x96xf32> to vector<16x32xf32>
    %429 = vector.extract_strided_slice %426 {offsets = [0, 64], sizes = [16, 32], strides = [1, 1]} : vector<16x96xf32> to vector<16x32xf32>
    %430 = vector.extract_strided_slice %427 {offsets = [0, 0], sizes = [8, 8], strides = [1, 1]} : vector<16x32xf32> to vector<8x8xf32>
    %431 = vector.extract_strided_slice %428 {offsets = [0, 0], sizes = [8, 8], strides = [1, 1]} : vector<16x32xf32> to vector<8x8xf32>
    %432 = vector.extract_strided_slice %429 {offsets = [0, 0], sizes = [8, 8], strides = [1, 1]} : vector<16x32xf32> to vector<8x8xf32>
    %cst_195 = arith.constant dense<0.000000e+00> : vector<8x8xf32>
    %433 = tpu.matmul %430, %431, %cst_195 {dimension_numbers = #tpu.dot_dimension_numbers<[1], [1], [0], [0], [0, 0, 1, 0], [], []>} : vector<8x8xf32>, vector<8x8xf32>, vector<8x8xf32> -> vector<8x8xf32>
    %cst_196 = arith.constant 0.353553385 : f32
    %434 = vector.broadcast %cst_196 : f32 to vector<8x8xf32>
    %435 = arith.mulf %433, %434 : vector<8x8xf32>
    %436 = arith.addf %435, %215 : vector<8x8xf32>
    %cst_197 = arith.constant dense<0xFF800000> : vector<8xf32>
    %437 = vector.multi_reduction <maximumf>, %436, %cst_197 [1] : vector<8x8xf32> to vector<8xf32>
    %438 = vector.shape_cast %437 : vector<8xf32> to vector<8x1xf32>
    %439 = vector.broadcast %438 : vector<8x1xf32> to vector<8x8xf32>
    %440 = arith.subf %436, %439 : vector<8x8xf32>
    %441 = math.exp %440 : vector<8x8xf32>
    %cst_198 = arith.constant dense<0.000000e+00> : vector<8xf32>
    %442 = vector.multi_reduction <add>, %441, %cst_198 [1] : vector<8x8xf32> to vector<8xf32>
    %443 = vector.shape_cast %442 : vector<8xf32> to vector<8x1xf32>
    %444 = vector.broadcast %443 : vector<8x1xf32> to vector<8x8xf32>
    %445 = arith.divf %441, %444 : vector<8x8xf32>
    %cst_199 = arith.constant dense<0.000000e+00> : vector<8x8xf32>
    %446 = tpu.matmul %445, %432, %cst_199 {dimension_numbers = #tpu.dot_dimension_numbers<[1], [0], [0], [1], [0, 0, 1, 1], [], []>} : vector<8x8xf32>, vector<8x8xf32>, vector<8x8xf32> -> vector<8x8xf32>
    %447 = vector.extract_strided_slice %427 {offsets = [0, 8], sizes = [8, 8], strides = [1, 1]} : vector<16x32xf32> to vector<8x8xf32>
    %448 = vector.extract_strided_slice %428 {offsets = [0, 8], sizes = [8, 8], strides = [1, 1]} : vector<16x32xf32> to vector<8x8xf32>
    %449 = vector.extract_strided_slice %429 {offsets = [0, 8], sizes = [8, 8], strides = [1, 1]} : vector<16x32xf32> to vector<8x8xf32>
    %cst_200 = arith.constant dense<0.000000e+00> : vector<8x8xf32>
    %450 = tpu.matmul %447, %448, %cst_200 {dimension_numbers = #tpu.dot_dimension_numbers<[1], [1], [0], [0], [0, 0, 1, 0], [], []>} : vector<8x8xf32>, vector<8x8xf32>, vector<8x8xf32> -> vector<8x8xf32>
    %cst_201 = arith.constant 0.353553385 : f32
    %451 = vector.broadcast %cst_201 : f32 to vector<8x8xf32>
    %452 = arith.mulf %450, %451 : vector<8x8xf32>
    %453 = arith.addf %452, %215 : vector<8x8xf32>
    %cst_202 = arith.constant dense<0xFF800000> : vector<8xf32>
    %454 = vector.multi_reduction <maximumf>, %453, %cst_202 [1] : vector<8x8xf32> to vector<8xf32>
    %455 = vector.shape_cast %454 : vector<8xf32> to vector<8x1xf32>
    %456 = vector.broadcast %455 : vector<8x1xf32> to vector<8x8xf32>
    %457 = arith.subf %453, %456 : vector<8x8xf32>
    %458 = math.exp %457 : vector<8x8xf32>
    %cst_203 = arith.constant dense<0.000000e+00> : vector<8xf32>
    %459 = vector.multi_reduction <add>, %458, %cst_203 [1] : vector<8x8xf32> to vector<8xf32>
    %460 = vector.shape_cast %459 : vector<8xf32> to vector<8x1xf32>
    %461 = vector.broadcast %460 : vector<8x1xf32> to vector<8x8xf32>
    %462 = arith.divf %458, %461 : vector<8x8xf32>
    %cst_204 = arith.constant dense<0.000000e+00> : vector<8x8xf32>
    %463 = tpu.matmul %462, %449, %cst_204 {dimension_numbers = #tpu.dot_dimension_numbers<[1], [0], [0], [1], [0, 0, 1, 1], [], []>} : vector<8x8xf32>, vector<8x8xf32>, vector<8x8xf32> -> vector<8x8xf32>
    %464 = vector.extract_strided_slice %427 {offsets = [0, 16], sizes = [8, 8], strides = [1, 1]} : vector<16x32xf32> to vector<8x8xf32>
    %465 = vector.extract_strided_slice %428 {offsets = [0, 16], sizes = [8, 8], strides = [1, 1]} : vector<16x32xf32> to vector<8x8xf32>
    %466 = vector.extract_strided_slice %429 {offsets = [0, 16], sizes = [8, 8], strides = [1, 1]} : vector<16x32xf32> to vector<8x8xf32>
    %cst_205 = arith.constant dense<0.000000e+00> : vector<8x8xf32>
    %467 = tpu.matmul %464, %465, %cst_205 {dimension_numbers = #tpu.dot_dimension_numbers<[1], [1], [0], [0], [0, 0, 1, 0], [], []>} : vector<8x8xf32>, vector<8x8xf32>, vector<8x8xf32> -> vector<8x8xf32>
    %cst_206 = arith.constant 0.353553385 : f32
    %468 = vector.broadcast %cst_206 : f32 to vector<8x8xf32>
    %469 = arith.mulf %467, %468 : vector<8x8xf32>
    %470 = arith.addf %469, %215 : vector<8x8xf32>
    %cst_207 = arith.constant dense<0xFF800000> : vector<8xf32>
    %471 = vector.multi_reduction <maximumf>, %470, %cst_207 [1] : vector<8x8xf32> to vector<8xf32>
    %472 = vector.shape_cast %471 : vector<8xf32> to vector<8x1xf32>
    %473 = vector.broadcast %472 : vector<8x1xf32> to vector<8x8xf32>
    %474 = arith.subf %470, %473 : vector<8x8xf32>
    %475 = math.exp %474 : vector<8x8xf32>
    %cst_208 = arith.constant dense<0.000000e+00> : vector<8xf32>
    %476 = vector.multi_reduction <add>, %475, %cst_208 [1] : vector<8x8xf32> to vector<8xf32>
    %477 = vector.shape_cast %476 : vector<8xf32> to vector<8x1xf32>
    %478 = vector.broadcast %477 : vector<8x1xf32> to vector<8x8xf32>
    %479 = arith.divf %475, %478 : vector<8x8xf32>
    %cst_209 = arith.constant dense<0.000000e+00> : vector<8x8xf32>
    %480 = tpu.matmul %479, %466, %cst_209 {dimension_numbers = #tpu.dot_dimension_numbers<[1], [0], [0], [1], [0, 0, 1, 1], [], []>} : vector<8x8xf32>, vector<8x8xf32>, vector<8x8xf32> -> vector<8x8xf32>
    %481 = vector.extract_strided_slice %427 {offsets = [0, 24], sizes = [8, 8], strides = [1, 1]} : vector<16x32xf32> to vector<8x8xf32>
    %482 = vector.extract_strided_slice %428 {offsets = [0, 24], sizes = [8, 8], strides = [1, 1]} : vector<16x32xf32> to vector<8x8xf32>
    %483 = vector.extract_strided_slice %429 {offsets = [0, 24], sizes = [8, 8], strides = [1, 1]} : vector<16x32xf32> to vector<8x8xf32>
    %cst_210 = arith.constant dense<0.000000e+00> : vector<8x8xf32>
    %484 = tpu.matmul %481, %482, %cst_210 {dimension_numbers = #tpu.dot_dimension_numbers<[1], [1], [0], [0], [0, 0, 1, 0], [], []>} : vector<8x8xf32>, vector<8x8xf32>, vector<8x8xf32> -> vector<8x8xf32>
    %cst_211 = arith.constant 0.353553385 : f32
    %485 = vector.broadcast %cst_211 : f32 to vector<8x8xf32>
    %486 = arith.mulf %484, %485 : vector<8x8xf32>
    %487 = arith.addf %486, %215 : vector<8x8xf32>
    %cst_212 = arith.constant dense<0xFF800000> : vector<8xf32>
    %488 = vector.multi_reduction <maximumf>, %487, %cst_212 [1] : vector<8x8xf32> to vector<8xf32>
    %489 = vector.shape_cast %488 : vector<8xf32> to vector<8x1xf32>
    %490 = vector.broadcast %489 : vector<8x1xf32> to vector<8x8xf32>
    %491 = arith.subf %487, %490 : vector<8x8xf32>
    %492 = math.exp %491 : vector<8x8xf32>
    %cst_213 = arith.constant dense<0.000000e+00> : vector<8xf32>
    %493 = vector.multi_reduction <add>, %492, %cst_213 [1] : vector<8x8xf32> to vector<8xf32>
    %494 = vector.shape_cast %493 : vector<8xf32> to vector<8x1xf32>
    %495 = vector.broadcast %494 : vector<8x1xf32> to vector<8x8xf32>
    %496 = arith.divf %492, %495 : vector<8x8xf32>
    %cst_214 = arith.constant dense<0.000000e+00> : vector<8x8xf32>
    %497 = tpu.matmul %496, %483, %cst_214 {dimension_numbers = #tpu.dot_dimension_numbers<[1], [0], [0], [1], [0, 0, 1, 1], [], []>} : vector<8x8xf32>, vector<8x8xf32>, vector<8x8xf32> -> vector<8x8xf32>
    %498 = tpu.concatenate %446, %463, %480, %497 in 1 : vector<8x8xf32>, vector<8x8xf32>, vector<8x8xf32>, vector<8x8xf32> -> vector<8x32xf32>
    %499 = vector.extract_strided_slice %427 {offsets = [8, 0], sizes = [8, 8], strides = [1, 1]} : vector<16x32xf32> to vector<8x8xf32>
    %500 = vector.extract_strided_slice %428 {offsets = [8, 0], sizes = [8, 8], strides = [1, 1]} : vector<16x32xf32> to vector<8x8xf32>
    %501 = vector.extract_strided_slice %429 {offsets = [8, 0], sizes = [8, 8], strides = [1, 1]} : vector<16x32xf32> to vector<8x8xf32>
    %cst_215 = arith.constant dense<0.000000e+00> : vector<8x8xf32>
    %502 = tpu.matmul %499, %500, %cst_215 {dimension_numbers = #tpu.dot_dimension_numbers<[1], [1], [0], [0], [0, 0, 1, 0], [], []>} : vector<8x8xf32>, vector<8x8xf32>, vector<8x8xf32> -> vector<8x8xf32>
    %cst_216 = arith.constant 0.353553385 : f32
    %503 = vector.broadcast %cst_216 : f32 to vector<8x8xf32>
    %504 = arith.mulf %502, %503 : vector<8x8xf32>
    %505 = arith.addf %504, %215 : vector<8x8xf32>
    %cst_217 = arith.constant dense<0xFF800000> : vector<8xf32>
    %506 = vector.multi_reduction <maximumf>, %505, %cst_217 [1] : vector<8x8xf32> to vector<8xf32>
    %507 = vector.shape_cast %506 : vector<8xf32> to vector<8x1xf32>
    %508 = vector.broadcast %507 : vector<8x1xf32> to vector<8x8xf32>
    %509 = arith.subf %505, %508 : vector<8x8xf32>
    %510 = math.exp %509 : vector<8x8xf32>
    %cst_218 = arith.constant dense<0.000000e+00> : vector<8xf32>
    %511 = vector.multi_reduction <add>, %510, %cst_218 [1] : vector<8x8xf32> to vector<8xf32>
    %512 = vector.shape_cast %511 : vector<8xf32> to vector<8x1xf32>
    %513 = vector.broadcast %512 : vector<8x1xf32> to vector<8x8xf32>
    %514 = arith.divf %510, %513 : vector<8x8xf32>
    %cst_219 = arith.constant dense<0.000000e+00> : vector<8x8xf32>
    %515 = tpu.matmul %514, %501, %cst_219 {dimension_numbers = #tpu.dot_dimension_numbers<[1], [0], [0], [1], [0, 0, 1, 1], [], []>} : vector<8x8xf32>, vector<8x8xf32>, vector<8x8xf32> -> vector<8x8xf32>
    %516 = vector.extract_strided_slice %427 {offsets = [8, 8], sizes = [8, 8], strides = [1, 1]} : vector<16x32xf32> to vector<8x8xf32>
    %517 = vector.extract_strided_slice %428 {offsets = [8, 8], sizes = [8, 8], strides = [1, 1]} : vector<16x32xf32> to vector<8x8xf32>
    %518 = vector.extract_strided_slice %429 {offsets = [8, 8], sizes = [8, 8], strides = [1, 1]} : vector<16x32xf32> to vector<8x8xf32>
    %cst_220 = arith.constant dense<0.000000e+00> : vector<8x8xf32>
    %519 = tpu.matmul %516, %517, %cst_220 {dimension_numbers = #tpu.dot_dimension_numbers<[1], [1], [0], [0], [0, 0, 1, 0], [], []>} : vector<8x8xf32>, vector<8x8xf32>, vector<8x8xf32> -> vector<8x8xf32>
    %cst_221 = arith.constant 0.353553385 : f32
    %520 = vector.broadcast %cst_221 : f32 to vector<8x8xf32>
    %521 = arith.mulf %519, %520 : vector<8x8xf32>
    %522 = arith.addf %521, %215 : vector<8x8xf32>
    %cst_222 = arith.constant dense<0xFF800000> : vector<8xf32>
    %523 = vector.multi_reduction <maximumf>, %522, %cst_222 [1] : vector<8x8xf32> to vector<8xf32>
    %524 = vector.shape_cast %523 : vector<8xf32> to vector<8x1xf32>
    %525 = vector.broadcast %524 : vector<8x1xf32> to vector<8x8xf32>
    %526 = arith.subf %522, %525 : vector<8x8xf32>
    %527 = math.exp %526 : vector<8x8xf32>
    %cst_223 = arith.constant dense<0.000000e+00> : vector<8xf32>
    %528 = vector.multi_reduction <add>, %527, %cst_223 [1] : vector<8x8xf32> to vector<8xf32>
    %529 = vector.shape_cast %528 : vector<8xf32> to vector<8x1xf32>
    %530 = vector.broadcast %529 : vector<8x1xf32> to vector<8x8xf32>
    %531 = arith.divf %527, %530 : vector<8x8xf32>
    %cst_224 = arith.constant dense<0.000000e+00> : vector<8x8xf32>
    %532 = tpu.matmul %531, %518, %cst_224 {dimension_numbers = #tpu.dot_dimension_numbers<[1], [0], [0], [1], [0, 0, 1, 1], [], []>} : vector<8x8xf32>, vector<8x8xf32>, vector<8x8xf32> -> vector<8x8xf32>
    %533 = vector.extract_strided_slice %427 {offsets = [8, 16], sizes = [8, 8], strides = [1, 1]} : vector<16x32xf32> to vector<8x8xf32>
    %534 = vector.extract_strided_slice %428 {offsets = [8, 16], sizes = [8, 8], strides = [1, 1]} : vector<16x32xf32> to vector<8x8xf32>
    %535 = vector.extract_strided_slice %429 {offsets = [8, 16], sizes = [8, 8], strides = [1, 1]} : vector<16x32xf32> to vector<8x8xf32>
    %cst_225 = arith.constant dense<0.000000e+00> : vector<8x8xf32>
    %536 = tpu.matmul %533, %534, %cst_225 {dimension_numbers = #tpu.dot_dimension_numbers<[1], [1], [0], [0], [0, 0, 1, 0], [], []>} : vector<8x8xf32>, vector<8x8xf32>, vector<8x8xf32> -> vector<8x8xf32>
    %cst_226 = arith.constant 0.353553385 : f32
    %537 = vector.broadcast %cst_226 : f32 to vector<8x8xf32>
    %538 = arith.mulf %536, %537 : vector<8x8xf32>
    %539 = arith.addf %538, %215 : vector<8x8xf32>
    %cst_227 = arith.constant dense<0xFF800000> : vector<8xf32>
    %540 = vector.multi_reduction <maximumf>, %539, %cst_227 [1] : vector<8x8xf32> to vector<8xf32>
    %541 = vector.shape_cast %540 : vector<8xf32> to vector<8x1xf32>
    %542 = vector.broadcast %541 : vector<8x1xf32> to vector<8x8xf32>
    %543 = arith.subf %539, %542 : vector<8x8xf32>
    %544 = math.exp %543 : vector<8x8xf32>
    %cst_228 = arith.constant dense<0.000000e+00> : vector<8xf32>
    %545 = vector.multi_reduction <add>, %544, %cst_228 [1] : vector<8x8xf32> to vector<8xf32>
    %546 = vector.shape_cast %545 : vector<8xf32> to vector<8x1xf32>
    %547 = vector.broadcast %546 : vector<8x1xf32> to vector<8x8xf32>
    %548 = arith.divf %544, %547 : vector<8x8xf32>
    %cst_229 = arith.constant dense<0.000000e+00> : vector<8x8xf32>
    %549 = tpu.matmul %548, %535, %cst_229 {dimension_numbers = #tpu.dot_dimension_numbers<[1], [0], [0], [1], [0, 0, 1, 1], [], []>} : vector<8x8xf32>, vector<8x8xf32>, vector<8x8xf32> -> vector<8x8xf32>
    %550 = vector.extract_strided_slice %427 {offsets = [8, 24], sizes = [8, 8], strides = [1, 1]} : vector<16x32xf32> to vector<8x8xf32>
    %551 = vector.extract_strided_slice %428 {offsets = [8, 24], sizes = [8, 8], strides = [1, 1]} : vector<16x32xf32> to vector<8x8xf32>
    %552 = vector.extract_strided_slice %429 {offsets = [8, 24], sizes = [8, 8], strides = [1, 1]} : vector<16x32xf32> to vector<8x8xf32>
    %cst_230 = arith.constant dense<0.000000e+00> : vector<8x8xf32>
    %553 = tpu.matmul %550, %551, %cst_230 {dimension_numbers = #tpu.dot_dimension_numbers<[1], [1], [0], [0], [0, 0, 1, 0], [], []>} : vector<8x8xf32>, vector<8x8xf32>, vector<8x8xf32> -> vector<8x8xf32>
    %cst_231 = arith.constant 0.353553385 : f32
    %554 = vector.broadcast %cst_231 : f32 to vector<8x8xf32>
    %555 = arith.mulf %553, %554 : vector<8x8xf32>
    %556 = arith.addf %555, %215 : vector<8x8xf32>
    %cst_232 = arith.constant dense<0xFF800000> : vector<8xf32>
    %557 = vector.multi_reduction <maximumf>, %556, %cst_232 [1] : vector<8x8xf32> to vector<8xf32>
    %558 = vector.shape_cast %557 : vector<8xf32> to vector<8x1xf32>
    %559 = vector.broadcast %558 : vector<8x1xf32> to vector<8x8xf32>
    %560 = arith.subf %556, %559 : vector<8x8xf32>
    %561 = math.exp %560 : vector<8x8xf32>
    %cst_233 = arith.constant dense<0.000000e+00> : vector<8xf32>
    %562 = vector.multi_reduction <add>, %561, %cst_233 [1] : vector<8x8xf32> to vector<8xf32>
    %563 = vector.shape_cast %562 : vector<8xf32> to vector<8x1xf32>
    %564 = vector.broadcast %563 : vector<8x1xf32> to vector<8x8xf32>
    %565 = arith.divf %561, %564 : vector<8x8xf32>
    %cst_234 = arith.constant dense<0.000000e+00> : vector<8x8xf32>
    %566 = tpu.matmul %565, %552, %cst_234 {dimension_numbers = #tpu.dot_dimension_numbers<[1], [0], [0], [1], [0, 0, 1, 1], [], []>} : vector<8x8xf32>, vector<8x8xf32>, vector<8x8xf32> -> vector<8x8xf32>
    %567 = tpu.concatenate %515, %532, %549, %566 in 1 : vector<8x8xf32>, vector<8x8xf32>, vector<8x8xf32>, vector<8x8xf32> -> vector<8x32xf32>
    %568 = tpu.concatenate %498, %567 in 0 : vector<8x32xf32>, vector<8x32xf32> -> vector<16x32xf32>
    %c1_235 = arith.constant 1 : index
    %c0_236 = arith.constant 0 : index
    %c0_237 = arith.constant 0 : index
    %569 = vector.load %arg15[%c1_235, %c0_236, %c0_237] : memref<2x32x64xf32, #tpu.memory_space<vmem>>, vector<1x32x64xf32>
    %570 = vector.shape_cast %569 : vector<1x32x64xf32> to vector<32x64xf32>
    %cst_238 = arith.constant dense<0.000000e+00> : vector<16x64xf32>
    %571 = tpu.matmul %568, %570, %cst_238 {dimension_numbers = #tpu.dot_dimension_numbers<[1], [0], [0], [1], [0, 0, 1, 1], [], []>} : vector<16x32xf32>, vector<32x64xf32>, vector<16x64xf32> -> vector<16x64xf32>
    %c1_239 = arith.constant 1 : index
    %c0_240 = arith.constant 0 : index
    %c0_241 = arith.constant 0 : index
    %572 = vector.load %arg16[%c1_239, %c0_240, %c0_241] : memref<2x1x64xf32, #tpu.memory_space<vmem>>, vector<1x1x64xf32>
    %573 = vector.shape_cast %572 : vector<1x1x64xf32> to vector<1x64xf32>
    %574 = vector.broadcast %573 : vector<1x64xf32> to vector<16x64xf32>
    %575 = arith.addf %571, %574 : vector<16x64xf32>
    %576 = arith.negf %575 : vector<16x64xf32>
    %577 = math.exp %576 : vector<16x64xf32>
    %cst_242 = arith.constant 1.000000e+00 : f32
    %578 = vector.broadcast %cst_242 : f32 to vector<16x64xf32>
    %579 = arith.addf %578, %577 : vector<16x64xf32>
    %580 = arith.divf %578, %579 : vector<16x64xf32>
    %581 = arith.mulf %575, %580 : vector<16x64xf32>
    %c1_243 = arith.constant 1 : index
    %c0_244 = arith.constant 0 : index
    %c0_245 = arith.constant 0 : index
    %582 = vector.load %arg17[%c1_243, %c0_244, %c0_245] : memref<2x64x32xf32, #tpu.memory_space<vmem>>, vector<1x64x32xf32>
    %583 = vector.shape_cast %582 : vector<1x64x32xf32> to vector<64x32xf32>
    %cst_246 = arith.constant dense<0.000000e+00> : vector<16x32xf32>
    %584 = tpu.matmul %581, %583, %cst_246 {dimension_numbers = #tpu.dot_dimension_numbers<[1], [0], [0], [1], [0, 0, 1, 1], [], []>} : vector<16x64xf32>, vector<64x32xf32>, vector<16x32xf32> -> vector<16x32xf32>
    %c1_247 = arith.constant 1 : index
    %c0_248 = arith.constant 0 : index
    %c0_249 = arith.constant 0 : index
    %585 = vector.load %arg18[%c1_247, %c0_248, %c0_249] : memref<2x1x32xf32, #tpu.memory_space<vmem>>, vector<1x1x32xf32>
    %586 = vector.shape_cast %585 : vector<1x1x32xf32> to vector<1x32xf32>
    %587 = vector.broadcast %586 : vector<1x32xf32> to vector<16x32xf32>
    %588 = arith.addf %584, %587 : vector<16x32xf32>
    %589 = arith.addf %423, %588 : vector<16x32xf32>
    %c1_250 = arith.constant 1 : index
    %c0_251 = arith.constant 0 : index
    %c0_252 = arith.constant 0 : index
    %590 = vector.load %arg19[%c1_250, %c0_251, %c0_252] : memref<2x1x32xf32, #tpu.memory_space<vmem>>, vector<1x1x32xf32>
    %591 = vector.shape_cast %590 : vector<1x1x32xf32> to vector<1x32xf32>
    %c1_253 = arith.constant 1 : index
    %c0_254 = arith.constant 0 : index
    %c0_255 = arith.constant 0 : index
    %592 = vector.load %arg20[%c1_253, %c0_254, %c0_255] : memref<2x1x32xf32, #tpu.memory_space<vmem>>, vector<1x1x32xf32>
    %593 = vector.shape_cast %592 : vector<1x1x32xf32> to vector<1x32xf32>
    %cst_256 = arith.constant dense<0.000000e+00> : vector<16xf32>
    %594 = vector.multi_reduction <add>, %589, %cst_256 [1] : vector<16x32xf32> to vector<16xf32>
    %595 = vector.shape_cast %594 : vector<16xf32> to vector<16x1xf32>
    %cst_257 = arith.constant 3.200000e+01 : f32
    %596 = vector.broadcast %cst_257 : f32 to vector<16x1xf32>
    %597 = arith.divf %595, %596 : vector<16x1xf32>
    %598 = vector.broadcast %597 : vector<16x1xf32> to vector<16x32xf32>
    %599 = arith.subf %589, %598 : vector<16x32xf32>
    %600 = arith.mulf %599, %599 : vector<16x32xf32>
    %cst_258 = arith.constant dense<0.000000e+00> : vector<16xf32>
    %601 = vector.multi_reduction <add>, %600, %cst_258 [1] : vector<16x32xf32> to vector<16xf32>
    %602 = vector.shape_cast %601 : vector<16xf32> to vector<16x1xf32>
    %cst_259 = arith.constant 3.200000e+01 : f32
    %603 = vector.broadcast %cst_259 : f32 to vector<16x1xf32>
    %604 = arith.divf %602, %603 : vector<16x1xf32>
    %cst_260 = arith.constant 9.99999993E-9 : f32
    %605 = vector.broadcast %cst_260 : f32 to vector<16x1xf32>
    %606 = arith.addf %604, %605 : vector<16x1xf32>
    %607 = math.rsqrt %606 : vector<16x1xf32>
    %608 = vector.broadcast %607 : vector<16x1xf32> to vector<16x32xf32>
    %609 = arith.mulf %599, %608 : vector<16x32xf32>
    %610 = vector.broadcast %591 : vector<1x32xf32> to vector<16x32xf32>
    %611 = arith.mulf %609, %610 : vector<16x32xf32>
    %612 = vector.broadcast %593 : vector<1x32xf32> to vector<16x32xf32>
    %613 = arith.addf %611, %612 : vector<16x32xf32>
    %c1_261 = arith.constant 1 : index
    %c0_262 = arith.constant 0 : index
    %c0_263 = arith.constant 0 : index
    %614 = vector.load %arg21[%c1_261, %c0_262, %c0_263] : memref<2x32x64xf32, #tpu.memory_space<vmem>>, vector<1x32x64xf32>
    %615 = vector.shape_cast %614 : vector<1x32x64xf32> to vector<32x64xf32>
    %cst_264 = arith.constant dense<0.000000e+00> : vector<16x64xf32>
    %616 = tpu.matmul %613, %615, %cst_264 {dimension_numbers = #tpu.dot_dimension_numbers<[1], [0], [0], [1], [0, 0, 1, 1], [], []>} : vector<16x32xf32>, vector<32x64xf32>, vector<16x64xf32> -> vector<16x64xf32>
    %c1_265 = arith.constant 1 : index
    %c0_266 = arith.constant 0 : index
    %c0_267 = arith.constant 0 : index
    %617 = vector.load %arg22[%c1_265, %c0_266, %c0_267] : memref<2x1x64xf32, #tpu.memory_space<vmem>>, vector<1x1x64xf32>
    %618 = vector.shape_cast %617 : vector<1x1x64xf32> to vector<1x64xf32>
    %619 = vector.broadcast %618 : vector<1x64xf32> to vector<16x64xf32>
    %620 = arith.addf %616, %619 : vector<16x64xf32>
    %cst_268 = arith.constant 0.000000e+00 : f32
    %621 = vector.broadcast %cst_268 : f32 to vector<16x64xf32>
    %622 = arith.maximumf %620, %621 : vector<16x64xf32>
    %c1_269 = arith.constant 1 : index
    %c0_270 = arith.constant 0 : index
    %c0_271 = arith.constant 0 : index
    %623 = vector.load %arg23[%c1_269, %c0_270, %c0_271] : memref<2x64x32xf32, #tpu.memory_space<vmem>>, vector<1x64x32xf32>
    %624 = vector.shape_cast %623 : vector<1x64x32xf32> to vector<64x32xf32>
    %cst_272 = arith.constant dense<0.000000e+00> : vector<16x32xf32>
    %625 = tpu.matmul %622, %624, %cst_272 {dimension_numbers = #tpu.dot_dimension_numbers<[1], [0], [0], [1], [0, 0, 1, 1], [], []>} : vector<16x64xf32>, vector<64x32xf32>, vector<16x32xf32> -> vector<16x32xf32>
    %c1_273 = arith.constant 1 : index
    %c0_274 = arith.constant 0 : index
    %c0_275 = arith.constant 0 : index
    %626 = vector.load %arg24[%c1_273, %c0_274, %c0_275] : memref<2x1x32xf32, #tpu.memory_space<vmem>>, vector<1x1x32xf32>
    %627 = vector.shape_cast %626 : vector<1x1x32xf32> to vector<1x32xf32>
    %628 = vector.broadcast %627 : vector<1x32xf32> to vector<16x32xf32>
    %629 = arith.addf %625, %628 : vector<16x32xf32>
    %630 = vector.broadcast %210 : vector<16x1xf32> to vector<16x32xf32>
    %631 = arith.mulf %629, %630 : vector<16x32xf32>
    %c0_276 = arith.constant 0 : index
    %c0_277 = arith.constant 0 : index
    %632 = vector.load %arg25[%c0_276, %c0_277] : memref<1x32xf32, #tpu.memory_space<vmem>>, vector<1x32xf32>
    %c0_278 = arith.constant 0 : index
    %c0_279 = arith.constant 0 : index
    %633 = vector.load %arg26[%c0_278, %c0_279] : memref<1x32xf32, #tpu.memory_space<vmem>>, vector<1x32xf32>
    %cst_280 = arith.constant dense<0.000000e+00> : vector<16xf32>
    %634 = vector.multi_reduction <add>, %631, %cst_280 [1] : vector<16x32xf32> to vector<16xf32>
    %635 = vector.shape_cast %634 : vector<16xf32> to vector<16x1xf32>
    %cst_281 = arith.constant 3.200000e+01 : f32
    %636 = vector.broadcast %cst_281 : f32 to vector<16x1xf32>
    %637 = arith.divf %635, %636 : vector<16x1xf32>
    %638 = vector.broadcast %637 : vector<16x1xf32> to vector<16x32xf32>
    %639 = arith.subf %631, %638 : vector<16x32xf32>
    %640 = arith.mulf %639, %639 : vector<16x32xf32>
    %cst_282 = arith.constant dense<0.000000e+00> : vector<16xf32>
    %641 = vector.multi_reduction <add>, %640, %cst_282 [1] : vector<16x32xf32> to vector<16xf32>
    %642 = vector.shape_cast %641 : vector<16xf32> to vector<16x1xf32>
    %cst_283 = arith.constant 3.200000e+01 : f32
    %643 = vector.broadcast %cst_283 : f32 to vector<16x1xf32>
    %644 = arith.divf %642, %643 : vector<16x1xf32>
    %cst_284 = arith.constant 9.99999993E-9 : f32
    %645 = vector.broadcast %cst_284 : f32 to vector<16x1xf32>
    %646 = arith.addf %644, %645 : vector<16x1xf32>
    %647 = math.rsqrt %646 : vector<16x1xf32>
    %648 = vector.broadcast %647 : vector<16x1xf32> to vector<16x32xf32>
    %649 = arith.mulf %639, %648 : vector<16x32xf32>
    %650 = vector.broadcast %632 : vector<1x32xf32> to vector<16x32xf32>
    %651 = arith.mulf %649, %650 : vector<16x32xf32>
    %652 = vector.broadcast %633 : vector<1x32xf32> to vector<16x32xf32>
    %653 = arith.addf %651, %652 : vector<16x32xf32>
    %c0_285 = arith.constant 0 : index
    %c0_286 = arith.constant 0 : index
    %654 = vector.load %arg13[%c0_285, %c0_286] : memref<16x16xf32, #tpu.memory_space<vmem>>, vector<16x16xf32>
    %cst_287 = arith.constant dense<0.000000e+00> : vector<16x32xf32>
    %655 = tpu.matmul %654, %653, %cst_287 {dimension_numbers = #tpu.dot_dimension_numbers<[1], [0], [0], [1], [0, 0, 1, 1], [], []>} : vector<16x16xf32>, vector<16x32xf32>, vector<16x32xf32> -> vector<16x32xf32>
    %c0_288 = arith.constant 0 : index
    %c0_289 = arith.constant 0 : index
    %656 = vector.load %arg34[%c0_288, %c0_289] : memref<2x16xf32, #tpu.memory_space<vmem>>, vector<2x16xf32>
    %cst_290 = arith.constant dense<0.000000e+00> : vector<2x32xf32>
    %657 = tpu.matmul %656, %655, %cst_290 {dimension_numbers = #tpu.dot_dimension_numbers<[1], [0], [0], [1], [0, 0, 1, 1], [], []>} : vector<2x16xf32>, vector<16x32xf32>, vector<2x32xf32> -> vector<2x32xf32>
    %c0_291 = arith.constant 0 : index
    %c0_292 = arith.constant 0 : index
    %658 = vector.load %arg37[%c0_291, %c0_292] : memref<2x32xf32, #tpu.memory_space<vmem>>, vector<2x32xf32>
    tpu.vector_store %arg37[%c0_291, %c0_292], %657 {strides = array<i32>} : memref<2x32xf32, #tpu.memory_space<vmem>>, vector<2x32xf32>,
    %659 = tpu.concatenate %655, %208 in 1 : vector<16x32xf32>, vector<16x32xf32> -> vector<16x64xf32>
    %c0_293 = arith.constant 0 : index
    %c0_294 = arith.constant 0 : index
    %660 = vector.load %arg27[%c0_293, %c0_294] : memref<64x32xf32, #tpu.memory_space<vmem>>, vector<64x32xf32>
    %cst_295 = arith.constant dense<0.000000e+00> : vector<16x32xf32>
    %661 = tpu.matmul %659, %660, %cst_295 {dimension_numbers = #tpu.dot_dimension_numbers<[1], [0], [0], [1], [0, 0, 1, 1], [], []>} : vector<16x64xf32>, vector<64x32xf32>, vector<16x32xf32> -> vector<16x32xf32>
    %c0_296 = arith.constant 0 : index
    %c0_297 = arith.constant 0 : index
    %662 = vector.load %arg28[%c0_296, %c0_297] : memref<1x32xf32, #tpu.memory_space<vmem>>, vector<1x32xf32>
    %663 = vector.broadcast %662 : vector<1x32xf32> to vector<16x32xf32>
    %664 = arith.addf %661, %663 : vector<16x32xf32>
    %cst_298 = arith.constant 0.000000e+00 : f32
    %665 = vector.broadcast %cst_298 : f32 to vector<16x32xf32>
    %666 = arith.maximumf %664, %665 : vector<16x32xf32>
    %c0_299 = arith.constant 0 : index
    %c0_300 = arith.constant 0 : index
    %667 = vector.load %arg29[%c0_299, %c0_300] : memref<1x32xf32, #tpu.memory_space<vmem>>, vector<1x32xf32>
    %668 = vector.broadcast %667 : vector<1x32xf32> to vector<16x32xf32>
    %669 = arith.mulf %666, %668 : vector<16x32xf32>
    %cst_301 = arith.constant dense<0.000000e+00> : vector<16xf32>
    %670 = vector.multi_reduction <add>, %669, %cst_301 [1] : vector<16x32xf32> to vector<16xf32>
    %671 = vector.shape_cast %670 : vector<16xf32> to vector<16x1xf32>
    %c0_302 = arith.constant 0 : index
    %c0_303 = arith.constant 0 : index
    %672 = vector.load %arg30[%c0_302, %c0_303] : memref<1x1xf32, #tpu.memory_space<vmem>>, vector<1x1xf32>
    %673 = vector.broadcast %672 : vector<1x1xf32> to vector<16x1xf32>
    %674 = arith.addf %671, %673 : vector<16x1xf32>
    %c0_304 = arith.constant 0 : index
    %c0_305 = arith.constant 0 : index
    %675 = vector.load %arg36[%c0_304, %c0_305] : memref<16x1xf32, #tpu.memory_space<vmem>>, vector<16x1xf32>
    tpu.vector_store %arg36[%c0_304, %c0_305], %674 {strides = array<i32>} : memref<16x1xf32, #tpu.memory_space<vmem>>, vector<16x1xf32>,
    return
  }
  func.func @transform_0(%arg0: i32) -> (i32, i32) {
    %c0_i32 = arith.constant 0 : i32
    %c0_i32_0 = arith.constant 0 : i32
    %c0_i32_1 = arith.constant 0 : i32
    return %c0_i32, %c0_i32_0 : i32, i32
  }
  func.func @transform_1(%arg0: i32) -> (i32, i32) {
    %c0_i32 = arith.constant 0 : i32
    %c0_i32_0 = arith.constant 0 : i32
    %c0_i32_1 = arith.constant 0 : i32
    return %c0_i32, %c0_i32_0 : i32, i32
  }
  func.func @transform_2(%arg0: i32) -> (i32, i32) {
    %c0_i32 = arith.constant 0 : i32
    %c0_i32_0 = arith.constant 0 : i32
    %c0_i32_1 = arith.constant 0 : i32
    return %c0_i32, %c0_i32_0 : i32, i32
  }
  func.func @transform_3(%arg0: i32) -> (i32, i32) {
    %c0_i32 = arith.constant 0 : i32
    %c0_i32_0 = arith.constant 0 : i32
    %c0_i32_1 = arith.constant 0 : i32
    return %c0_i32, %c0_i32_0 : i32, i32
  }
  func.func @transform_4(%arg0: i32) -> (i32, i32) {
    %c0_i32 = arith.constant 0 : i32
    %c0_i32_0 = arith.constant 0 : i32
    %c0_i32_1 = arith.constant 0 : i32
    return %c0_i32, %c0_i32_0 : i32, i32
  }
  func.func @transform_5(%arg0: i32) -> (i32, i32) {
    %c0_i32 = arith.constant 0 : i32
    %c0_i32_0 = arith.constant 0 : i32
    %c0_i32_1 = arith.constant 0 : i32
    return %c0_i32, %c0_i32_0 : i32, i32
  }
  func.func @transform_6(%arg0: i32) -> (i32, i32) {
    %c0_i32 = arith.constant 0 : i32
    %c0_i32_0 = arith.constant 0 : i32
    %c0_i32_1 = arith.constant 0 : i32
    return %c0_i32, %c0_i32_0 : i32, i32
  }
  func.func @transform_7(%arg0: i32) -> (i32, i32) {
    %c0_i32 = arith.constant 0 : i32
    %c0_i32_0 = arith.constant 0 : i32
    %c0_i32_1 = arith.constant 0 : i32
    return %c0_i32, %c0_i32_0 : i32, i32
  }
  func.func @transform_8(%arg0: i32) -> (i32, i32) {
    %c0_i32 = arith.constant 0 : i32
    %c0_i32_0 = arith.constant 0 : i32
    %c0_i32_1 = arith.constant 0 : i32
    return %c0_i32, %c0_i32_0 : i32, i32
  }
  func.func @transform_9(%arg0: i32) -> (i32, i32) {
    %c0_i32 = arith.constant 0 : i32
    %c0_i32_0 = arith.constant 0 : i32
    %c0_i32_1 = arith.constant 0 : i32
    return %c0_i32, %c0_i32_0 : i32, i32
  }
  func.func @transform_10(%arg0: i32) -> (i32, i32) {
    %c0_i32 = arith.constant 0 : i32
    %c0_i32_0 = arith.constant 0 : i32
    %c0_i32_1 = arith.constant 0 : i32
    return %c0_i32, %c0_i32_0 : i32, i32
  }
  func.func @transform_11(%arg0: i32) -> (i32, i32) {
    %c0_i32 = arith.constant 0 : i32
    %c0_i32_0 = arith.constant 0 : i32
    %c0_i32_1 = arith.constant 0 : i32
    return %c0_i32, %c0_i32_0 : i32, i32
  }
  func.func @transform_12(%arg0: i32) -> (i32, i32) {
    %c0_i32 = arith.constant 0 : i32
    %c0_i32_0 = arith.constant 0 : i32
    %c0_i32_1 = arith.constant 0 : i32
    return %c0_i32, %c0_i32_0 : i32, i32
  }
  func.func @transform_13(%arg0: i32) -> (i32, i32, i32) {
    %c0_i32 = arith.constant 0 : i32
    %c0_i32_0 = arith.constant 0 : i32
    %c0_i32_1 = arith.constant 0 : i32
    %c0_i32_2 = arith.constant 0 : i32
    return %c0_i32, %c0_i32_0, %c0_i32_1 : i32, i32, i32
  }
  func.func @transform_14(%arg0: i32) -> (i32, i32, i32) {
    %c0_i32 = arith.constant 0 : i32
    %c0_i32_0 = arith.constant 0 : i32
    %c0_i32_1 = arith.constant 0 : i32
    %c0_i32_2 = arith.constant 0 : i32
    return %c0_i32, %c0_i32_0, %c0_i32_1 : i32, i32, i32
  }
  func.func @transform_15(%arg0: i32) -> (i32, i32, i32) {
    %c0_i32 = arith.constant 0 : i32
    %c0_i32_0 = arith.constant 0 : i32
    %c0_i32_1 = arith.constant 0 : i32
    %c0_i32_2 = arith.constant 0 : i32
    return %c0_i32, %c0_i32_0, %c0_i32_1 : i32, i32, i32
  }
  func.func @transform_16(%arg0: i32) -> (i32, i32, i32) {
    %c0_i32 = arith.constant 0 : i32
    %c0_i32_0 = arith.constant 0 : i32
    %c0_i32_1 = arith.constant 0 : i32
    %c0_i32_2 = arith.constant 0 : i32
    return %c0_i32, %c0_i32_0, %c0_i32_1 : i32, i32, i32
  }
  func.func @transform_17(%arg0: i32) -> (i32, i32, i32) {
    %c0_i32 = arith.constant 0 : i32
    %c0_i32_0 = arith.constant 0 : i32
    %c0_i32_1 = arith.constant 0 : i32
    %c0_i32_2 = arith.constant 0 : i32
    return %c0_i32, %c0_i32_0, %c0_i32_1 : i32, i32, i32
  }
  func.func @transform_18(%arg0: i32) -> (i32, i32, i32) {
    %c0_i32 = arith.constant 0 : i32
    %c0_i32_0 = arith.constant 0 : i32
    %c0_i32_1 = arith.constant 0 : i32
    %c0_i32_2 = arith.constant 0 : i32
    return %c0_i32, %c0_i32_0, %c0_i32_1 : i32, i32, i32
  }
  func.func @transform_19(%arg0: i32) -> (i32, i32, i32) {
    %c0_i32 = arith.constant 0 : i32
    %c0_i32_0 = arith.constant 0 : i32
    %c0_i32_1 = arith.constant 0 : i32
    %c0_i32_2 = arith.constant 0 : i32
    return %c0_i32, %c0_i32_0, %c0_i32_1 : i32, i32, i32
  }
  func.func @transform_20(%arg0: i32) -> (i32, i32, i32) {
    %c0_i32 = arith.constant 0 : i32
    %c0_i32_0 = arith.constant 0 : i32
    %c0_i32_1 = arith.constant 0 : i32
    %c0_i32_2 = arith.constant 0 : i32
    return %c0_i32, %c0_i32_0, %c0_i32_1 : i32, i32, i32
  }
  func.func @transform_21(%arg0: i32) -> (i32, i32, i32) {
    %c0_i32 = arith.constant 0 : i32
    %c0_i32_0 = arith.constant 0 : i32
    %c0_i32_1 = arith.constant 0 : i32
    %c0_i32_2 = arith.constant 0 : i32
    return %c0_i32, %c0_i32_0, %c0_i32_1 : i32, i32, i32
  }
  func.func @transform_22(%arg0: i32) -> (i32, i32, i32) {
    %c0_i32 = arith.constant 0 : i32
    %c0_i32_0 = arith.constant 0 : i32
    %c0_i32_1 = arith.constant 0 : i32
    %c0_i32_2 = arith.constant 0 : i32
    return %c0_i32, %c0_i32_0, %c0_i32_1 : i32, i32, i32
  }
  func.func @transform_23(%arg0: i32) -> (i32, i32, i32) {
    %c0_i32 = arith.constant 0 : i32
    %c0_i32_0 = arith.constant 0 : i32
    %c0_i32_1 = arith.constant 0 : i32
    %c0_i32_2 = arith.constant 0 : i32
    return %c0_i32, %c0_i32_0, %c0_i32_1 : i32, i32, i32
  }
  func.func @transform_24(%arg0: i32) -> (i32, i32) {
    %c0_i32 = arith.constant 0 : i32
    %c0_i32_0 = arith.constant 0 : i32
    %c0_i32_1 = arith.constant 0 : i32
    return %c0_i32, %c0_i32_0 : i32, i32
  }
  func.func @transform_25(%arg0: i32) -> (i32, i32) {
    %c0_i32 = arith.constant 0 : i32
    %c0_i32_0 = arith.constant 0 : i32
    %c0_i32_1 = arith.constant 0 : i32
    return %c0_i32, %c0_i32_0 : i32, i32
  }
  func.func @transform_26(%arg0: i32) -> (i32, i32) {
    %c0_i32 = arith.constant 0 : i32
    %c0_i32_0 = arith.constant 0 : i32
    %c0_i32_1 = arith.constant 0 : i32
    return %c0_i32, %c0_i32_0 : i32, i32
  }
  func.func @transform_27(%arg0: i32) -> (i32, i32) {
    %c0_i32 = arith.constant 0 : i32
    %c0_i32_0 = arith.constant 0 : i32
    %c0_i32_1 = arith.constant 0 : i32
    return %c0_i32, %c0_i32_0 : i32, i32
  }
  func.func @transform_28(%arg0: i32) -> (i32, i32) {
    %c0_i32 = arith.constant 0 : i32
    %c0_i32_0 = arith.constant 0 : i32
    %c0_i32_1 = arith.constant 0 : i32
    return %c0_i32, %c0_i32_0 : i32, i32
  }
  func.func @transform_29(%arg0: i32) -> (i32, i32) {
    %c0_i32 = arith.constant 0 : i32
    %c0_i32_0 = arith.constant 0 : i32
    %c0_i32_1 = arith.constant 0 : i32
    return %c0_i32, %c0_i32_0 : i32, i32
  }
  func.func @transform_30(%arg0: i32) -> (i32, i32) {
    %c0_i32 = arith.constant 0 : i32
    %c0_i32_0 = arith.constant 0 : i32
    %c0_i32_1 = arith.constant 0 : i32
    return %c0_i32, %c0_i32_0 : i32, i32
  }
  func.func @transform_31(%arg0: i32) -> (i32, i32) {
    %c0_i32 = arith.constant 0 : i32
    %c0_i32_0 = arith.constant 0 : i32
    %c0_i32_1 = arith.constant 0 : i32
    return %c0_i32, %c0_i32_0 : i32, i32
  }
  func.func @transform_32(%arg0: i32) -> (i32, i32) {
    %c0_i32 = arith.constant 0 : i32
    %c0_i32_0 = arith.constant 0 : i32
    %c0_i32_1 = arith.constant 0 : i32
    return %c0_i32, %c0_i32_0 : i32, i32
  }
  func.func @transform_33(%arg0: i32) -> (i32, i32) {
    %c0_i32 = arith.constant 0 : i32
    %c0_i32_0 = arith.constant 0 : i32
    %c0_i32_1 = arith.constant 0 : i32
    return %c0_i32, %c0_i32_0 : i32, i32
  }
  func.func @transform_34(%arg0: i32) -> (i32, i32) {
    %c0_i32 = arith.constant 0 : i32
    %c0_i32_0 = arith.constant 0 : i32
    %c0_i32_1 = arith.constant 0 : i32
    return %c0_i32, %c0_i32_0 : i32, i32
  }
  func.func @transform_35(%arg0: i32) -> (i32, i32) {
    %c0_i32 = arith.constant 0 : i32
    %c0_i32_0 = arith.constant 0 : i32
    %c0_i32_1 = arith.constant 0 : i32
    return %c0_i32, %c0_i32_0 : i32, i32
  }
  func.func @transform_36(%arg0: i32) -> (i32, i32) {
    %c0_i32 = arith.constant 0 : i32
    %c0_i32_0 = arith.constant 0 : i32
    %c0_i32_1 = arith.constant 0 : i32
    return %c0_i32, %c0_i32_0 : i32, i32
  }
  func.func @transform_37(%arg0: i32) -> (i32, i32) {
    %c0_i32 = arith.constant 0 : i32
    %c0_i32_0 = arith.constant 0 : i32
    %c0_i32_1 = arith.constant 0 : i32
    return %c0_i32, %c0_i32_0 : i32, i32
  }
  func.func @transform_38(%arg0: i32) -> (i32, i32) {
    %c0_i32 = arith.constant 0 : i32
    %c0_i32_0 = arith.constant 0 : i32
    %c0_i32_1 = arith.constant 0 : i32
    return %c0_i32, %c0_i32_0 : i32, i32
  }
}

</mosaic_0001>

<bundles_post_ra>
// kernel: eq.8
= control target key start
LH: loop header
LB: loop body
LE: loop exit
PB: predicated region body
PF: predicated region fallthrough
CT: control target
= control target key end

     0   :  { %vm7_vm0 = vcmask 64512   ;;  %vm13_vm1 = vcmask 130112   ;;  %s39_s0 = inlined_call_operand.vmem [shape: s32[2,8], index: 0, kind: input, shape index: {}]   ;;  %s40_s1 = inlined_call_operand.vmem [shape: s32[16], index: 1, kind: output, shape index: {}]  }
   0x1   :  { %v4_v0 = vld [vmem:[%s39_s0] sm:$0x3]  ;;  %s22_s0 = smov 8  }
   0x2   :  { %5 = vst [vmem:[#allocation1] sm:$0x3] %v4_v0 }
   0x9   :  { %v10_v1 = vld [vmem:[#allocation1 + $0x1] sm:$0x1]   ;;  %v6_v2 = vld [vmem:[#allocation1] sm:$0x1]  }
   0xa   :  { %11 = vrot.lane.b32.xlu0 %v10_v1, %s22_s0  ;;  %8 = vst.msk [vmem:[#allocation0] sm:$0x1] %vm7_vm0, %v6_v2  }
  0x7c   :  { %v12_v3 = vpop.permute.xlu0 %11  }
  0x7d   :  { %14 = vst.msk [vmem:[#allocation0] sm:$0x1] %vm13_vm1, %v12_v3  }
  0x84   :  { %v18_v4 = vld [vmem:[#allocation0] sm:$0x1] }
  0x85   :  { %20 = vst [vmem:[%s40_s1] sm:$0x1] %v18_v4 }

// kernel: sdhid_forward.1
= control target key start
LH: loop header
LB: loop body
LE: loop exit
PB: predicated region body
PF: predicated region fallthrough
CT: control target
= control target key end

     0   :  { %s8512_s6 = smov 1   ;;  %s8513_s10 = smov 2   ;;  %s9570_s0 = inlined_call_operand.smem [shape: u32[39], index: -1, kind: input, shape index: {}] }
   0x1   :  { %s8579_s5 = sld [smem:[%s9570_s0]]   ;;  %s8514_s14 = smov 3  }
   0x2   :  { %s8584_s9 = sld [smem:[%s9570_s0 + %s8512_s6]]   ;;  %s8515_s18 = smov 4  }
   0x3   :  { %s8589_s13 = sld [smem:[%s9570_s0 + %s8513_s10]]   ;;  %s8516_s22 = smov 5  }
   0x4   :  { %s8594_s17 = sld [smem:[%s9570_s0 + %s8514_s14]]   ;;  %s8517_s26 = smov 6  }
   0x5   :  { %s8599_s21 = sld [smem:[%s9570_s0 + %s8515_s18]]   ;;  %s8518_s30 = smov 7  }
   0x6   :  { %s8604_s25 = sld [smem:[%s9570_s0 + %s8516_s22]]   ;;  %s8519_s4 = smov 8  }
   0x7   :  { %s8609_s29 = sld [smem:[%s9570_s0 + %s8517_s26]]   ;;  %s8520_s10 = smov 9  }
   0x8   :  { %s8614_s3 = sld [smem:[%s9570_s0 + %s8518_s30]]   ;;  %s8521_s15 = smov 10  }
   0x9   :  { %s8619_s8 = sld [smem:[%s9570_s0 + %s8519_s4]]   ;;  %s8522_s20 = smov 11  }
   0xa   :  { %s8624_s14 = sld [smem:[%s9570_s0 + %s8520_s10]]   ;;  %s8523_s26 = smov 12  }
   0xb   :  { %s8629_s19 = sld [smem:[%s9570_s0 + %s8521_s15]]   ;;  %s8524_s1 = smov 13  }
   0xc   :  { %s8634_s24 = sld [smem:[%s9570_s0 + %s8522_s20]]   ;;  %s8525_s7 = smov 14  }
   0xd   :  { %s8639_s30 = sld [smem:[%s9570_s0 + %s8523_s26]]   ;;  %s8526_s15 = smov 15  }
   0xe   :  { %s8644_s6 = sld [smem:[%s9570_s0 + %s8524_s1]]   ;;  %s8527_s22 = smov 16  }
   0xf   :  { %s8649_s12 = sld [smem:[%s9570_s0 + %s8525_s7]]   ;;  %s8528_s28 = smov 17  }
  0x10   :  { %s8654_s20 = sld [smem:[%s9570_s0 + %s8526_s15]]   ;;  %s8529_s7 = smov 18  }
  0x11   :  { %9585 = sst [smem:[#allocation9_spill]] %s8629_s19  ;;  %s8530_s15 = smov 19  }
  0x12   :  { %9586 = sst [smem:[#allocation10_spill]] %s8634_s24  ;;  %s8541_s10 = smov 30  }
  0x13   :  { %9587 = sst [smem:[#allocation11_spill]] %s8639_s30  ;;  %s8542_s16 = smov 31  }
  0x14   :  { %s8659_s27 = sld [smem:[%s9570_s0 + %s8527_s22]]   ;;  %s8531_s22 = smov 20  }
  0x15   :  { %9588 = sst [smem:[#allocation12_spill]] %s8649_s12  ;;  %s8543_s23 = smov 32  }
  0x16   :  { %9589 = sst [smem:[#allocation13_spill]] %s8654_s20  ;;  %s8544_s1 = smov 33  }
  0x17   :  { %s8664_s4 = sld [smem:[%s9570_s0 + %s8528_s28]]   ;;  %s8532_s28 = smov 21  }
  0x18   :  { %s8669_s30 = sld [smem:[%s9570_s0 + %s8529_s7]]   ;;  %s8533_s7 = smov 22  }
  0x19   :  { %s8674_s20 = sld [smem:[%s9570_s0 + %s8530_s15]]   ;;  %s8534_s15 = smov 23  }
  0x1a   :  { %9590 = sst [smem:[#allocation14_spill]] %s8659_s27 }
  0x1b   :  { %s8679_s27 = sld [smem:[%s9570_s0 + %s8531_s22]]   ;;  %s8535_s22 = smov 24  }
  0x1c   :  { %s8742_s12 = sld [smem:[%s9570_s0 + %s8544_s1]]   ;;  %s8548_s1 = smov 37  }
  0x1d   :  { %9591 = sst [smem:[#allocation15_spill]] %s8664_s4 }
  0x1e   :  { %9592 = sst [smem:[#allocation16_spill]] %s8669_s30 }
  0x1f   :  { %9593 = sst [smem:[#allocation17_spill]] %s8674_s20 }
  0x20   :  { %s8684_s4 = sld [smem:[%s9570_s0 + %s8532_s28]]   ;;  %s8536_s28 = smov 25  }
  0x21   :  { %9594 = sst [smem:[#allocation18_spill]] %s8679_s27 }
  0x22   :  { %s8689_s30 = sld [smem:[%s9570_s0 + %s8533_s7]]   ;;  %s8537_s7 = smov 26  }
  0x23   :  { %s8694_s20 = sld [smem:[%s9570_s0 + %s8534_s15]]   ;;  %s8538_s15 = smov 27  }
  0x24   :  { %s8699_s27 = sld [smem:[%s9570_s0 + %s8535_s22]]   ;;  %s8539_s22 = smov 28  }
  0x25   :  { %9604 = sst [smem:[#allocation28_spill]] %s8742_s12 }
  0x26   :  { %9595 = sst [smem:[#allocation19_spill]] %s8684_s4 }
  0x27   :  { %s8704_s4 = sld [smem:[%s9570_s0 + %s8536_s28]]   ;;  %s8540_s28 = smov 29  }
  0x28   :  { %9596 = sst [smem:[#allocation20_spill]] %s8689_s30 }
  0x29   :  { %9597 = sst [smem:[#allocation21_spill]] %s8694_s20 }
  0x2a   :  { %9598 = sst [smem:[#allocation22_spill]] %s8699_s27 }
  0x2b   :  { %s8709_s30 = sld [smem:[%s9570_s0 + %s8537_s7]]   ;;  %s8549_s7 = smov 38  }
  0x2c   :  { %s8714_s20 = sld [smem:[%s9570_s0 + %s8538_s15]]  }
  0x2d   :  { %9599 = sst [smem:[#allocation23_spill]] %s8704_s4 }
  0x2e   :  { %s8719_s27 = sld [smem:[%s9570_s0 + %s8539_s22]]  }
  0x2f   :  { %s6980_s4 = sld [smem:[%s9570_s0 + %s8540_s28]]  }
  0x31   :  { %9600 = sst [smem:[#allocation24_spill]] %s8709_s30 }
  0x32   :  { %9601 = sst [smem:[#allocation25_spill]] %s8714_s20 }
  0x33   :  { %s8727_s30 = sld [smem:[%s9570_s0 + %s8541_s10]]   ;;  %s8545_s10 = smov 34  }
  0x34   :  { %9602 = sst [smem:[#allocation26_spill]] %s8719_s27 }
  0x35   :  { %s8732_s20 = sld [smem:[%s9570_s0 + %s8542_s16]]   ;;  %s8546_s16 = smov 35   ;;  %v83_v0 = vstv %s6980_s4 }
  0x36   :  { %s8737_s27 = sld [smem:[%s9570_s0 + %s8543_s23]]   ;;  %s8547_s23 = smov 36   ;;  %84 = vst [vmem:[#allocation2] sm:$0x1] %v83_v0 }
  0x37   :  { %s8747_s24 = sld [smem:[%s9570_s0 + %s8545_s10]]  }
  0x38   :  { %s8752_s19 = sld [smem:[%s9570_s0 + %s8546_s16]]  }
  0x39   :  { %s8757_s28 = sld [smem:[%s9570_s0 + %s8547_s23]]  }
  0x3a   :  { %s8762_s10 = sld [smem:[%s9570_s0 + %s8548_s1]]  }
  0x3b   :  { %9603 = sst [smem:[#allocation27_spill]] %s8732_s20 }
  0x3c   :  { %s8767_s16 = sld [smem:[%s9570_s0 + %s8549_s7]]  }
  0x3d   :  { %85 = vsyncpa [#allocation4], 0  ;;  %v164_v1 = vld [vmem:[%s8604_s25] sm:$0xff]  ;;  %v165_v2 = vld [vmem:[%s8604_s25 + $0x8] sm:$0xff]  ;;  %vm175_vm0 = vcmask 261120  }
  0x3e   :  { %v166_v3 = vld [vmem:[%s8604_s25 + $0x10] sm:$0xff]  ;;  %v8007_v4 = vpack.c.bf16 %v165_v2, %v164_v1  ;;  %v167_v5 = vld [vmem:[%s8604_s25 + $0x18] sm:$0xff]  ;;  %v162_v6 = vld [vmem:[%s8599_s21] sm:$0xff] }
  0x3f   :  { %v8011_v7 = vpack.c.bf16 %v167_v5, %v166_v3  ;;  %7471 = vmatprep.mubr.msk.f32.mxu1 %vm175_vm0, %v162_v6  ;;  %v156_v8 = vld [vmem:[%s8624_s14] sm:$0xff]  ;;  %v157_v9 = vld [vmem:[%s8624_s14 + $0x8] sm:$0xff] }
  0x40   :  { %86 = vsyncpa [#allocation6], 0  ;;  %8008 = vmatprep.subr.bf16.mxu1 %v8007_v4  ;;  %v8777_v10 = vpack.c.bf16 %v157_v9, %v156_v8  ;;  %v163_v11 = vld [vmem:[%s8599_s21 + $0x8] sm:$0x3]  ;;  %v158_v12 = vld [vmem:[%s8624_s14 + $0x10] sm:$0xff]  ;;  %vm367_vm1 = vcmask 1043456  }
  0x41   :  { %8010 = vmatpush3.bf16.msra.mxu1 %v8007_v4  ;;  %v159_v13 = vld [vmem:[%s8624_s14 + $0x18] sm:$0xff]  ;;  %v6990_v15 = vld [vmem:[%s8609_s29] ss:$0 sm:$0xff]  ;;  %vm360_vm6 = vcmask 31744   ;;  %vm448_vm7 = vcmask 80896   ;;  %vm455_vm8 = vcmask 1041408  }
  0x42   :  { %8012 = vmatprep.subr.bf16.mxu1 %v8011_v7  ;;  %v8785_v14 = vpack.c.bf16 %v159_v13, %v158_v12  ;;  %v8793_v22 = vld [vmem:[%s8619_s8] sm:$0xf]  ;;  %vm8550_vm9 = vmmov 1   ;;  %v8815_v46 = vld [vmem:[%s8727_s30 + $0x8] sm:$0xff]  ;;  %vm621_vm11 = vcmask 130048   ;;  %v8551_v50 = vmov 0.0  }
  0x43   :  { %7485 = vmatprep.subr.msk.mxu0 %vm367_vm1, %v8793_v22  ;;  %v8802_v39 = vld [vmem:[%s8727_s30] sm:$0xff]  ;;  %vm8806_vm10 = vmpackc.low %vm455_vm8, %vm8550_vm9  ;;  %v8829_v48 = vld [vmem:[%s8584_s9 + $0x8] sm:$0xff]  ;;  %v1042_v51 = vsel %vm360_vm6, 1.0, %v8551_v50  ;;  %vm711_vm12 = vcmask 64512   ;;  %s8552_s0 = smov 112   ;;  %vm2287_vm9 = vcmask 254976  }
  0x44   :  { %7486 = vmatpush3.msk.msra.mxu0 %vm367_vm1, %v8793_v22  ;;  %v8820_v47 = vld [vmem:[%s8584_s9] sm:$0xff]  ;;  %1043 = vadd.xlane.f32.xlu0 %v1042_v51  ;;  %v620_v57 = vld [vmem:[%s8589_s13 + $0x8] sm:$0x3]  ;;  %v709_v59 = vld [vmem:[%s8614_s3 + $0x10] sm:$0xff]  ;;  %s8553_s9 = smov 120   ;;  %s8557_s21 = smov 88  }
  0x45   :  { %8014 = vmatpush3.bf16.msra.mxu1 %v8011_v7  ;;  %v619_v49 = vld [vmem:[%s8589_s13] sm:$0xff]  ;;  %v708_v60 = vld [vmem:[%s8614_s3 + $0x8] sm:$0xff]  ;;  %v710_v3 = vld [vmem:[%s8614_s3 + $0x18] sm:$0xff]  ;;  %s8554_s13 = smov 104   ;;  %s8558_s25 = smov 96  }
  0x46   :  { %8016 = vmatprep.subr.bf16.mxu1 %v8777_v10  ;;  %v707_v58 = vld [vmem:[%s8614_s3] sm:$0xff]  ;;  %s8559_s29 = smov 80   ;;  %s8560_s3 = smov 72  }
  0x47   :  { %s8561_s8 = smov 64   ;;  %s8562_s14 = smov 56  }
  0x48   :  { %7472 = vmatmul.mubr.msk.f32.vlgmr.msra.gmra.mrb[0].mxu1 %vm175_vm0, %v163_v11  ;;  %s8563_s30 = smov 40   ;;  %s8564_s12 = smov 48  }
  0x49   :  { %8018 = vmatpush3.bf16.msra.mxu1 %v8777_v10  ;;  %s9610_s20 = sld [smem:[#allocation12_spill]]  ;;  %s8566_s4 = smov 16  }
  0x4a   :  { %8020 = vmatprep.subr.bf16.mxu1 %v8785_v14  ;;  %s8567_s15 = smov 24   ;;  %s9611_s18 = sld [smem:[#allocation14_spill]] }
  0x4b   :  { %s9612_s23 = sld [smem:[#allocation13_spill]]  ;;  %s9613_s22 = sld [smem:[#allocation15_spill]] }
  0x4c   :  { %s9614_s26 = sld [smem:[#allocation18_spill]]  ;;  %s9615_s1 = sld [smem:[#allocation20_spill]] }
  0x4d   :  { %8022 = vmatpush3.bf16.msra.mxu1 %v8785_v14  ;;  %s9616_s2 = sld [smem:[#allocation16_spill]]  ;;  %s9617_s7 = sld [smem:[#allocation17_spill]] }
  0x4e   :  { %s9618_s11 = sld [smem:[#allocation19_spill]] }
  0xd1   :  { %v1044_v4 = vpop.xlane.xlu0 %1043 }
 0x11b   :  { %v7473_v16 = vpop.f32.mrb[0].mxu1 }
 0x11c   :  { %v254_v17 = vadd.f32 %v7473_v16, %v6990_v15  ;;  %v248_v18 = vpop.f32.mrb[1].mxu1 }
 0x11d   :  { %v249_v19 = vadd.f32 %v6990_v15, %v248_v18 }
 0x11e   :  { %v258_v21 = vmul.f32 %v254_v17, %v254_v17 }
 0x11f   :  { %v257_v20 = vmul.f32 %v249_v19, %v249_v19 }
 0x121   :  { %7482 = vmatprep.mubr.msk.f32.mxu1 %vm175_vm0, %v257_v20 }
 0x122   :  { %7483 = vmatmul.mubr.msk.f32.vlgmr.msra.gmra.mrb[2].mxu1 %vm175_vm0, %v258_v21 }
 0x123   :  { %7508 = vmatprep.mubr.msk.f32.mxu1 %vm621_vm11, %v619_v49 }
 0x1f5   :  { %v7484_v23 = vpop.f32.mrb[2].mxu1 }
 0x1f6   :  { %8306 = vrsqrt.f32 %v7484_v23  ;;  %v331_v24 = vpop.f32.mrb[3].mxu1  ;;  %vm349_vm2 = vcmp.eq.f32.partialorder %v7484_v23, inf  ;;  %v352_v28 = vand.u32 2147483648, %v7484_v23  ;;  %vm351_vm3 = vcmp.eq.f32.partialorder %v7484_v23, 0.0 }
 0x1f7   :  { %8308 = vrsqrt.f32 %v331_v24  ;;  %vm342_vm4 = vcmp.eq.f32.partialorder %v331_v24, inf  ;;  %v345_v31 = vand.u32 2147483648, %v331_v24  ;;  %vm344_vm5 = vcmp.eq.f32.partialorder %v331_v24, 0.0 }
 0x200   :  { %v8307_v25 = vpop.eup %8306 }
 0x201   :  { %v8309_v26 = vpop.eup %8308  ;;  %v348_v27 = vmul.f32 %v8307_v25, %v7484_v23 }
 0x202   :  { %v341_v29 = vmul.f32 %v8309_v26, %v331_v24 }
 0x203   :  { %v350_v30 = vsel %vm349_vm2, %v7484_v23, %v348_v27 }
 0x204   :  { %v353_v32 = vsel %vm351_vm3, %v352_v28, %v350_v30  ;;  %v343_v33 = vsel %vm342_vm4, %v331_v24, %v341_v29  ;;  %vm1668_vm3 = vcmask 25600  }
 0x205   :  { %v355_v34 = vmax.f32 %v353_v32, 1e-12  ;;  %v346_v35 = vsel %vm344_vm5, %v345_v31, %v343_v33 }
 0x206   :  { %v354_v36 = vmax.f32 %v346_v35, 1e-12 }
 0x208   :  { %8310 = vrcp.f32 %v354_v36 }
 0x209   :  { %8312 = vrcp.f32 %v355_v34 }
 0x20a   :  { %8314 = vrcp.f32 %v1044_v4 }
 0x212   :  { %v8311_v37 = vpop.eup %8310 }
 0x213   :  { %v8313_v38 = vpop.eup %8312  ;;  %7487 = vmatprep.mubr.msk.f32.mxu0 %vm360_vm6, %v8311_v37 }
 0x214   :  { %7488 = vmatmul.mubr.msk.f32.vlgmr.msra.gmra.mrb[0].mxu0 %vm360_vm6, %v8313_v38  ;;  %v8315_v6 = vpop.eup %8314 }
 0x215   :  { %7494 = vmatprep.mubr.msk.f32.mxu0 %vm448_vm7, %v8802_v39 }
 0x2e7   :  { %v7489_v40 = vpop.f32.mrb[0].mxu0 }
 0x2e8   :  { %v447_v41 = vmul.f32 %v7489_v40, %v254_v17  ;;  %v437_v42 = vpop.f32.mrb[1].mxu0 }
 0x2e9   :  { %v446_v43 = vmul.f32 %v437_v42, %v249_v19 }
 0x2eb   :  { %v8023_v45 = vpack.c.bf16 %v447_v41, %v446_v43 }
 0x2ed   :  { %8025 = vmatprep.subr.msk.bf16.mxu0 %vm8806_vm10, %v8023_v45 }
 0x2ee   :  { %8028 = vmatpush3.bf16.msk.msra.mxu0 %vm8806_vm10, %v8023_v45 }
 0x2ef   :  { %8031 = vmatprep.subr.msk.bf16.mxu0 %vm8806_vm10, %v8023_v45 }
 0x2f1   :  { %7495 = vmatmul.mubr.msk.f32.vlgmr.msra.gmra.mrb[2].mxu0 %vm448_vm7, %v8815_v46 }
 0x2f2   :  { %8034 = vmatpush3.bf16.msk.msra.mxu0 %vm8806_vm10, %v8023_v45  ;;  %7501 = vmatprep.mubr.msk.f32.mxu0 %vm448_vm7, %v8820_v47 }
 0x2f3   :  { %7511 = vmatprep.subr.mxu0 %v707_v58 }
 0x2f5   :  { %7502 = vmatmul.mubr.msk.f32.vlgmr.msra.gmra.mrb[4].mxu0 %vm448_vm7, %v8829_v48 }
 0x2f6   :  { %7512 = vmatpush3.msra.mxu0 %v707_v58 }
 0x2f7   :  { %7521 = vmatprep.subr.mxu0 %v709_v59 }
 0x3c4   :  { %v7496_v52 = vpop.f32.mrb[2].mxu0 }
 0x3c5   :  { %535 = vst.msk [vmem:[%s8767_s16 + $0x8] sm:$0xff] %vm175_vm0, %v7496_v52  ;;  %v525_v53 = vpop.f32.mrb[3].mxu0 }
 0x3c6   :  { %534 = vst.msk [vmem:[%s8767_s16] sm:$0xff] %vm175_vm0, %v525_v53  ;;  %s9619_s16 = sld [smem:[#allocation21_spill]] }
 0x3c8   :  { %v7503_v54 = vpop.f32.mrb[4].mxu0 }
 0x3c9   :  { %v610_v55 = vpop.f32.mrb[5].mxu0 }
 0x3ca   :  { %v8035_v56 = vpack.c.bf16 %v7503_v54, %v610_v55 }
 0x3cc   :  { %8036 = vmatprep.subr.bf16.mxu1 %v8035_v56 }
 0x3cd   :  { %8038 = vmatpush3.bf16.msra.mxu1 %v8035_v56 }
 0x3ce   :  { %7516 = vmatprep.subr.mxu1 %v708_v60 }
 0x3d0   :  { %7509 = vmatmul.mubr.msk.f32.vlgmr.msra.gmra.mrb[4].mxu1 %vm621_vm11, %v620_v57 }
 0x3d1   :  { %7517 = vmatpush3.msra.mxu1 %v708_v60 }
 0x3d2   :  { %7526 = vmatprep.subr.mxu1 %v710_v3 }
 0x4a3   :  { %v7510_v61 = vpop.f32.mrb[4].mxu1 }
 0x4a4   :  { %v704_v62 = vadd.f32 %v7510_v61, %v447_v41  ;;  %v694_v63 = vpop.f32.mrb[5].mxu1 }
 0x4a5   :  { %v703_v0 = vadd.f32 %v694_v63, %v446_v43 }
 0x4a6   :  { %v706_v1 = vmul.f32 0.5, %v704_v62 }
 0x4a7   :  { %v705_v2 = vmul.f32 0.5, %v703_v0 }
 0x4a8   :  { %878 = vrot.lane.b32.xlu1 %v706_v1, %s8552_s0 }
 0x4a9   :  { %876 = vrot.lane.b32.xlu0 %v705_v2, %s8552_s0  ;;  %7513 = vmatprep.mubr.msk.f32.mxu0 %vm711_vm12, %v705_v2 }
 0x4aa   :  { %7514 = vmatmul.mubr.msk.f32.vlgmr.msra.gmra.mrb[6].mxu0 %vm711_vm12, %v706_v1 }
 0x4ab   :  { %7522 = vmatpush3.msra.mxu0 %v709_v59 }
 0x4ac   :  { %795 = vrot.lane.b32.xlu1 %v706_v1, %s8553_s9  ;;  %7531 = vmatprep.subr.msk.mxu0 %vm367_vm1, %v8793_v22 }
 0x4b0   :  { %793 = vrot.lane.b32.xlu1 %v705_v2, %s8553_s9 }
 0x4b4   :  { %959 = vrot.lane.b32.xlu1 %v705_v2, %s8554_s13 }
 0x4b8   :  { %961 = vrot.lane.b32.xlu1 %v706_v1, %s8554_s13 }
 0x51a   :  { %v879_v5 = vpop.permute.xlu1 %878 }
 0x51b   :  { %v877_v7 = vpop.permute.xlu0 %876 }
 0x51c   :  { %7523 = vmatprep.mubr.msk.f32.mxu0 %vm711_vm12, %v877_v7 }
 0x51d   :  { %7524 = vmatmul.mubr.msk.f32.vlgmr.msra.gmra.mrb[8].mxu0 %vm711_vm12, %v879_v5 }
 0x51e   :  { %v796_v8 = vpop.permute.xlu1 %795  ;;  %7532 = vmatpush3.msk.msra.mxu0 %vm367_vm1, %v8793_v22  ;;  %7533 = vmatprep.mubr.msk.f32.mxu0 %vm360_vm6, %v8315_v6 }
 0x51f   :  { %7547 = vmatprep.subr.msk.mxu0 %vm367_vm1, %v8793_v22 }
 0x521   :  { %7534 = vmatmul.mubr.msk.f32.vlgmr.msra.gmra.mrb[10].mxu0 %vm360_vm6, %v8315_v6 }
 0x522   :  { %v794_v9 = vpop.permute.xlu1 %793  ;;  %7548 = vmatpush3.msk.msra.mxu0 %vm367_vm1, %v8793_v22 }
 0x523   :  { %7518 = vmatprep.mubr.msk.f32.mxu1 %vm711_vm12, %v794_v9  ;;  %8048 = vmatprep.subr.bf16.mxu0 %v8777_v10 }
 0x524   :  { %7519 = vmatmul.mubr.msk.f32.vlgmr.msra.gmra.mrb[6].mxu1 %vm711_vm12, %v796_v8 }
 0x525   :  { %7527 = vmatpush3.msra.mxu1 %v710_v3 }
 0x526   :  { %v960_v11 = vpop.permute.xlu1 %959  ;;  %8040 = vmatprep.subr.bf16.mxu1 %v8777_v10 }
 0x527   :  { %7528 = vmatprep.mubr.msk.f32.mxu1 %vm711_vm12, %v960_v11 }
 0x52a   :  { %v962_v12 = vpop.permute.xlu1 %961 }
 0x52b   :  { %7529 = vmatmul.mubr.msk.f32.vlgmr.msra.gmra.mrb[8].mxu1 %vm711_vm12, %v962_v12 }
 0x52c   :  { %8042 = vmatpush3.bf16.msra.mxu1 %v8777_v10 }
 0x52d   :  { %8044 = vmatprep.subr.bf16.mxu1 %v8785_v14 }
 0x530   :  { %8046 = vmatpush3.bf16.msra.mxu1 %v8785_v14 }
 0x531   :  { %8056 = vmatprep.subr.bf16.mxu1 %v8777_v10 }
 0x57d   :  { %v8877_v13 = vpop.f32.mrb[6].mxu0 }
 0x57e   :  { %v8879_v15 = vpop.f32.mrb[7].mxu0 }
 0x5f0   :  { %v8881_v16 = vpop.f32.mrb[8].mxu0 }
 0x5f1   :  { %v8883_v17 = vpop.f32.mrb[9].mxu0 }
 0x5f4   :  { %v7535_v18 = vpop.f32.mrb[10].mxu0 }
 0x5f5   :  { %v1126_v19 = vmul.f32 %v7535_v18, %v8877_v13  ;;  %v1134_v20 = vmul.f32 %v7535_v18, %v8881_v16  ;;  %v1116_v21 = vpop.f32.mrb[11].mxu0 }
 0x5f6   :  { %v1125_v23 = vmul.f32 %v1116_v21, %v8879_v15  ;;  %v1133_v24 = vmul.f32 %v1116_v21, %v8883_v17 }
 0x5f7   :  { %v8889_v25 = vpop.f32.mrb[6].mxu1 }
 0x5f8   :  { %v1130_v26 = vmul.f32 %v7535_v18, %v8889_v25  ;;  %v8892_v27 = vpop.f32.mrb[7].mxu1 }
 0x5f9   :  { %v1129_v28 = vmul.f32 %v1116_v21, %v8892_v27 }
 0x5fa   :  { %v1132_v29 = vadd.f32 %v1130_v26, %v1126_v19 }
 0x5fb   :  { %v1131_v30 = vadd.f32 %v1129_v28, %v1125_v23 }
 0x5fc   :  { %v1136_v31 = vadd.f32 %v1134_v20, %v1132_v29 }
 0x5fd   :  { %v1135_v32 = vadd.f32 %v1133_v24, %v1131_v30 }
 0x5fe   :  { %v8895_v33 = vpop.f32.mrb[8].mxu1 }
 0x5ff   :  { %v1138_v34 = vmul.f32 %v7535_v18, %v8895_v33  ;;  %v8898_v35 = vpop.f32.mrb[9].mxu1 }
 0x600   :  { %v1137_v36 = vmul.f32 %v1116_v21, %v8898_v35 }
 0x601   :  { %v1140_v37 = vadd.f32 %v1138_v34, %v1136_v31 }
 0x602   :  { %v1139_v38 = vadd.f32 %v1137_v36, %v1135_v32 }
 0x603   :  { %v1142_v41 = vmul.f32 %v1140_v37, %v1140_v37 }
 0x604   :  { %v1141_v40 = vmul.f32 %v1139_v38, %v1139_v38 }
 0x606   :  { %7544 = vmatprep.mubr.msk.f32.mxu1 %vm175_vm0, %v1141_v40 }
 0x607   :  { %7545 = vmatmul.mubr.msk.f32.vlgmr.msra.gmra.mrb[10].mxu1 %vm175_vm0, %v1142_v41 }
 0x608   :  { %8058 = vmatpush3.bf16.msra.mxu1 %v8777_v10 }
 0x609   :  { %8060 = vmatprep.subr.bf16.mxu1 %v8785_v14 }
 0x60c   :  { %8062 = vmatpush3.bf16.msra.mxu1 %v8785_v14 }
 0x60d   :  { %8072 = vmatprep.subr.bf16.mxu1 %v8777_v10 }
 0x6da   :  { %v7546_v42 = vpop.f32.mrb[10].mxu1 }
 0x6db   :  { %v1231_v43 = vadd.f32 1e-08, %v7546_v42  ;;  %v1215_v45 = vpop.f32.mrb[11].mxu1  ;;  %v1225_v53 = vadd.f32 1.0, %v7546_v42 }
 0x6dc   :  { %v1230_v49 = vadd.f32 1e-08, %v1215_v45  ;;  %v1224_v51 = vadd.f32 1.0, %v1215_v45 }
 0x6dd   :  { %8316 = vrsqrt.f32 %v1231_v43  ;;  %vm1241_vm13 = vcmp.eq.f32.partialorder %v1231_v43, inf  ;;  %v1244_v56 = vand.u32 2147483648, %v1231_v43  ;;  %vm1243_vm14 = vcmp.eq.f32.partialorder %v1231_v43, 0.0 }
 0x6de   :  { %8318 = vrsqrt.f32 %v1230_v49  ;;  %vm1234_vm15 = vcmp.eq.f32.partialorder %v1230_v49, inf  ;;  %v1237_v60 = vand.u32 2147483648, %v1230_v49  ;;  %vm1236_vm2 = vcmp.eq.f32.partialorder %v1230_v49, 0.0 }
 0x6df   :  { %8320 = vrcp.f32 %v1224_v51 }
 0x6e0   :  { %8322 = vrcp.f32 %v1225_v53 }
 0x6e7   :  { %v8317_v52 = vpop.eup %8316 }
 0x6e8   :  { %v1240_v54 = vmul.f32 %v8317_v52, %v1231_v43  ;;  %v8319_v55 = vpop.eup %8318 }
 0x6e9   :  { %v1233_v58 = vmul.f32 %v8319_v55, %v1230_v49  ;;  %v8321_v63 = vpop.eup %8320 }
 0x6ea   :  { %v1242_v57 = vsel %vm1241_vm13, %v1231_v43, %v1240_v54  ;;  %v8323_v0 = vpop.eup %8322  ;;  %v1227_v2 = vmul.f32 %v8321_v63, %v1215_v45  ;;  %vm2539_vm13 = vcmask 1045504  }
 0x6eb   :  { %v1245_v59 = vsel %vm1243_vm14, %v1244_v56, %v1242_v57  ;;  %v1235_v61 = vsel %vm1234_vm15, %v1230_v49, %v1233_v58  ;;  %v1229_v4 = vmul.f32 %v8323_v0, %v7546_v42  ;;  %vm2535_vm14 = vcmask 48128  }
 0x6ec   :  { %8324 = vrcp.f32 %v1245_v59  ;;  %v1238_v62 = vsel %vm1236_vm2, %v1237_v60, %v1235_v61 }
 0x6ed   :  { %8326 = vrcp.f32 %v1238_v62 }
 0x6f6   :  { %v8325_v1 = vpop.eup %8324 }
 0x6f7   :  { %v8327_v3 = vpop.eup %8326  ;;  %v1249_v6 = vmul.f32 %v8325_v1, %v1229_v4 }
 0x6f8   :  { %v1247_v5 = vmul.f32 %v8327_v3, %v1227_v2 }
 0x6fa   :  { %7549 = vmatprep.mubr.msk.f32.mxu0 %vm360_vm6, %v1247_v5 }
 0x6fb   :  { %7550 = vmatmul.mubr.msk.f32.vlgmr.msra.gmra.mrb[12].mxu0 %vm360_vm6, %v1249_v6 }
 0x6fc   :  { %8050 = vmatpush3.bf16.msra.mxu0 %v8777_v10 }
 0x6fd   :  { %8052 = vmatprep.subr.bf16.mxu0 %v8785_v14 }
 0x700   :  { %8054 = vmatpush3.bf16.msra.mxu0 %v8785_v14 }
 0x701   :  { %8064 = vmatprep.subr.bf16.mxu0 %v8777_v10 }
 0x7ce   :  { %v7551_v7 = vpop.f32.mrb[12].mxu0 }
 0x7cf   :  { %v1332_v8 = vmul.f32 %v7551_v7, %v1140_v37  ;;  %v1322_v9 = vpop.f32.mrb[13].mxu0 }
 0x7d0   :  { %v1331_v11 = vmul.f32 %v1322_v9, %v1139_v38 }
 0x7d1   :  { %v1334_v12 = vmul.f32 %v8877_v13, %v1332_v8  ;;  %v1417_v18 = vmul.f32 %v8889_v25, %v1332_v8  ;;  %v1500_v19 = vmul.f32 %v8881_v16, %v1332_v8  ;;  %v1583_v20 = vmul.f32 %v8895_v33, %v1332_v8 }
 0x7d2   :  { %v1333_v21 = vmul.f32 %v1331_v11, %v8879_v15  ;;  %v1416_v23 = vmul.f32 %v1331_v11, %v8892_v27  ;;  %v1499_v24 = vmul.f32 %v1331_v11, %v8883_v17  ;;  %v1582_v26 = vmul.f32 %v1331_v11, %v8898_v35 }
 0x7d4   :  { %7560 = vmatprep.mubr.msk.f32.mxu0 %vm175_vm0, %v1333_v21  ;;  %7571 = vmatprep.mubr.msk.f32.mxu1 %vm175_vm0, %v1416_v23 }
 0x7d5   :  { %7561 = vmatmul.mubr.msk.f32.vlgmr.msra.gmra.mrb[14].mxu0 %vm175_vm0, %v1334_v12  ;;  %7572 = vmatmul.mubr.msk.f32.vlgmr.msra.gmra.mrb[12].mxu1 %vm175_vm0, %v1417_v18 }
 0x7d6   :  { %8066 = vmatpush3.bf16.msra.mxu0 %v8777_v10  ;;  %8074 = vmatpush3.bf16.msra.mxu1 %v8777_v10 }
 0x7d7   :  { %7582 = vmatprep.mubr.msk.f32.mxu0 %vm175_vm0, %v1499_v24  ;;  %7593 = vmatprep.mubr.msk.f32.mxu1 %vm175_vm0, %v1582_v26 }
 0x7d8   :  { %8068 = vmatprep.subr.bf16.mxu0 %v8785_v14  ;;  %8076 = vmatprep.subr.bf16.mxu1 %v8785_v14 }
 0x7da   :  { %8070 = vmatpush3.bf16.msra.mxu0 %v8785_v14  ;;  %8078 = vmatpush3.bf16.msra.mxu1 %v8785_v14 }
 0x7db   :  { %7596 = vmatprep.subr.msk.mxu0 %vm367_vm1, %v8793_v22  ;;  %7601 = vmatprep.subr.msk.mxu1 %vm367_vm1, %v8793_v22 }
 0x7dd   :  { %7583 = vmatmul.mubr.msk.f32.vlgmr.msra.gmra.mrb[16].mxu0 %vm175_vm0, %v1500_v19  ;;  %7594 = vmatmul.mubr.msk.f32.vlgmr.msra.gmra.mrb[14].mxu1 %vm175_vm0, %v1583_v20 }
 0x7de   :  { %7597 = vmatpush3.msk.msra.mxu0 %vm367_vm1, %v8793_v22  ;;  %7602 = vmatpush3.msk.msra.mxu1 %vm367_vm1, %v8793_v22 }
 0x7df   :  { %7606 = vmatprep.subr.msk.mxu0 %vm367_vm1, %v8793_v22  ;;  %7611 = vmatprep.subr.msk.mxu1 %vm367_vm1, %v8793_v22 }
 0x8a8   :  { %v7562_v28 = vpop.f32.mrb[14].mxu0  ;;  %v7573_v29 = vpop.f32.mrb[12].mxu1 }
 0x8a9   :  { %v1407_v30 = vpop.f32.mrb[15].mxu0  ;;  %v1490_v31 = vpop.f32.mrb[13].mxu1  ;;  %v1669_v32 = vsel %vm1668_vm3, %v7562_v28, -inf  ;;  %v1691_v36 = vsel %vm1668_vm3, %v7573_v29, -inf }
 0x8aa   :  { %1670 = vmax.xlane.f32.xlu0 %v1669_v32  ;;  %v1665_v34 = vsel %vm360_vm6, %v1407_v30, -inf  ;;  %v1688_v37 = vsel %vm360_vm6, %v1490_v31, -inf }
 0x8ab   :  { %1666 = vmax.xlane.f32.xlu1 %v1665_v34 }
 0x8ae   :  { %1692 = vmax.xlane.f32.xlu0 %v1691_v36 }
 0x8af   :  { %1689 = vmax.xlane.f32.xlu1 %v1688_v37 }
 0x8b0   :  { %v7595_v38 = vpop.f32.mrb[14].mxu1  ;;  %v7584_v40 = vpop.f32.mrb[16].mxu0 }
 0x8b1   :  { %v1573_v41 = vpop.f32.mrb[17].mxu0  ;;  %v1656_v42 = vpop.f32.mrb[15].mxu1  ;;  %v1713_v43 = vsel %vm1668_vm3, %v7584_v40, -inf  ;;  %v1735_v49 = vsel %vm1668_vm3, %v7595_v38, -inf }
 0x8b2   :  { %1714 = vmax.xlane.f32.xlu0 %v1713_v43  ;;  %v1710_v45 = vsel %vm360_vm6, %v1573_v41, -inf  ;;  %v1732_v51 = vsel %vm360_vm6, %v1656_v42, -inf }
 0x8b3   :  { %1711 = vmax.xlane.f32.xlu1 %v1710_v45 }
 0x8b6   :  { %1736 = vmax.xlane.f32.xlu0 %v1735_v49 }
 0x8b7   :  { %1733 = vmax.xlane.f32.xlu1 %v1732_v51 }
 0x937   :  { %v1671_v52 = vpop.xlane.xlu0 %1670 }
 0x938   :  { %v1673_v53 = vsub.f32 %v7562_v28, %v1671_v52  ;;  %v1667_v54 = vpop.xlane.xlu1 %1666 }
 0x939   :  { %v1672_v55 = vsub.f32 %v1407_v30, %v1667_v54 }
 0x93a   :  { %v1676_v56 = vmul.f32 1.442695, %v1673_v53 }
 0x93b   :  { %v1674_v57 = vmul.f32 1.442695, %v1672_v55  ;;  %v1693_v58 = vpop.xlane.xlu0 %1692 }
 0x93c   :  { %8328 = vpow2.f32 %v1676_v56  ;;  %v1695_v59 = vsub.f32 %v7573_v29, %v1693_v58  ;;  %v1690_v60 = vpop.xlane.xlu1 %1689 }
 0x93d   :  { %8330 = vpow2.f32 %v1674_v57  ;;  %v1694_v61 = vsub.f32 %v1490_v31, %v1690_v60 }
 0x93e   :  { %v1698_v62 = vmul.f32 1.442695, %v1695_v59 }
 0x93f   :  { %v1696_v63 = vmul.f32 1.442695, %v1694_v61  ;;  %v1715_v0 = vpop.xlane.xlu0 %1714 }
 0x940   :  { %8332 = vpow2.f32 %v1698_v62  ;;  %v1717_v1 = vsub.f32 %v7584_v40, %v1715_v0  ;;  %v1712_v2 = vpop.xlane.xlu1 %1711 }
 0x941   :  { %8334 = vpow2.f32 %v1696_v63  ;;  %v1716_v3 = vsub.f32 %v1573_v41, %v1712_v2 }
 0x942   :  { %v1720_v4 = vmul.f32 1.442695, %v1717_v1 }
 0x943   :  { %v1718_v5 = vmul.f32 1.442695, %v1716_v3  ;;  %v1737_v6 = vpop.xlane.xlu0 %1736 }
 0x944   :  { %8336 = vpow2.f32 %v1720_v4  ;;  %v1739_v7 = vsub.f32 %v7595_v38, %v1737_v6  ;;  %v1734_v8 = vpop.xlane.xlu1 %1733 }
 0x945   :  { %8338 = vpow2.f32 %v1718_v5  ;;  %v1738_v9 = vsub.f32 %v1656_v42, %v1734_v8 }
 0x946   :  { %v8329_v11 = vpop.eup %8328  ;;  %v1742_v12 = vmul.f32 1.442695, %v1739_v7 }
 0x947   :  { %v8331_v18 = vpop.eup %8330  ;;  %v1740_v19 = vmul.f32 1.442695, %v1738_v9  ;;  %v1681_v20 = vsel %vm1668_vm3, %v8329_v11, 0.0 }
 0x948   :  { %8340 = vpow2.f32 %v1742_v12  ;;  %1682 = vadd.xlane.f32.xlu0 %v1681_v20  ;;  %v1678_v21 = vsel %vm360_vm6, %v8331_v18, 0.0 }
 0x949   :  { %8342 = vpow2.f32 %v1740_v19  ;;  %1679 = vadd.xlane.f32.xlu1 %v1678_v21 }
 0x94a   :  { %v8333_v23 = vpop.eup %8332 }
 0x94b   :  { %v8335_v24 = vpop.eup %8334  ;;  %v1703_v26 = vsel %vm1668_vm3, %v8333_v23, 0.0 }
 0x94c   :  { %1704 = vadd.xlane.f32.xlu0 %v1703_v26  ;;  %v1700_v28 = vsel %vm360_vm6, %v8335_v24, 0.0 }
 0x94d   :  { %1701 = vadd.xlane.f32.xlu1 %v1700_v28 }
 0x94e   :  { %v8337_v29 = vpop.eup %8336 }
 0x94f   :  { %v8339_v30 = vpop.eup %8338  ;;  %v1725_v31 = vsel %vm1668_vm3, %v8337_v29, 0.0 }
 0x950   :  { %1726 = vadd.xlane.f32.xlu0 %v1725_v31  ;;  %v1722_v32 = vsel %vm360_vm6, %v8339_v30, 0.0 }
 0x951   :  { %1723 = vadd.xlane.f32.xlu1 %v1722_v32 }
 0x952   :  { %v8341_v34 = vpop.eup %8340 }
 0x953   :  { %v8343_v36 = vpop.eup %8342  ;;  %v1747_v37 = vsel %vm1668_vm3, %v8341_v34, 0.0 }
 0x954   :  { %1748 = vadd.xlane.f32.xlu0 %v1747_v37  ;;  %v1744_v38 = vsel %vm360_vm6, %v8343_v36, 0.0 }
 0x955   :  { %1745 = vadd.xlane.f32.xlu1 %v1744_v38 }
 0x9d5   :  { %v1683_v40 = vpop.xlane.xlu0 %1682 }
 0x9d6   :  { %8344 = vrcp.f32 %v1683_v40  ;;  %v1680_v41 = vpop.xlane.xlu1 %1679 }
 0x9d7   :  { %8346 = vrcp.f32 %v1680_v41 }
 0x9d9   :  { %v1705_v42 = vpop.xlane.xlu0 %1704 }
 0x9da   :  { %8348 = vrcp.f32 %v1705_v42  ;;  %v1702_v43 = vpop.xlane.xlu1 %1701 }
 0x9db   :  { %8350 = vrcp.f32 %v1702_v43 }
 0x9dd   :  { %v1727_v45 = vpop.xlane.xlu0 %1726 }
 0x9de   :  { %8352 = vrcp.f32 %v1727_v45  ;;  %v1724_v49 = vpop.xlane.xlu1 %1723 }
 0x9df   :  { %8354 = vrcp.f32 %v1724_v49 }
 0x9e0   :  { %v8345_v51 = vpop.eup %8344 }
 0x9e1   :  { %v8347_v52 = vpop.eup %8346  ;;  %v1749_v53 = vpop.xlane.xlu0 %1748  ;;  %v1687_v56 = vmul.f32 %v8345_v51, %v8329_v11 }
 0x9e2   :  { %8356 = vrcp.f32 %v1749_v53  ;;  %v1746_v54 = vpop.xlane.xlu1 %1745  ;;  %v1685_v55 = vmul.f32 %v8347_v52, %v8331_v18 }
 0x9e3   :  { %8358 = vrcp.f32 %v1746_v54 }
 0x9e4   :  { %v8349_v57 = vpop.eup %8348  ;;  %7598 = vmatprep.mubr.msk.f32.mxu0 %vm360_vm6, %v1685_v55 }
 0x9e5   :  { %v8351_v58 = vpop.eup %8350  ;;  %7599 = vmatmul.mubr.msk.f32.vlgmr.msra.gmra.mrb[18].mxu0 %vm360_vm6, %v1687_v56  ;;  %v1709_v60 = vmul.f32 %v8349_v57, %v8333_v23 }
 0x9e6   :  { %v1707_v59 = vmul.f32 %v8351_v58, %v8335_v24  ;;  %7607 = vmatpush3.msk.msra.mxu0 %vm367_vm1, %v8793_v22 }
 0x9e7   :  { %8080 = vmatprep.subr.bf16.mxu0 %v8777_v10 }
 0x9e8   :  { %v8353_v61 = vpop.eup %8352  ;;  %7603 = vmatprep.mubr.msk.f32.mxu1 %vm360_vm6, %v1707_v59 }
 0x9e9   :  { %v8355_v62 = vpop.eup %8354  ;;  %7604 = vmatmul.mubr.msk.f32.vlgmr.msra.gmra.mrb[16].mxu1 %vm360_vm6, %v1709_v60  ;;  %v1731_v0 = vmul.f32 %v8353_v61, %v8337_v29 }
 0x9ea   :  { %v1729_v63 = vmul.f32 %v8355_v62, %v8339_v30  ;;  %7612 = vmatpush3.msk.msra.mxu1 %vm367_vm1, %v8793_v22 }
 0x9eb   :  { %7627 = vmatprep.subr.msk.mxu1 %vm367_vm1, %v8793_v22 }
 0x9ec   :  { %v8357_v1 = vpop.eup %8356  ;;  %7608 = vmatprep.mubr.msk.f32.mxu0 %vm360_vm6, %v1729_v63 }
 0x9ed   :  { %v8359_v2 = vpop.eup %8358  ;;  %7609 = vmatmul.mubr.msk.f32.vlgmr.msra.gmra.mrb[20].mxu0 %vm360_vm6, %v1731_v0  ;;  %v1753_v4 = vmul.f32 %v8357_v1, %v8341_v34 }
 0x9ee   :  { %v1751_v3 = vmul.f32 %v8359_v2, %v8343_v36  ;;  %8082 = vmatpush3.bf16.msra.mxu0 %v8777_v10 }
 0x9ef   :  { %8084 = vmatprep.subr.bf16.mxu0 %v8785_v14 }
 0x9f0   :  { %7613 = vmatprep.mubr.msk.f32.mxu1 %vm360_vm6, %v1751_v3  ;;  %v2376_v3 = vld [vmem:[%s8579_s5 + $0x8] sm:$0xff] }
 0x9f1   :  { %7614 = vmatmul.mubr.msk.f32.vlgmr.msra.gmra.mrb[18].mxu1 %vm360_vm6, %v1753_v4  ;;  %v8555_v4 = vmov 0.0|0.0  }
 0x9f2   :  { %8086 = vmatpush3.bf16.msra.mxu0 %v8785_v14  ;;  %7628 = vmatpush3.msk.msra.mxu1 %vm367_vm1, %v8793_v22 }
 0xab8   :  { %v7600_v5 = vpop.f32.mrb[18].mxu0 }
 0xab9   :  { %v1836_v6 = vmul.f32 %v7600_v5, %v8877_v13  ;;  %v1826_v7 = vpop.f32.mrb[19].mxu0 }
 0xaba   :  { %v1835_v8 = vmul.f32 %v1826_v7, %v8879_v15  ;;  %v2458_v7 = vld [vmem:[%s8594_s17] sm:$0x3f]  ;;  %s9608_s17 = sld [smem:[#allocation9_spill]] }
 0xabc   :  { %v7605_v9 = vpop.f32.mrb[16].mxu1 }
 0xabd   :  { %v1921_v10 = vmul.f32 %v7605_v9, %v8889_v25  ;;  %v1911_v11 = vpop.f32.mrb[17].mxu1  ;;  %v2700_v9 = vsel %vm448_vm7, %v8815_v46, 0.0 }
 0xabe   :  { %v1920_v12 = vmul.f32 %v1911_v11, %v8892_v27  ;;  %2701 = vadd.xlane.f32.xlu0 %v2700_v9 }
 0xabf   :  { %v1923_v18 = vadd.f32 %v1921_v10, %v1836_v6 }
 0xac0   :  { %v1922_v19 = vadd.f32 %v1920_v12, %v1835_v8  ;;  %v7610_v20 = vpop.f32.mrb[20].mxu0  ;;  %v2697_v8 = vsel %vm448_vm7, %v8802_v39, 0.0 }
 0xac1   :  { %v2006_v14 = vmul.f32 %v7610_v20, %v8881_v16  ;;  %v1996_v21 = vpop.f32.mrb[21].mxu0  ;;  %2698 = vadd.xlane.f32.xlu1 %v2697_v8  ;;  %v2783_v20 = vld [vmem:[%s8644_s6] sm:$0xff] }
 0xac2   :  { %v2005_v22 = vmul.f32 %v1996_v21, %v8883_v17 }
 0xac3   :  { %v2008_v23 = vadd.f32 %v2006_v14, %v1923_v18  ;;  %v2784_v14 = vld [vmem:[%s8644_s6 + $0x8] sm:$0xff] }
 0xac4   :  { %v2007_v24 = vadd.f32 %v2005_v22, %v1922_v19  ;;  %v7615_v13 = vpop.f32.mrb[18].mxu1  ;;  %v2534_v19 = vld [vmem:[%s8737_s27] sm:$0x3]  ;;  %v8112_v22 = vpack.c.bf16 %v2784_v14, %v2783_v20  ;;  %s8565_s27 = smov 8  }
 0xac5   :  { %v2091_v26 = vmul.f32 %v7615_v13, %v8895_v33  ;;  %v2081_v15 = vpop.f32.mrb[19].mxu1 }
 0xac6   :  { %v2090_v28 = vmul.f32 %v2081_v15, %v8898_v35  ;;  %v2703_v15 = vld [vmem:[%s9608_s17] sm:$0xff] }
 0xac7   :  { %v2093_v25 = vadd.f32 %v2091_v26, %v2008_v23  ;;  %v2786_v23 = vld [vmem:[%s8644_s6 + $0x18] sm:$0xff]  ;;  %v2704_v26 = vld [vmem:[%s9608_s17 + $0x8] sm:$0xff]  ;;  %s9624_s17 = sld [smem:[#allocation28_spill]] }
 0xac8   :  { %v2092_v29 = vadd.f32 %v2090_v28, %v2007_v24 }
 0xac9   :  { %v2095_v27 = vmul.f32 %v2093_v25, %v2093_v25 }
 0xaca   :  { %v2094_v30 = vmul.f32 %v2092_v29, %v2092_v29 }
 0xacc   :  { %7624 = vmatprep.mubr.msk.f32.mxu0 %vm175_vm0, %v2094_v30 }
 0xacd   :  { %7625 = vmatmul.mubr.msk.f32.vlgmr.msra.gmra.mrb[22].mxu0 %vm175_vm0, %v2095_v27 }
 0xb4e   :  { %v9051_v30 = vpop.xlane.xlu1 %2698 }
 0xba0   :  { %v7626_v16 = vpop.f32.mrb[22].mxu0 }
 0xba1   :  { %v2184_v31 = vadd.f32 1e-08, %v7626_v16  ;;  %v2168_v32 = vpop.f32.mrb[23].mxu0  ;;  %v2178_v33 = vadd.f32 1.0, %v7626_v16 }
 0xba2   :  { %v2183_v17 = vadd.f32 1e-08, %v2168_v32  ;;  %v2177_v34 = vadd.f32 1.0, %v2168_v32 }
 0xba3   :  { %8360 = vrsqrt.f32 %v2184_v31  ;;  %vm2194_vm1 = vcmp.eq.f32.partialorder %v2184_v31, inf  ;;  %v2197_v35 = vand.u32 2147483648, %v2184_v31  ;;  %vm2196_vm4 = vcmp.eq.f32.partialorder %v2184_v31, 0.0 }
 0xba4   :  { %8362 = vrsqrt.f32 %v2183_v17  ;;  %vm2187_vm5 = vcmp.eq.f32.partialorder %v2183_v17, inf  ;;  %v2190_v43 = vand.u32 2147483648, %v2183_v17  ;;  %vm2189_vm8 = vcmp.eq.f32.partialorder %v2183_v17, 0.0 }
 0xba5   :  { %8364 = vrcp.f32 %v2177_v34 }
 0xba6   :  { %8366 = vrcp.f32 %v2178_v33 }
 0xbad   :  { %v8361_v36 = vpop.eup %8360 }
 0xbae   :  { %v2193_v37 = vmul.f32 %v8361_v36, %v2184_v31  ;;  %v8363_v38 = vpop.eup %8362 }
 0xbaf   :  { %v2186_v41 = vmul.f32 %v8363_v38, %v2183_v17  ;;  %v8365_v51 = vpop.eup %8364 }
 0xbb0   :  { %v2195_v40 = vsel %vm2194_vm1, %v2184_v31, %v2193_v37  ;;  %v8367_v52 = vpop.eup %8366  ;;  %v2180_v54 = vmul.f32 %v8365_v51, %v2168_v32 }
 0xbb1   :  { %v2198_v42 = vsel %vm2196_vm4, %v2197_v35, %v2195_v40  ;;  %v2188_v45 = vsel %vm2187_vm5, %v2183_v17, %v2186_v41  ;;  %v2182_v56 = vmul.f32 %v8367_v52, %v7626_v16  ;;  %v9053_v16 = vpop.xlane.xlu0 %2701 }
 0xbb2   :  { %8368 = vrcp.f32 %v2198_v42  ;;  %v2191_v49 = vsel %vm2189_vm8, %v2190_v43, %v2188_v45 }
 0xbb3   :  { %8370 = vrcp.f32 %v2191_v49 }
 0xbbc   :  { %v8369_v53 = vpop.eup %8368 }
 0xbbd   :  { %v8371_v55 = vpop.eup %8370  ;;  %v2202_v58 = vmul.f32 %v8369_v53, %v2182_v56 }
 0xbbe   :  { %v2200_v57 = vmul.f32 %v8371_v55, %v2180_v54 }
 0xbc0   :  { %7629 = vmatprep.mubr.msk.f32.mxu1 %vm360_vm6, %v2200_v57 }
 0xbc1   :  { %7630 = vmatmul.mubr.msk.f32.vlgmr.msra.gmra.mrb[20].mxu1 %vm360_vm6, %v2202_v58  ;;  %vm8556_vm6 = vmmov 0  }
 0xbc2   :  { %7636 = vmatprep.mubr.msk.f32.mxu1 %vm448_vm7, %v8820_v47  ;;  %v2375_v47 = vld [vmem:[%s8579_s5] sm:$0xff]  ;;  %s9607_s5 = sld [smem:[#allocation27_spill]] }
 0xbc3   :  { %7643 = vmatprep.mubr.msk.f32.mxu0 %vm621_vm11, %v2375_v47 }
 0xbc8   :  { %v2614_v21 = vld [vmem:[%s9607_s5] sm:$0xff]  ;;  %v2615_v44 = vld [vmem:[%s9607_s5 + $0x8] sm:$0xff]  ;;  %s9623_s5 = sld [smem:[#allocation24_spill]] }
 0xc94   :  { %v7631_v59 = vpop.f32.mrb[20].mxu1 }
 0xc95   :  { %v2285_v60 = vmul.f32 %v7631_v59, %v2093_v25  ;;  %v2275_v61 = vpop.f32.mrb[21].mxu1 }
 0xc96   :  { %v2284_v62 = vmul.f32 %v2275_v61, %v2092_v29 }
 0xc97   :  { %2288 = vst.msk [vmem:[%s8747_s24 + $0x8] sm:$0x3] %vm2287_vm9, %v2285_v60 }
 0xc98   :  { %2286 = vst.msk [vmem:[%s8747_s24] sm:$0xff] %vm175_vm0, %v2284_v62  ;;  %v8087_v63 = vpack.c.bf16 %v2285_v60, %v2284_v62  ;;  %s9609_s24 = sld [smem:[#allocation10_spill]] }
 0xc9a   :  { %8089 = vmatprep.subr.msk.bf16.mxu1 %vm8806_vm10, %v8087_v63 }
 0xc9b   :  { %8092 = vmatpush3.bf16.msk.msra.mxu1 %vm8806_vm10, %v8087_v63 }
 0xc9c   :  { %8097 = vmatprep.subr.bf16.mxu1 %v8555_v4 }
 0xc9e   :  { %7637 = vmatmul.mubr.msk.f32.vlgmr.msra.gmra.mrb[22].mxu1 %vm448_vm7, %v8829_v48  ;;  %v9148_v58 = vld [vmem:[%s9609_s24] sm:$0xff] }
 0xc9f   :  { %7650 = vmatprep.mubr.msk.f32.mxu1 %vm8556_vm6, %v8551_v50 }
 0xd71   :  { %v7638_v0 = vpop.f32.mrb[22].mxu1 }
 0xd72   :  { %v2366_v1 = vpop.f32.mrb[23].mxu1 }
 0xd73   :  { %v8093_v2 = vpack.c.bf16 %v7638_v0, %v2366_v1 }
 0xd75   :  { %8094 = vmatprep.subr.bf16.mxu0 %v8093_v2 }
 0xd76   :  { %8096 = vmatpush3.bf16.msra.mxu0 %v8093_v2 }
 0xd77   :  { %7653 = vmatprep.subr.mxu0 %v8551_v50 }
 0xd79   :  { %7644 = vmatmul.mubr.msk.f32.vlgmr.msra.gmra.mrb[24].mxu0 %vm621_vm11, %v2376_v3 }
 0xd7a   :  { %7655 = vmatprep.mubr.msk.f32.mxu0 %vm8556_vm6, %v8551_v50 }
 0xe4c   :  { %v7645_v48 = vpop.f32.mrb[24].mxu0 }
 0xe4d   :  { %v2449_v5 = vpop.f32.mrb[25].mxu0 }
 0xe4e   :  { %v8098_v6 = vpack.c.bf16 %v7645_v48, %v2449_v5 }
 0xe50   :  { %8099 = vmatpush3.bf16.msra.mxu1 %v8098_v6 }
 0xe51   :  { %8102 = vmatprep.subr.msk.bf16.mxu1 %vm8806_vm10, %v8087_v63 }
 0xe53   :  { %7651 = vmatmul.mubr.msk.f32.vlgmr.msra.gmra.mrb[24].mxu1 %vm621_vm11, %v2458_v7 }
 0xe54   :  { %8105 = vmatpush3.bf16.msk.msra.mxu1 %vm8806_vm10, %v8087_v63  ;;  %7662 = vmatprep.mubr.msk.f32.mxu1 %vm448_vm7, %v2614_v21 }
 0xe55   :  { %8113 = vmatprep.subr.bf16.mxu1 %v8112_v22 }
 0xe57   :  { %7663 = vmatmul.mubr.msk.f32.vlgmr.msra.gmra.mrb[26].mxu1 %vm448_vm7, %v2615_v44 }
 0xe58   :  { %8115 = vmatpush3.bf16.msra.mxu1 %v8112_v22 }
 0xf26   :  { %v2528_v10 = vpop.f32.mrb[24].mxu1 }
 0xf27   :  { %v2532_v11 = vadd.f32 %v2528_v10, %v2366_v1  ;;  %v7652_v12 = vpop.f32.mrb[25].mxu1 }
 0xf29   :  { %v2533_v18 = vmul.f32 0.5, %v2532_v11 }
 0xf2a   :  { %v9067_v17 = vpop.f32.mrb[26].mxu1 }
 0xf2b   :  { %7654 = vmatpush3.msk.msra.mxu0 %vm2539_vm13, %v2533_v18  ;;  %v9069_v34 = vpop.f32.mrb[27].mxu1 }
 0xf2c   :  { %7656 = vmatmul.mubr.msk.f32.vlgmr.msra.gmra.mrb[26].mxu0 %vm2535_vm14, %v2534_v19  ;;  %8108 = vmatprep.subr.msk.bf16.mxu0 %vm8806_vm10, %v8087_v63 }
 0xf2d   :  { %8111 = vmatpush3.bf16.msk.msra.mxu0 %vm8806_vm10, %v8087_v63  ;;  %7669 = vmatprep.mubr.msk.f32.mxu0 %vm448_vm7, %v8802_v39  ;;  %v2785_v39 = vld [vmem:[%s8644_s6 + $0x10] sm:$0xff]  ;;  %vm4354_vm10 = vcmask 523264  }
 0xf2e   :  { %7683 = vmatprep.subr.mxu0 %v8551_v50  ;;  %v8116_v24 = vpack.c.bf16 %v2786_v23, %v2785_v39 }
 0xf30   :  { %7670 = vmatmul.mubr.msk.f32.vlgmr.msra.gmra.mrb[28].mxu0 %vm448_vm7, %v8815_v46  ;;  %8117 = vmatprep.subr.bf16.mxu1 %v8116_v24  ;;  %vm3549_vm7 = vcmask 195584  }
 0xf31   :  { %7685 = vmatprep.mubr.msk.f32.mxu0 %vm8556_vm6, %v8551_v50  ;;  %8119 = vmatpush3.bf16.msra.mxu1 %v8116_v24 }
 0xf32   :  { %7693 = vmatprep.subr.mxu1 %v8551_v50 }
 0xfff   :  { %v2609_v46 = vpop.f32.mrb[26].mxu0 }
0x1000   :  { %2613 = vst.msk [vmem:[#allocation5] sm:$0x3] %vm2287_vm9, %v2609_v46  ;;  %v7657_v13 = vpop.f32.mrb[27].mxu0 }
0x1003   :  { %v7671_v28 = vpop.f32.mrb[28].mxu0 }
0x1004   :  { %v2777_v25 = vadd.f32 %v7671_v28, %v2704_v26  ;;  %v2771_v29 = vpop.f32.mrb[29].mxu0 }
0x1005   :  { %v2772_v27 = vadd.f32 %v2771_v29, %v2703_v15 }
0x1006   :  { %v9059_v32 = vmul.f32 %v2777_v25, %v9053_v16 }
0x1007   :  { %v9056_v31 = vmul.f32 %v2772_v27, %v9051_v30 }
0x1009   :  { %7680 = vmatprep.mubr.msk.f32.mxu1 %vm175_vm0, %v9056_v31 }
0x100a   :  { %7681 = vmatmul.mubr.msk.f32.vlgmr.msra.gmra.mrb[28].mxu1 %vm175_vm0, %v9059_v32 }
0x100b   :  { %7695 = vmatprep.mubr.msk.f32.mxu1 %vm8556_vm6, %v8551_v50 }
0x10dd   :  { %v9071_v36 = vpop.f32.mrb[28].mxu1 }
0x10de   :  { %v9073_v33 = vpop.f32.mrb[29].mxu1 }
0x10df   :  { %3036 = vrot.lane.b32.xlu0 %v9073_v33, %s8557_s21  ;;  %2869 = vrot.lane.b32.xlu1 %v9073_v33, %s8558_s25 }
0x10e3   :  { %3201 = vrot.lane.b32.xlu0 %v9073_v33, %s8552_s0  ;;  %3034 = vrot.lane.b32.xlu1 %v9073_v33, %s8553_s9 }
0x10e7   :  { %3368 = vrot.lane.b32.xlu0 %v9073_v33, %s8554_s13  ;;  %3203 = vrot.lane.b32.xlu1 %v9073_v33, %s8559_s29 }
0x10eb   :  { %3719 = vrot.lane.b32.xlu0 %v9071_v36, %s8557_s21  ;;  %3370 = vrot.lane.b32.xlu1 %v9073_v33, %s8560_s3 }
0x10ef   :  { %3886 = vrot.lane.b32.xlu0 %v9071_v36, %s8559_s29  ;;  %3552 = vrot.lane.b32.xlu1 %v9071_v36, %s8558_s25 }
0x10f3   :  { %4053 = vrot.lane.b32.xlu0 %v9071_v36, %s8560_s3  ;;  %3717 = vrot.lane.b32.xlu1 %v9071_v36, %s8553_s9 }
0x10f7   :  { %2958 = vrot.lane.b32.xlu0 %v9073_v33, %s8561_s8  ;;  %3884 = vrot.lane.b32.xlu1 %v9071_v36, %s8552_s0 }
0x10fb   :  { %4051 = vrot.lane.b32.xlu1 %v9071_v36, %s8554_s13 }
0x10ff   :  { %3125 = vrot.lane.b32.xlu1 %v9073_v33, %s8562_s14 }
0x1151   :  { %v3037_v37 = vpop.permute.xlu0 %3036  ;;  %v2870_v38 = vpop.permute.xlu1 %2869 }
0x1152   :  { %7684 = vmatpush3.xpose.msk.msra.mxu0 %vm711_vm12, %v2870_v38  ;;  %7694 = vmatpush3.xpose.msk.msra.mxu1 %vm711_vm12, %v3037_v37 }
0x1153   :  { %7703 = vmatprep.subr.mxu1 %v8551_v50  ;;  %7688 = vmatprep.subr.mxu0 %v8551_v50 }
0x1155   :  { %v3202_v35 = vpop.permute.xlu0 %3201  ;;  %7686 = vmatmul.mubr.msk.f32.vlgmr.msra.gmra.mrb[30].mxu0 %vm711_vm12, %v9073_v33  ;;  %v3035_v40 = vpop.permute.xlu1 %3034 }
0x1156   :  { %7696 = vmatmul.mubr.msk.f32.vlgmr.msra.gmra.mrb[30].mxu1 %vm711_vm12, %v3035_v40  ;;  %7690 = vmatprep.mubr.msk.f32.mxu0 %vm8556_vm6, %v8551_v50 }
0x1157   :  { %7705 = vmatprep.mubr.msk.f32.mxu1 %vm8556_vm6, %v8551_v50 }
0x1159   :  { %v3369_v41 = vpop.permute.xlu0 %3368  ;;  %v3204_v42 = vpop.permute.xlu1 %3203 }
0x115a   :  { %7704 = vmatpush3.xpose.msk.msra.mxu1 %vm711_vm12, %v3204_v42 }
0x115b   :  { %7713 = vmatprep.subr.mxu1 %v8551_v50 }
0x115d   :  { %v3720_v43 = vpop.permute.xlu0 %3719  ;;  %7706 = vmatmul.mubr.msk.f32.vlgmr.msra.gmra.mrb[32].mxu1 %vm711_vm12, %v3202_v35  ;;  %v3371_v45 = vpop.permute.xlu1 %3370 }
0x115e   :  { %7714 = vmatpush3.xpose.msk.msra.mxu1 %vm711_vm12, %v3371_v45  ;;  %7715 = vmatprep.mubr.msk.f32.mxu1 %vm8556_vm6, %v8551_v50 }
0x115f   :  { %7723 = vmatprep.subr.mxu1 %v8551_v50 }
0x1161   :  { %v3887_v49 = vpop.permute.xlu0 %3886  ;;  %7716 = vmatmul.mubr.msk.f32.vlgmr.msra.gmra.mrb[34].mxu1 %vm711_vm12, %v3369_v41  ;;  %v3553_v51 = vpop.permute.xlu1 %3552 }
0x1162   :  { %7724 = vmatpush3.xpose.msk.msra.mxu1 %vm711_vm12, %v3553_v51  ;;  %7725 = vmatprep.mubr.msk.f32.mxu1 %vm8556_vm6, %v8551_v50 }
0x1163   :  { %7733 = vmatprep.subr.mxu1 %v8551_v50 }
0x1165   :  { %v4054_v52 = vpop.permute.xlu0 %4053  ;;  %7726 = vmatmul.mubr.msk.f32.vlgmr.msra.gmra.mrb[36].mxu1 %vm711_vm12, %v9071_v36  ;;  %v3718_v53 = vpop.permute.xlu1 %3717 }
0x1166   :  { %7734 = vmatpush3.xpose.msk.msra.mxu1 %vm711_vm12, %v3720_v43  ;;  %7735 = vmatprep.mubr.msk.f32.mxu1 %vm8556_vm6, %v8551_v50 }
0x1167   :  { %7743 = vmatprep.subr.mxu1 %v8551_v50 }
0x1169   :  { %v2959_v54 = vpop.permute.xlu0 %2958  ;;  %7736 = vmatmul.mubr.msk.f32.vlgmr.msra.gmra.mrb[38].mxu1 %vm711_vm12, %v3718_v53  ;;  %v3885_v55 = vpop.permute.xlu1 %3884 }
0x116a   :  { %7689 = vmatpush3.msra.mxu0 %v2959_v54  ;;  %7744 = vmatpush3.xpose.msk.msra.mxu1 %vm711_vm12, %v3887_v49 }
0x116b   :  { %7745 = vmatprep.mubr.msk.f32.mxu1 %vm8556_vm6, %v8551_v50  ;;  %7753 = vmatprep.subr.mxu1 %v8551_v50 }
0x116c   :  { %7698 = vmatprep.subr.mxu0 %v8551_v50 }
0x116d   :  { %7746 = vmatmul.mubr.msk.f32.vlgmr.msra.gmra.mrb[40].mxu1 %vm711_vm12, %v3885_v55  ;;  %v4052_v56 = vpop.permute.xlu1 %4051 }
0x116e   :  { %7754 = vmatpush3.xpose.msk.msra.mxu1 %vm711_vm12, %v4054_v52  ;;  %7755 = vmatprep.mubr.msk.f32.mxu1 %vm8556_vm6, %v8551_v50 }
0x1171   :  { %7756 = vmatmul.mubr.msk.f32.vlgmr.msra.gmra.mrb[42].mxu1 %vm711_vm12, %v4052_v56  ;;  %v9170_v35 = vpop.permute.xlu1 %3125 }
0x1228   :  { %v2941_v57 = vpop.f32.mrb[30].mxu0 }
0x1229   :  { %v2945_v59 = vmul.f32 0.35355338, %v2941_v57  ;;  %v7687_v60 = vpop.f32.mrb[31].mxu0  ;;  %v3108_v61 = vpop.f32.mrb[30].mxu1 }
0x122a   :  { %v3112_v62 = vmul.f32 0.35355338, %v3108_v61  ;;  %v7697_v63 = vpop.f32.mrb[31].mxu1 }
0x122b   :  { %v2946_v47 = vadd.f32 %v2945_v59, %v9148_v58 }
0x122c   :  { %v3113_v0 = vadd.f32 %v3112_v62, %v9148_v58 }
0x122d   :  { %v2947_v1 = vsel %vm711_vm12, %v2946_v47, -inf }
0x122e   :  { %2948 = vmax.xlane.f32.xlu0 %v2947_v1  ;;  %v3114_v2 = vsel %vm711_vm12, %v3113_v0, -inf }
0x122f   :  { %3115 = vmax.xlane.f32.xlu1 %v3114_v2 }
0x1230   :  { %v3275_v3 = vpop.f32.mrb[32].mxu1 }
0x1231   :  { %v3279_v48 = vmul.f32 0.35355338, %v3275_v3  ;;  %v7707_v5 = vpop.f32.mrb[33].mxu1 }
0x1233   :  { %v3280_v6 = vadd.f32 %v3279_v48, %v9148_v58 }
0x1234   :  { %v3442_v7 = vpop.f32.mrb[34].mxu1 }
0x1235   :  { %v3446_v8 = vmul.f32 0.35355338, %v3442_v7  ;;  %v7717_v9 = vpop.f32.mrb[35].mxu1  ;;  %v3281_v10 = vsel %vm711_vm12, %v3280_v6, -inf }
0x1236   :  { %3282 = vmax.xlane.f32.xlu0 %v3281_v10 }
0x1237   :  { %v3447_v11 = vadd.f32 %v3446_v8, %v9148_v58 }
0x1238   :  { %v3624_v12 = vpop.f32.mrb[36].mxu1 }
0x1239   :  { %v3628_v18 = vmul.f32 0.35355338, %v3624_v12  ;;  %v7727_v19 = vpop.f32.mrb[37].mxu1  ;;  %v3448_v20 = vsel %vm711_vm12, %v3447_v11, -inf }
0x123a   :  { %3449 = vmax.xlane.f32.xlu0 %v3448_v20 }
0x123b   :  { %v3629_v14 = vadd.f32 %v3628_v18, %v9148_v58 }
0x123c   :  { %v3791_v21 = vpop.f32.mrb[38].mxu1 }
0x123d   :  { %v3795_v22 = vmul.f32 0.35355338, %v3791_v21  ;;  %v7737_v44 = vpop.f32.mrb[39].mxu1  ;;  %v3630_v39 = vsel %vm711_vm12, %v3629_v14, -inf }
0x123e   :  { %3631 = vmax.xlane.f32.xlu1 %v3630_v39 }
0x123f   :  { %v3796_v23 = vadd.f32 %v3795_v22, %v9148_v58 }
0x1240   :  { %v3958_v24 = vpop.f32.mrb[40].mxu1 }
0x1241   :  { %v3962_v46 = vmul.f32 0.35355338, %v3958_v24  ;;  %v7747_v13 = vpop.f32.mrb[41].mxu1  ;;  %v3797_v26 = vsel %vm711_vm12, %v3796_v23, -inf }
0x1242   :  { %3798 = vmax.xlane.f32.xlu0 %v3797_v26 }
0x1243   :  { %v3963_v15 = vadd.f32 %v3962_v46, %v9148_v58 }
0x1244   :  { %v4125_v28 = vpop.f32.mrb[42].mxu1 }
0x1245   :  { %v4129_v25 = vmul.f32 0.35355338, %v4125_v28  ;;  %v7757_v29 = vpop.f32.mrb[43].mxu1  ;;  %v3964_v27 = vsel %vm711_vm12, %v3963_v15, -inf }
0x1246   :  { %3965 = vmax.xlane.f32.xlu1 %v3964_v27 }
0x1247   :  { %v4130_v37 = vadd.f32 %v4129_v25, %v9148_v58 }
0x1249   :  { %v4131_v38 = vsel %vm711_vm12, %v4130_v37, -inf }
0x124a   :  { %4132 = vmax.xlane.f32.xlu0 %v4131_v38 }
0x1257   :  { %3459 = vrot.lane.b32.xlu1 %v9073_v33, %s8563_s30 }
0x1260   :  { %3292 = vrot.lane.b32.xlu0 %v9073_v33, %s8564_s12 }
0x12bb   :  { %v2949_v40 = vpop.xlane.xlu0 %2948 }
0x12bc   :  { %v2950_v41 = vsub.f32 %v2946_v47, %v2949_v40  ;;  %v3116_v42 = vpop.xlane.xlu1 %3115 }
0x12bd   :  { %v3117_v43 = vsub.f32 %v3113_v0, %v3116_v42 }
0x12be   :  { %v2951_v45 = vmul.f32 1.442695, %v2950_v41 }
0x12bf   :  { %v3118_v49 = vmul.f32 1.442695, %v3117_v43 }
0x12c0   :  { %8372 = vpow2.f32 %v2951_v45 }
0x12c1   :  { %8374 = vpow2.f32 %v3118_v49 }
0x12c3   :  { %v3283_v51 = vpop.xlane.xlu0 %3282 }
0x12c4   :  { %v3284_v52 = vsub.f32 %v3280_v6, %v3283_v51 }
0x12c6   :  { %v3285_v53 = vmul.f32 1.442695, %v3284_v52 }
0x12c7   :  { %v3450_v54 = vpop.xlane.xlu0 %3449 }
0x12c8   :  { %8376 = vpow2.f32 %v3285_v53  ;;  %v3451_v55 = vsub.f32 %v3447_v11, %v3450_v54 }
0x12ca   :  { %v8373_v56 = vpop.eup %8372  ;;  %v3452_v57 = vmul.f32 1.442695, %v3451_v55 }
0x12cb   :  { %v8375_v59 = vpop.eup %8374  ;;  %v2953_v33 = vsel %vm711_vm12, %v8373_v56, 0.0  ;;  %v3632_v0 = vpop.xlane.xlu1 %3631 }
0x12cc   :  { %8378 = vpow2.f32 %v3452_v57  ;;  %2954 = vadd.xlane.f32.xlu1 %v2953_v33  ;;  %v3120_v60 = vsel %vm711_vm12, %v8375_v59, 0.0  ;;  %v3633_v1 = vsub.f32 %v3629_v14, %v3632_v0 }
0x12cd   :  { %3121 = vadd.xlane.f32.xlu0 %v3120_v60 }
0x12ce   :  { %v3634_v5 = vmul.f32 1.442695, %v3633_v1 }
0x12cf   :  { %v3799_v2 = vpop.xlane.xlu0 %3798 }
0x12d0   :  { %v3800_v48 = vsub.f32 %v3796_v23, %v3799_v2  ;;  %8380 = vpow2.f32 %v3634_v5 }
0x12d2   :  { %v8377_v61 = vpop.eup %8376  ;;  %v3801_v8 = vmul.f32 1.442695, %v3800_v48  ;;  %v4234_v48 = vld [vmem:[%s9610_s20 + $0x8] sm:$0xff] }
0x12d3   :  { %v3287_v62 = vsel %vm711_vm12, %v8377_v61, 0.0  ;;  %v3966_v3 = vpop.xlane.xlu1 %3965 }
0x12d4   :  { %3288 = vadd.xlane.f32.xlu1 %v3287_v62  ;;  %v3967_v6 = vsub.f32 %v3963_v15, %v3966_v3  ;;  %8382 = vpow2.f32 %v3801_v8  ;;  %v4233_v3 = vld [vmem:[%s9610_s20] sm:$0xff] }
0x12d5   :  { %v8120_v5 = vpack.c.bf16 %v4234_v48, %v4233_v3 }
0x12d6   :  { %v9175_v63 = vpop.eup %8378  ;;  %v3968_v9 = vmul.f32 1.442695, %v3967_v6  ;;  %v4235_v6 = vld [vmem:[%s9610_s20 + $0x10] sm:$0xff] }
0x12d7   :  { %v3454_v47 = vsel %vm711_vm12, %v9175_v63, 0.0  ;;  %v4133_v7 = vpop.xlane.xlu0 %4132  ;;  %v3460_v39 = vpop.permute.xlu1 %3459  ;;  %8121 = vmatprep.subr.bf16.mxu1 %v8120_v5 }
0x12d8   :  { %3455 = vadd.xlane.f32.xlu0 %v3454_v47  ;;  %v4134_v10 = vsub.f32 %v4130_v37, %v4133_v7  ;;  %8384 = vpow2.f32 %v3968_v9  ;;  %8123 = vmatpush3.bf16.msra.mxu1 %v8120_v5  ;;  %v4236_v7 = vld [vmem:[%s9610_s20 + $0x18] sm:$0xff] }
0x12d9   :  { %v8124_v8 = vpack.c.bf16 %v4236_v7, %v4235_v6 }
0x12da   :  { %v4135_v11 = vmul.f32 1.442695, %v4134_v10  ;;  %v8381_v12 = vpop.eup %8380 }
0x12db   :  { %v3636_v19 = vsel %vm711_vm12, %v8381_v12, 0.0  ;;  %v3293_v23 = vpop.permute.xlu0 %3292  ;;  %8125 = vmatprep.subr.bf16.mxu1 %v8124_v8 }
0x12dc   :  { %8386 = vpow2.f32 %v4135_v11  ;;  %8127 = vmatpush3.bf16.msra.mxu1 %v8124_v8 }
0x12de   :  { %v9183_v18 = vpop.eup %8382 }
0x12df   :  { %v3803_v14 = vsel %vm711_vm12, %v9183_v18, 0.0 }
0x12e2   :  { %v9186_v20 = vpop.eup %8384 }
0x12e3   :  { %v3970_v21 = vsel %vm711_vm12, %v9186_v20, 0.0 }
0x12e5   :  { %3808 = vrot.lane.b32.xlu1 %v9071_v36, %s8562_s14 }
0x12e6   :  { %v9192_v22 = vpop.eup %8386 }
0x12e7   :  { %v4137_v44 = vsel %vm711_vm12, %v9192_v22, 0.0 }
0x12ee   :  { %3641 = vrot.lane.b32.xlu0 %v9071_v36, %s8561_s8 }
0x1309   :  { %3637 = vadd.xlane.f32.xlu1 %v3636_v19 }
0x130d   :  { %3804 = vadd.xlane.f32.xlu0 %v3803_v14  ;;  %3971 = vadd.xlane.f32.xlu1 %v3970_v21 }
0x1311   :  { %4138 = vadd.xlane.f32.xlu1 %v4137_v44 }
0x1322   :  { %4142 = vrot.lane.b32.xlu1 %v9071_v36, %s8563_s30 }
0x1323   :  { %3975 = vrot.lane.b32.xlu0 %v9071_v36, %s8564_s12 }
0x1359   :  { %v2955_v24 = vpop.xlane.xlu1 %2954 }
0x135a   :  { %8388 = vrcp.f32 %v2955_v24  ;;  %v3122_v46 = vpop.xlane.xlu0 %3121 }
0x135b   :  { %8390 = vrcp.f32 %v3122_v46 }
0x1361   :  { %v3289_v13 = vpop.xlane.xlu1 %3288 }
0x1362   :  { %8392 = vrcp.f32 %v3289_v13 }
0x1364   :  { %v8389_v26 = vpop.eup %8388 }
0x1365   :  { %v2957_v15 = vmul.f32 %v8389_v26, %v8373_v56  ;;  %v3456_v28 = vpop.xlane.xlu0 %3455  ;;  %v8391_v25 = vpop.eup %8390 }
0x1366   :  { %8394 = vrcp.f32 %v3456_v28  ;;  %v3124_v36 = vmul.f32 %v8391_v25, %v8375_v59  ;;  %v3809_v40 = vpop.permute.xlu1 %3808 }
0x1367   :  { %7691 = vmatmul.mubr.msk.f32.vlgmr.msra.gmra.mrb[32].mxu0 %vm711_vm12, %v2957_v15 }
0x1368   :  { %7699 = vmatpush3.msra.mxu0 %v9170_v35  ;;  %7700 = vmatprep.mubr.msk.f32.mxu0 %vm8556_vm6, %v8551_v50 }
0x1369   :  { %7708 = vmatprep.subr.mxu0 %v8551_v50  ;;  %v3642_v35 = vpop.permute.xlu0 %3641 }
0x136b   :  { %7701 = vmatmul.mubr.msk.f32.vlgmr.msra.gmra.mrb[34].mxu0 %vm711_vm12, %v3124_v36  ;;  %v4339_v36 = vld [vmem:[%s9611_s18] sm:$0xff] }
0x136c   :  { %v8393_v29 = vpop.eup %8392  ;;  %7709 = vmatpush3.msra.mxu0 %v3293_v23  ;;  %7710 = vmatprep.mubr.msk.f32.mxu0 %vm8556_vm6, %v8551_v50 }
0x136d   :  { %v3291_v27 = vmul.f32 %v8393_v29, %v8377_v61  ;;  %7718 = vmatprep.subr.mxu0 %v8551_v50  ;;  %v4340_v29 = vld [vmem:[%s9611_s18 + $0x8] sm:$0xff] }
0x136f   :  { %7711 = vmatmul.mubr.msk.f32.vlgmr.msra.gmra.mrb[36].mxu0 %vm711_vm12, %v3291_v27  ;;  %v8128_v27 = vpack.c.bf16 %v4340_v29, %v4339_v36 }
0x1370   :  { %v8395_v37 = vpop.eup %8394  ;;  %7719 = vmatpush3.msra.mxu0 %v3460_v39  ;;  %7720 = vmatprep.mubr.msk.f32.mxu0 %vm8556_vm6, %v8551_v50 }
0x1371   :  { %v3458_v38 = vmul.f32 %v8395_v37, %v9175_v63  ;;  %7728 = vmatprep.subr.mxu0 %v8551_v50  ;;  %v4341_v37 = vld [vmem:[%s9611_s18 + $0x10] sm:$0xff] }
0x1373   :  { %7721 = vmatmul.mubr.msk.f32.vlgmr.msra.gmra.mrb[38].mxu0 %vm711_vm12, %v3458_v38  ;;  %v4342_v38 = vld [vmem:[%s9611_s18 + $0x18] sm:$0xff] }
0x1374   :  { %7729 = vmatpush3.msra.mxu0 %v3642_v35  ;;  %7730 = vmatprep.mubr.msk.f32.mxu0 %vm8556_vm6, %v8551_v50  ;;  %v8132_v35 = vpack.c.bf16 %v4342_v38, %v4341_v37 }
0x1375   :  { %7738 = vmatprep.subr.mxu0 %v8551_v50 }
0x1396   :  { %v3638_v41 = vpop.xlane.xlu1 %3637 }
0x1397   :  { %8396 = vrcp.f32 %v3638_v41  ;;  %v4344_v41 = vld [vmem:[%s9611_s18 + $0x28] sm:$0xff] }
0x139a   :  { %v3805_v42 = vpop.xlane.xlu0 %3804  ;;  %v3972_v43 = vpop.xlane.xlu1 %3971 }
0x139b   :  { %8398 = vrcp.f32 %v3805_v42 }
0x139c   :  { %8400 = vrcp.f32 %v3972_v43  ;;  %v4345_v43 = vld [vmem:[%s9611_s18 + $0x30] sm:$0xff] }
0x139e   :  { %v4139_v45 = vpop.xlane.xlu1 %4138  ;;  %v3976_v55 = vpop.permute.xlu0 %3975 }
0x139f   :  { %8402 = vrcp.f32 %v4139_v45  ;;  %v4346_v45 = vld [vmem:[%s9611_s18 + $0x38] sm:$0xff] }
0x13a1   :  { %v8397_v49 = vpop.eup %8396 }
0x13a2   :  { %v3640_v51 = vmul.f32 %v8397_v49, %v8381_v12  ;;  %v4143_v59 = vpop.permute.xlu1 %4142  ;;  %v8140_v49 = vpack.c.bf16 %v4346_v45, %v4345_v43 }
0x13a4   :  { %7731 = vmatmul.mubr.msk.f32.vlgmr.msra.gmra.mrb[40].mxu0 %vm711_vm12, %v3640_v51  ;;  %v7087_v51 = vld [vmem:[%s9612_s23] ss:$0 sm:$0xff] }
0x13a5   :  { %v8399_v52 = vpop.eup %8398  ;;  %7739 = vmatpush3.msra.mxu0 %v3809_v40  ;;  %7740 = vmatprep.mubr.msk.f32.mxu0 %vm8556_vm6, %v8551_v50  ;;  %v4343_v40 = vld [vmem:[%s9611_s18 + $0x20] sm:$0xff] }
0x13a6   :  { %v3807_v53 = vmul.f32 %v8399_v52, %v9183_v18  ;;  %7748 = vmatprep.subr.mxu0 %v8551_v50  ;;  %v8401_v54 = vpop.eup %8400  ;;  %v8136_v42 = vpack.c.bf16 %v4344_v41, %v4343_v40  ;;  %v7096_v41 = vld [vmem:[%s9617_s7] ss:$0 sm:$0xff] }
0x13a7   :  { %v3974_v56 = vmul.f32 %v8401_v54, %v9186_v20 }
0x13a8   :  { %7741 = vmatmul.mubr.msk.f32.vlgmr.msra.gmra.mrb[42].mxu0 %vm711_vm12, %v3807_v53 }
0x13a9   :  { %7749 = vmatpush3.msra.mxu0 %v3976_v55  ;;  %7750 = vmatprep.mubr.msk.f32.mxu0 %vm8556_vm6, %v8551_v50  ;;  %v8403_v57 = vpop.eup %8402 }
0x13aa   :  { %7758 = vmatprep.subr.mxu0 %v8551_v50  ;;  %v4141_v33 = vmul.f32 %v8403_v57, %v9192_v22 }
0x13ac   :  { %7751 = vmatmul.mubr.msk.f32.vlgmr.msra.gmra.mrb[44].mxu0 %vm711_vm12, %v3974_v56 }
0x13ad   :  { %7759 = vmatpush3.msra.mxu0 %v4143_v59  ;;  %7760 = vmatprep.mubr.msk.f32.mxu0 %vm8556_vm6, %v8551_v50 }
0x13ae   :  { %8129 = vmatprep.subr.bf16.mxu0 %v8128_v27 }
0x13b0   :  { %7761 = vmatmul.mubr.msk.f32.vlgmr.msra.gmra.mrb[46].mxu0 %vm711_vm12, %v4141_v33 }
0x13b1   :  { %8131 = vmatpush3.bf16.msra.mxu0 %v8128_v27 }
0x13b2   :  { %8133 = vmatprep.subr.bf16.mxu0 %v8132_v35 }
0x13b5   :  { %8135 = vmatpush3.bf16.msra.mxu0 %v8132_v35  ;;  %v7095_v35 = vld [vmem:[%s9616_s2] ss:$0 sm:$0xff] }
0x13b6   :  { %8137 = vmatprep.subr.bf16.mxu0 %v8136_v42 }
0x13b9   :  { %8139 = vmatpush3.bf16.msra.mxu0 %v8136_v42 }
0x13ba   :  { %8141 = vmatprep.subr.bf16.mxu0 %v8140_v49 }
0x13bd   :  { %8143 = vmatpush3.bf16.msra.mxu0 %v8140_v49 }
0x143a   :  { %v3030_v60 = vpop.f32.mrb[32].mxu0 }
0x143b   :  { %v7692_v61 = vpop.f32.mrb[33].mxu0 }
0x143e   :  { %v3197_v62 = vpop.f32.mrb[34].mxu0 }
0x143f   :  { %3536 = vrot.lane.b32.xlu0 %v3197_v62, %s8565_s27  ;;  %v7702_v63 = vpop.f32.mrb[35].mxu0 }
0x1442   :  { %v3364_v47 = vpop.f32.mrb[36].mxu0 }
0x1443   :  { %3540 = vrot.lane.b32.xlu1 %v3364_v47, %s8566_s4  ;;  %v7712_v0 = vpop.f32.mrb[37].mxu0 }
0x1446   :  { %v3531_v1 = vpop.f32.mrb[38].mxu0 }
0x1447   :  { %3544 = vrot.lane.b32.xlu1 %v3531_v1, %s8567_s15  ;;  %v7722_v2 = vpop.f32.mrb[39].mxu0  ;;  %v7092_v1 = vld [vmem:[%s9613_s22] ss:$0 sm:$0xff] }
0x1477   :  { %v3713_v9 = vpop.f32.mrb[40].mxu0 }
0x1478   :  { %v7732_v10 = vpop.f32.mrb[41].mxu0 }
0x147b   :  { %v3880_v11 = vpop.f32.mrb[42].mxu0 }
0x147c   :  { %4219 = vrot.lane.b32.xlu0 %v3880_v11, %s8565_s27  ;;  %v7742_v12 = vpop.f32.mrb[43].mxu0 }
0x147f   :  { %v4047_v18 = vpop.f32.mrb[44].mxu0 }
0x1480   :  { %4223 = vrot.lane.b32.xlu0 %v4047_v18, %s8566_s4  ;;  %v7752_v19 = vpop.f32.mrb[45].mxu0 }
0x1483   :  { %v4214_v20 = vpop.f32.mrb[46].mxu0 }
0x1484   :  { %4227 = vrot.lane.b32.xlu1 %v4214_v20, %s8567_s15  ;;  %v7762_v14 = vpop.f32.mrb[47].mxu0 }
0x14b1   :  { %v3537_v21 = vpop.permute.xlu0 %3536 }
0x14b2   :  { %v3547_v44 = vsel %vm711_vm12, %v3030_v60, %v3537_v21 }
0x14b5   :  { %v3541_v22 = vpop.permute.xlu1 %3540 }
0x14b6   :  { %v3548_v39 = vsel %vm621_vm11, %v3547_v44, %v3541_v22  ;;  %v4483_v22 = vld [vmem:[%s9614_s26] sm:$0xff]  ;;  %v4484_v44 = vld [vmem:[%s9614_s26 + $0x8] sm:$0xff] }
0x14b9   :  { %v3545_v23 = vpop.permute.xlu1 %3544 }
0x14ba   :  { %v3550_v24 = vsel %vm3549_vm7, %v3548_v39, %v3545_v23  ;;  %v8144_v39 = vpack.c.bf16 %v4484_v44, %v4483_v22  ;;  %v4485_v23 = vld [vmem:[%s9614_s26 + $0x10] sm:$0xff] }
0x14bb   :  { %7771 = vmatprep.mubr.msk.f32.mxu1 %vm175_vm0, %v3550_v24  ;;  %v4486_v24 = vld [vmem:[%s9614_s26 + $0x18] sm:$0xff] }
0x14bc   :  { %8145 = vmatprep.subr.bf16.mxu1 %v8144_v39 }
0x14ee   :  { %v4220_v46 = vpop.permute.xlu0 %4219 }
0x14ef   :  { %v4230_v26 = vsel %vm711_vm12, %v3713_v9, %v4220_v46  ;;  %v8148_v46 = vpack.c.bf16 %v4486_v24, %v4485_v23 }
0x14f2   :  { %v4224_v13 = vpop.permute.xlu0 %4223 }
0x14f3   :  { %v4231_v15 = vsel %vm621_vm11, %v4230_v26, %v4224_v13  ;;  %v4577_v13 = vld [vmem:[%s9615_s1] sm:$0xff]  ;;  %v4578_v26 = vld [vmem:[%s9615_s1 + $0x8] sm:$0xff] }
0x14f6   :  { %v4228_v28 = vpop.permute.xlu1 %4227 }
0x14f7   :  { %v4232_v25 = vsel %vm3549_vm7, %v4231_v15, %v4228_v28  ;;  %v8152_v15 = vpack.c.bf16 %v4578_v26, %v4577_v13 }
0x14f8   :  { %7772 = vmatmul.mubr.msk.f32.vlgmr.msra.gmra.mrb[44].mxu1 %vm175_vm0, %v4232_v25 }
0x14f9   :  { %8147 = vmatpush3.bf16.msra.mxu1 %v8144_v39 }
0x14fa   :  { %8149 = vmatprep.subr.bf16.mxu1 %v8148_v46 }
0x14fd   :  { %8151 = vmatpush3.bf16.msra.mxu1 %v8148_v46 }
0x14fe   :  { %8153 = vmatprep.subr.bf16.mxu1 %v8152_v15 }
0x15cb   :  { %v7773_v52 = vpop.f32.mrb[44].mxu1 }
0x15cc   :  { %v4322_v53 = vadd.f32 %v7773_v52, %v7087_v51  ;;  %v4316_v54 = vpop.f32.mrb[45].mxu1  ;;  %v4580_v52 = vld [vmem:[%s9615_s1 + $0x18] sm:$0xff] }
0x15cd   :  { %v4317_v55 = vadd.f32 %v7087_v51, %v4316_v54  ;;  %v4579_v51 = vld [vmem:[%s9615_s1 + $0x10] sm:$0xff] }
0x15ce   :  { %v7091_v56 = vmul.f32 -1.442695, %v4322_v53 }
0x15cf   :  { %v7090_v57 = vmul.f32 -1.442695, %v4317_v55 }
0x15d0   :  { %8404 = vpow2.f32 %v7091_v56  ;;  %v4581_v56 = vld [vmem:[%s9615_s1 + $0x20] sm:$0xff] }
0x15d1   :  { %8406 = vpow2.f32 %v7090_v57  ;;  %v4582_v57 = vld [vmem:[%s9615_s1 + $0x28] sm:$0xff] }
0x15da   :  { %v8405_v59 = vpop.eup %8404 }
0x15db   :  { %v8407_v33 = vpop.eup %8406  ;;  %v4332_v60 = vadd.f32 1.0, %v8405_v59  ;;  %v8160_v59 = vpack.c.bf16 %v4582_v57, %v4581_v56 }
0x15dc   :  { %v4331_v61 = vadd.f32 1.0, %v8407_v33  ;;  %v4583_v33 = vld [vmem:[%s9615_s1 + $0x30] sm:$0xff] }
0x15dd   :  { %8408 = vrcp.f32 %v4332_v60  ;;  %v4584_v60 = vld [vmem:[%s9615_s1 + $0x38] sm:$0xff] }
0x15de   :  { %8410 = vrcp.f32 %v4331_v61  ;;  %v8164_v61 = vpack.c.bf16 %v4584_v60, %v4583_v33 }
0x15e7   :  { %v8409_v62 = vpop.eup %8408 }
0x15e8   :  { %v8411_v63 = vpop.eup %8410  ;;  %v4338_v0 = vmul.f32 %v8409_v62, %v4322_v53  ;;  %v7103_v62 = vld [vmem:[%s8644_s6 + $0x20] sm:$0xff] }
0x15e9   :  { %v4337_v47 = vmul.f32 %v8411_v63, %v4317_v55  ;;  %v8156_v55 = vpack.c.bf16 %v4580_v52, %v4579_v51  ;;  %v7104_v63 = vld [vmem:[%s8644_s6 + $0x28] sm:$0xff] }
0x15eb   :  { %7790 = vmatprep.mubr.msk.f32.mxu0 %vm4354_vm10, %v4337_v47  ;;  %v8168_v47 = vpack.c.bf16 %v7104_v63, %v7103_v62 }
0x15ec   :  { %7791 = vmatmul.mubr.msk.f32.vlgmr.msra.gmra.mrb[48].mxu0 %vm4354_vm10, %v4338_v0  ;;  %v7097_v0 = vld [vmem:[%s9618_s11] ss:$0 sm:$0xff] }
0x15ed   :  { %8169 = vmatprep.subr.bf16.mxu0 %v8168_v47 }
0x15ee   :  { %8171 = vmatpush3.bf16.msra.mxu0 %v8168_v47 }
0x16bf   :  { %v7792_v2 = vpop.f32.mrb[48].mxu0 }
0x16c0   :  { %v4433_v3 = vadd.f32 %v7792_v2, %v7092_v1  ;;  %v4427_v48 = vpop.f32.mrb[49].mxu0 }
0x16c1   :  { %v4428_v5 = vadd.f32 %v7092_v1, %v4427_v48 }
0x16c2   :  { %v4437_v6 = vadd.f32 %v4433_v3, %v9059_v32 }
0x16c3   :  { %v4436_v7 = vadd.f32 %v4428_v5, %v9056_v31 }
0x16c4   :  { %v4443_v8 = vsel %vm175_vm0, %v4437_v6, 0.0 }
0x16c5   :  { %4444 = vadd.xlane.f32.xlu1 %v4443_v8  ;;  %v4440_v9 = vsel %vm175_vm0, %v4436_v7, 0.0  ;;  %v7106_v8 = vld [vmem:[%s8644_s6 + $0x38] sm:$0xff] }
0x16c6   :  { %4441 = vadd.xlane.f32.xlu0 %v4440_v9 }
0x1752   :  { %v4445_v10 = vpop.xlane.xlu1 %4444 }
0x1753   :  { %v4448_v11 = vmul.f32 0.03125, %v4445_v10  ;;  %v4442_v12 = vpop.xlane.xlu0 %4441  ;;  %v7100_v10 = vld [vmem:[%s9619_s16] ss:$0 sm:$0xff] }
0x1754   :  { %v4447_v18 = vmul.f32 0.03125, %v4442_v12 }
0x1755   :  { %v4450_v19 = vsub.f32 %v4437_v6, %v4448_v11 }
0x1756   :  { %v4449_v20 = vsub.f32 %v4436_v7, %v4447_v18  ;;  %v7105_v7 = vld [vmem:[%s8644_s6 + $0x30] sm:$0xff]  ;;  %s9620_s6 = sld [smem:[#allocation11_spill]] }
0x1757   :  { %v4452_v32 = vmul.f32 %v4450_v19, %v4450_v19  ;;  %v8172_v9 = vpack.c.bf16 %v7106_v8, %v7105_v7 }
0x1758   :  { %v4451_v14 = vmul.f32 %v4449_v20, %v4449_v20 }
0x1759   :  { %v4456_v21 = vsel %vm175_vm0, %v4452_v32, 0.0  ;;  %8173 = vmatprep.subr.bf16.mxu0 %v8172_v9 }
0x175a   :  { %v4453_v31 = vsel %vm175_vm0, %v4451_v14, 0.0  ;;  %8175 = vmatpush3.bf16.msra.mxu0 %v8172_v9 }
0x175b   :  { %4454 = vadd.xlane.f32.xlu0 %v4453_v31  ;;  %7834 = vmatprep.subr.mxu0 %v8551_v50 }
0x175f   :  { %4457 = vadd.xlane.f32.xlu0 %v4456_v21 }
0x17e8   :  { %v4455_v28 = vpop.xlane.xlu0 %4454 }
0x17e9   :  { %v4459_v25 = vmul.f32 0.03125, %v4455_v28 }
0x17eb   :  { %v4461_v36 = vadd.f32 1e-08, %v4459_v25 }
0x17ec   :  { %v4458_v29 = vpop.xlane.xlu0 %4457 }
0x17ed   :  { %8412 = vrsqrt.f32 %v4461_v36  ;;  %v4460_v27 = vmul.f32 0.03125, %v4458_v29 }
0x17ef   :  { %v4462_v37 = vadd.f32 1e-08, %v4460_v27 }
0x17f1   :  { %8414 = vrsqrt.f32 %v4462_v37 }
0x17f7   :  { %v8413_v38 = vpop.eup %8412 }
0x17f8   :  { %v4465_v40 = vmul.f32 %v8413_v38, %v4449_v20 }
0x17fa   :  { %v4473_v42 = vmul.f32 %v7095_v35, %v4465_v40 }
0x17fb   :  { %v8415_v43 = vpop.eup %8414 }
0x17fc   :  { %v4466_v45 = vmul.f32 %v8415_v43, %v4450_v19  ;;  %v4481_v49 = vadd.f32 %v7096_v41, %v4473_v42 }
0x17fe   :  { %v4474_v53 = vmul.f32 %v7095_v35, %v4466_v45  ;;  %7801 = vmatprep.mubr.msk.f32.mxu1 %vm175_vm0, %v4481_v49 }
0x1800   :  { %v4482_v54 = vadd.f32 %v7096_v41, %v4474_v53 }
0x1802   :  { %7802 = vmatmul.mubr.msk.f32.vlgmr.msra.gmra.mrb[46].mxu1 %vm175_vm0, %v4482_v54 }
0x1803   :  { %8155 = vmatpush3.bf16.msra.mxu1 %v8152_v15 }
0x1804   :  { %8157 = vmatprep.subr.bf16.mxu1 %v8156_v55 }
0x1807   :  { %8159 = vmatpush3.bf16.msra.mxu1 %v8156_v55 }
0x1808   :  { %8161 = vmatprep.subr.bf16.mxu1 %v8160_v59 }
0x180b   :  { %8163 = vmatpush3.bf16.msra.mxu1 %v8160_v59 }
0x180c   :  { %8165 = vmatprep.subr.bf16.mxu1 %v8164_v61 }
0x180f   :  { %8167 = vmatpush3.bf16.msra.mxu1 %v8164_v61 }
0x1810   :  { %7844 = vmatprep.subr.mxu1 %v8551_v50 }
0x18d5   :  { %v7803_v1 = vpop.f32.mrb[46].mxu1 }
0x18d6   :  { %v4572_v2 = vadd.f32 %v7803_v1, %v7097_v0  ;;  %v4566_v3 = vpop.f32.mrb[47].mxu1 }
0x18d7   :  { %v4567_v48 = vadd.f32 %v7097_v0, %v4566_v3 }
0x18d8   :  { %v4576_v6 = vmax.f32 %v4572_v2, 0.0 }
0x18d9   :  { %v4575_v5 = vmax.f32 %v4567_v48, 0.0 }
0x18db   :  { %7820 = vmatprep.mubr.msk.f32.mxu1 %vm4354_vm10, %v4575_v5 }
0x18dc   :  { %7821 = vmatmul.mubr.msk.f32.vlgmr.msra.gmra.mrb[48].mxu1 %vm4354_vm10, %v4576_v6 }
0x18dd   :  { %7846 = vmatprep.mubr.msk.f32.mxu1 %vm8556_vm6, %v8551_v50 }
0x19af   :  { %v7822_v11 = vpop.f32.mrb[48].mxu1 }
0x19b0   :  { %v4670_v12 = vadd.f32 %v7822_v11, %v7100_v10  ;;  %v4664_v18 = vpop.f32.mrb[49].mxu1 }
0x19b1   :  { %v4665_v19 = vadd.f32 %v7100_v10, %v4664_v18 }
0x19b2   :  { %v9301_v14 = vmul.f32 %v4670_v12, %v9053_v16 }
0x19b3   :  { %v9298_v20 = vmul.f32 %v4665_v19, %v9051_v30 }
0x19b5   :  { %7831 = vmatprep.mubr.msk.f32.mxu0 %vm175_vm0, %v9298_v20 }
0x19b6   :  { %7832 = vmatmul.mubr.msk.f32.vlgmr.msra.gmra.mrb[50].mxu0 %vm175_vm0, %v9301_v14 }
0x19b7   :  { %7836 = vmatprep.mubr.msk.f32.mxu0 %vm8556_vm6, %v8551_v50 }
0x1a89   :  { %v9309_v31 = vpop.f32.mrb[50].mxu0 }
0x1a8a   :  { %v9311_v32 = vpop.f32.mrb[51].mxu0 }
0x1a8b   :  { %4929 = vrot.lane.b32.xlu0 %v9311_v32, %s8557_s21  ;;  %4762 = vrot.lane.b32.xlu1 %v9311_v32, %s8558_s25 }
0x1a8f   :  { %5094 = vrot.lane.b32.xlu0 %v9311_v32, %s8552_s0  ;;  %4927 = vrot.lane.b32.xlu1 %v9311_v32, %s8553_s9 }
0x1a93   :  { %5261 = vrot.lane.b32.xlu0 %v9311_v32, %s8554_s13  ;;  %5096 = vrot.lane.b32.xlu1 %v9311_v32, %s8559_s29 }
0x1a97   :  { %5611 = vrot.lane.b32.xlu0 %v9309_v31, %s8557_s21  ;;  %5263 = vrot.lane.b32.xlu1 %v9311_v32, %s8560_s3  ;;  %s9625_s21 = sld [smem:[#allocation25_spill]] }
0x1a9b   :  { %5778 = vrot.lane.b32.xlu0 %v9309_v31, %s8559_s29  ;;  %5444 = vrot.lane.b32.xlu1 %v9309_v31, %s8558_s25  ;;  %s9626_s25 = sld [smem:[#allocation26_spill]]  ;;  %s8569_s29 = smov [#allocation3]  }
0x1a9f   :  { %5945 = vrot.lane.b32.xlu0 %v9309_v31, %s8560_s3  ;;  %5609 = vrot.lane.b32.xlu1 %v9309_v31, %s8553_s9  ;;  %s8568_s9 = smov 32   ;;  %s6922_s3 = sshll.u32 %s8569_s29, 4  ;;  %s6923_s3 = int_to_ptr.vmem [resolvable:$true] %s6922_s3 }
0x1aa0   :  { %s8464_s24 = scalar_lea.vmem %s6923_s3, 32  ;;  %p8469_p1 = scmp.lt.s32.totalorder %s6923_s3, %s6923_s3 }
0x1aa1   :  { %p8465_p0 = scmp.ne.s32.totalorder %s6923_s3, %s8464_s24  ;;  %p8470_p2 = scmp.lt.s32.totalorder %s8464_s24, %s8464_s24 }
0x1aa3   :  { %4851 = vrot.lane.b32.xlu0 %v9311_v32, %s8561_s8  ;;  %5776 = vrot.lane.b32.xlu1 %v9309_v31, %s8552_s0  ;;  %s9621_s0 = sld [smem:[#allocation22_spill]]  ;;  %p8471_p3 = por %p8470_p2, %p8469_p1 }
0x1aa5   :  { %p8472_p4 = pnand %p8471_p3, %p8465_p0 }
0x1aa7   :  { %5943 = vrot.lane.b32.xlu1 %v9309_v31, %s8554_s13  ;;  %s9622_s13 = sld [smem:[#allocation23_spill]] }
0x1aab   :  { %5018 = vrot.lane.b32.xlu1 %v9311_v32, %s8562_s14 }
0x1afd   :  { %v4930_v21 = vpop.permute.xlu0 %4929  ;;  %v4763_v22 = vpop.permute.xlu1 %4762 }
0x1afe   :  { %7835 = vmatpush3.xpose.msk.msra.mxu0 %vm711_vm12, %v4763_v22  ;;  %7845 = vmatpush3.xpose.msk.msra.mxu1 %vm711_vm12, %v4930_v21 }
0x1aff   :  { %7854 = vmatprep.subr.mxu1 %v8551_v50  ;;  %7839 = vmatprep.subr.mxu0 %v8551_v50 }
0x1b01   :  { %v5095_v44 = vpop.permute.xlu0 %5094  ;;  %7837 = vmatmul.mubr.msk.f32.vlgmr.msra.gmra.mrb[52].mxu0 %vm711_vm12, %v9311_v32  ;;  %v4928_v39 = vpop.permute.xlu1 %4927 }
0x1b02   :  { %7847 = vmatmul.mubr.msk.f32.vlgmr.msra.gmra.mrb[50].mxu1 %vm711_vm12, %v4928_v39  ;;  %7841 = vmatprep.mubr.msk.f32.mxu0 %vm8556_vm6, %v8551_v50 }
0x1b03   :  { %7856 = vmatprep.mubr.msk.f32.mxu1 %vm8556_vm6, %v8551_v50 }
0x1b05   :  { %v5262_v23 = vpop.permute.xlu0 %5261  ;;  %v5097_v24 = vpop.permute.xlu1 %5096 }
0x1b06   :  { %7855 = vmatpush3.xpose.msk.msra.mxu1 %vm711_vm12, %v5097_v24 }
0x1b07   :  { %7864 = vmatprep.subr.mxu1 %v8551_v50 }
0x1b09   :  { %v5612_v46 = vpop.permute.xlu0 %5611  ;;  %7857 = vmatmul.mubr.msk.f32.vlgmr.msra.gmra.mrb[52].mxu1 %vm711_vm12, %v5095_v44  ;;  %v5264_v13 = vpop.permute.xlu1 %5263 }
0x1b0a   :  { %7865 = vmatpush3.xpose.msk.msra.mxu1 %vm711_vm12, %v5264_v13  ;;  %7866 = vmatprep.mubr.msk.f32.mxu1 %vm8556_vm6, %v8551_v50 }
0x1b0b   :  { %7874 = vmatprep.subr.mxu1 %v8551_v50 }
0x1b0d   :  { %v5779_v26 = vpop.permute.xlu0 %5778  ;;  %7867 = vmatmul.mubr.msk.f32.vlgmr.msra.gmra.mrb[54].mxu1 %vm711_vm12, %v5262_v23  ;;  %v5445_v15 = vpop.permute.xlu1 %5444 }
0x1b0e   :  { %7875 = vmatpush3.xpose.msk.msra.mxu1 %vm711_vm12, %v5445_v15  ;;  %7876 = vmatprep.mubr.msk.f32.mxu1 %vm8556_vm6, %v8551_v50 }
0x1b0f   :  { %7884 = vmatprep.subr.mxu1 %v8551_v50 }
0x1b11   :  { %v5946_v28 = vpop.permute.xlu0 %5945  ;;  %7877 = vmatmul.mubr.msk.f32.vlgmr.msra.gmra.mrb[56].mxu1 %vm711_vm12, %v9309_v31  ;;  %v5610_v25 = vpop.permute.xlu1 %5609 }
0x1b12   :  { %7885 = vmatpush3.xpose.msk.msra.mxu1 %vm711_vm12, %v5612_v46  ;;  %7886 = vmatprep.mubr.msk.f32.mxu1 %vm8556_vm6, %v8551_v50 }
0x1b13   :  { %7894 = vmatprep.subr.mxu1 %v8551_v50 }
0x1b15   :  { %v4852_v36 = vpop.permute.xlu0 %4851  ;;  %7887 = vmatmul.mubr.msk.f32.vlgmr.msra.gmra.mrb[58].mxu1 %vm711_vm12, %v5610_v25  ;;  %v5777_v29 = vpop.permute.xlu1 %5776 }
0x1b16   :  { %7840 = vmatpush3.msra.mxu0 %v4852_v36  ;;  %7895 = vmatpush3.xpose.msk.msra.mxu1 %vm711_vm12, %v5779_v26 }
0x1b17   :  { %7896 = vmatprep.mubr.msk.f32.mxu1 %vm8556_vm6, %v8551_v50  ;;  %7904 = vmatprep.subr.mxu1 %v8551_v50 }
0x1b18   :  { %7849 = vmatprep.subr.mxu0 %v8551_v50 }
0x1b19   :  { %7897 = vmatmul.mubr.msk.f32.vlgmr.msra.gmra.mrb[60].mxu1 %vm711_vm12, %v5777_v29  ;;  %v5944_v27 = vpop.permute.xlu1 %5943 }
0x1b1a   :  { %7905 = vmatpush3.xpose.msk.msra.mxu1 %vm711_vm12, %v5946_v28  ;;  %7906 = vmatprep.mubr.msk.f32.mxu1 %vm8556_vm6, %v8551_v50 }
0x1b1d   :  { %7907 = vmatmul.mubr.msk.f32.vlgmr.msra.gmra.mrb[62].mxu1 %vm711_vm12, %v5944_v27  ;;  %v9405_v44 = vpop.permute.xlu1 %5018 }
0x1bd4   :  { %v4834_v37 = vpop.f32.mrb[52].mxu0 }
0x1bd5   :  { %v4838_v38 = vmul.f32 0.35355338, %v4834_v37  ;;  %v7838_v35 = vpop.f32.mrb[53].mxu0  ;;  %v5001_v40 = vpop.f32.mrb[50].mxu1 }
0x1bd6   :  { %v5005_v41 = vmul.f32 0.35355338, %v5001_v40  ;;  %v7848_v42 = vpop.f32.mrb[51].mxu1 }
0x1bd7   :  { %v4839_v43 = vadd.f32 %v4838_v38, %v9148_v58 }
0x1bd8   :  { %v5006_v45 = vadd.f32 %v5005_v41, %v9148_v58 }
0x1bd9   :  { %v4840_v49 = vsel %vm711_vm12, %v4839_v43, -inf }
0x1bda   :  { %4841 = vmax.xlane.f32.xlu0 %v4840_v49  ;;  %v5007_v51 = vsel %vm711_vm12, %v5006_v45, -inf }
0x1bdb   :  { %5008 = vmax.xlane.f32.xlu1 %v5007_v51 }
0x1bdc   :  { %v5168_v52 = vpop.f32.mrb[52].mxu1 }
0x1bdd   :  { %v5172_v53 = vmul.f32 0.35355338, %v5168_v52  ;;  %v7858_v54 = vpop.f32.mrb[53].mxu1 }
0x1bdf   :  { %v5173_v55 = vadd.f32 %v5172_v53, %v9148_v58 }
0x1be0   :  { %v5335_v56 = vpop.f32.mrb[54].mxu1 }
0x1be1   :  { %v5339_v57 = vmul.f32 0.35355338, %v5335_v56  ;;  %v7868_v59 = vpop.f32.mrb[55].mxu1  ;;  %v5174_v33 = vsel %vm711_vm12, %v5173_v55, -inf }
0x1be2   :  { %5175 = vmax.xlane.f32.xlu0 %v5174_v33 }
0x1be3   :  { %v5340_v60 = vadd.f32 %v5339_v57, %v9148_v58 }
0x1be4   :  { %v5516_v61 = vpop.f32.mrb[56].mxu1 }
0x1be5   :  { %v5520_v62 = vmul.f32 0.35355338, %v5516_v61  ;;  %v7878_v63 = vpop.f32.mrb[57].mxu1  ;;  %v5341_v47 = vsel %vm711_vm12, %v5340_v60, -inf }
0x1be6   :  { %5342 = vmax.xlane.f32.xlu0 %v5341_v47 }
0x1be7   :  { %v5521_v0 = vadd.f32 %v5520_v62, %v9148_v58 }
0x1be8   :  { %v5683_v1 = vpop.f32.mrb[58].mxu1 }
0x1be9   :  { %v5687_v2 = vmul.f32 0.35355338, %v5683_v1  ;;  %v7888_v3 = vpop.f32.mrb[59].mxu1  ;;  %v5522_v48 = vsel %vm711_vm12, %v5521_v0, -inf }
0x1bea   :  { %5523 = vmax.xlane.f32.xlu1 %v5522_v48 }
0x1beb   :  { %v5688_v5 = vadd.f32 %v5687_v2, %v9148_v58 }
0x1bec   :  { %v5850_v6 = vpop.f32.mrb[60].mxu1 }
0x1bed   :  { %v5854_v7 = vmul.f32 0.35355338, %v5850_v6  ;;  %v7898_v8 = vpop.f32.mrb[61].mxu1  ;;  %v5689_v9 = vsel %vm711_vm12, %v5688_v5, -inf }
0x1bee   :  { %5690 = vmax.xlane.f32.xlu0 %v5689_v9 }
0x1bef   :  { %v5855_v10 = vadd.f32 %v5854_v7, %v9148_v58 }
0x1bf0   :  { %v6017_v11 = vpop.f32.mrb[62].mxu1 }
0x1bf1   :  { %v6021_v12 = vmul.f32 0.35355338, %v6017_v11  ;;  %v7908_v18 = vpop.f32.mrb[63].mxu1  ;;  %v5856_v19 = vsel %vm711_vm12, %v5855_v10, -inf }
0x1bf2   :  { %5857 = vmax.xlane.f32.xlu1 %v5856_v19 }
0x1bf3   :  { %v6022_v21 = vadd.f32 %v6021_v12, %v9148_v58 }
0x1bf5   :  { %v6023_v22 = vsel %vm711_vm12, %v6022_v21, -inf }
0x1bf6   :  { %6024 = vmax.xlane.f32.xlu0 %v6023_v22 }
0x1c03   :  { %5352 = vrot.lane.b32.xlu1 %v9311_v32, %s8563_s30 }
0x1c0c   :  { %5185 = vrot.lane.b32.xlu0 %v9311_v32, %s8564_s12 }
0x1c67   :  { %v4842_v39 = vpop.xlane.xlu0 %4841 }
0x1c68   :  { %v4843_v23 = vsub.f32 %v4839_v43, %v4842_v39  ;;  %v5009_v24 = vpop.xlane.xlu1 %5008 }
0x1c69   :  { %v5010_v46 = vsub.f32 %v5006_v45, %v5009_v24 }
0x1c6a   :  { %v4844_v13 = vmul.f32 1.442695, %v4843_v23 }
0x1c6b   :  { %v5011_v26 = vmul.f32 1.442695, %v5010_v46 }
0x1c6c   :  { %8416 = vpow2.f32 %v4844_v13 }
0x1c6d   :  { %8418 = vpow2.f32 %v5011_v26 }
0x1c6f   :  { %v5176_v58 = vpop.xlane.xlu0 %5175 }
0x1c70   :  { %v5177_v15 = vsub.f32 %v5173_v55, %v5176_v58 }
0x1c72   :  { %v5178_v28 = vmul.f32 1.442695, %v5177_v15 }
0x1c73   :  { %v5343_v25 = vpop.xlane.xlu0 %5342 }
0x1c74   :  { %8420 = vpow2.f32 %v5178_v28  ;;  %v5344_v36 = vsub.f32 %v5340_v60, %v5343_v25 }
0x1c76   :  { %v8417_v29 = vpop.eup %8416  ;;  %v5345_v27 = vmul.f32 1.442695, %v5344_v36 }
0x1c77   :  { %v8419_v37 = vpop.eup %8418  ;;  %v4846_v32 = vsel %vm711_vm12, %v8417_v29, 0.0  ;;  %v5524_v43 = vpop.xlane.xlu1 %5523 }
0x1c78   :  { %8422 = vpow2.f32 %v5345_v27  ;;  %4847 = vadd.xlane.f32.xlu1 %v4846_v32  ;;  %v5013_v38 = vsel %vm711_vm12, %v8419_v37, 0.0  ;;  %v5525_v45 = vsub.f32 %v5521_v0, %v5524_v43 }
0x1c79   :  { %5014 = vadd.xlane.f32.xlu0 %v5013_v38 }
0x1c7a   :  { %v5526_v53 = vmul.f32 1.442695, %v5525_v45 }
0x1c7b   :  { %v5691_v49 = vpop.xlane.xlu0 %5690 }
0x1c7c   :  { %v5692_v52 = vsub.f32 %v5688_v5, %v5691_v49  ;;  %8424 = vpow2.f32 %v5526_v53  ;;  %v7133_v49 = vld [vmem:[%s9610_s20 + $0x20] sm:$0xff]  ;;  %v7135_v53 = vld [vmem:[%s9610_s20 + $0x30] sm:$0xff] }
0x1c7e   :  { %v8421_v35 = vpop.eup %8420  ;;  %v5693_v56 = vmul.f32 1.442695, %v5692_v52 }
0x1c7f   :  { %v5180_v40 = vsel %vm711_vm12, %v8421_v35, 0.0  ;;  %v5858_v51 = vpop.xlane.xlu1 %5857 }
0x1c80   :  { %5181 = vadd.xlane.f32.xlu1 %v5180_v40  ;;  %v5859_v54 = vsub.f32 %v5855_v10, %v5858_v51  ;;  %8426 = vpow2.f32 %v5693_v56  ;;  %v7134_v51 = vld [vmem:[%s9610_s20 + $0x28] sm:$0xff] }
0x1c81   :  { %v8176_v52 = vpack.c.bf16 %v7134_v51, %v7133_v49 }
0x1c82   :  { %v9410_v41 = vpop.eup %8422  ;;  %v5860_v57 = vmul.f32 1.442695, %v5859_v54  ;;  %v7136_v54 = vld [vmem:[%s9610_s20 + $0x38] sm:$0xff] }
0x1c83   :  { %v5347_v42 = vsel %vm711_vm12, %v9410_v41, 0.0  ;;  %v6025_v55 = vpop.xlane.xlu0 %6024  ;;  %v5353_v3 = vpop.permute.xlu1 %5352  ;;  %8177 = vmatprep.subr.bf16.mxu1 %v8176_v52 }
0x1c84   :  { %5348 = vadd.xlane.f32.xlu0 %v5347_v42  ;;  %v6026_v59 = vsub.f32 %v6022_v21, %v6025_v55  ;;  %8428 = vpow2.f32 %v5860_v57  ;;  %8179 = vmatpush3.bf16.msra.mxu1 %v8176_v52  ;;  %v8180_v55 = vpack.c.bf16 %v7136_v54, %v7135_v53 }
0x1c86   :  { %v6027_v33 = vmul.f32 1.442695, %v6026_v59  ;;  %v8425_v60 = vpop.eup %8424  ;;  %8181 = vmatprep.subr.bf16.mxu1 %v8180_v55 }
0x1c87   :  { %v5528_v62 = vsel %vm711_vm12, %v8425_v60, 0.0  ;;  %v5186_v48 = vpop.permute.xlu0 %5185 }
0x1c88   :  { %8430 = vpow2.f32 %v6027_v33  ;;  %8183 = vmatpush3.bf16.msra.mxu1 %v8180_v55 }
0x1c8a   :  { %v9418_v61 = vpop.eup %8426 }
0x1c8b   :  { %v5695_v47 = vsel %vm711_vm12, %v9418_v61, 0.0 }
0x1c8e   :  { %v9421_v63 = vpop.eup %8428 }
0x1c8f   :  { %v5862_v0 = vsel %vm711_vm12, %v9421_v63, 0.0 }
0x1c91   :  { %5700 = vrot.lane.b32.xlu1 %v9309_v31, %s8562_s14 }
0x1c92   :  { %v9427_v1 = vpop.eup %8430 }
0x1c93   :  { %v6029_v2 = vsel %vm711_vm12, %v9427_v1, 0.0 }
0x1c9a   :  { %5533 = vrot.lane.b32.xlu0 %v9309_v31, %s8561_s8  ;;  %s8570_s8 = smov [#allocation5]  }
0x1c9b   :  { %s6932_s14 = sshll.u32 %s8570_s8, 4  ;;  %s6933_s14 = int_to_ptr.vmem [resolvable:$true] %s6932_s14 }
0x1cb5   :  { %5529 = vadd.xlane.f32.xlu1 %v5528_v62 }
0x1cb9   :  { %5696 = vadd.xlane.f32.xlu0 %v5695_v47  ;;  %5863 = vadd.xlane.f32.xlu1 %v5862_v0 }
0x1cbd   :  { %6030 = vadd.xlane.f32.xlu1 %v6029_v2 }
0x1cce   :  { %6034 = vrot.lane.b32.xlu1 %v9309_v31, %s8563_s30 }
0x1ccf   :  { %5867 = vrot.lane.b32.xlu0 %v9309_v31, %s8564_s12 }
0x1d05   :  { %v4848_v5 = vpop.xlane.xlu1 %4847 }
0x1d06   :  { %8432 = vrcp.f32 %v4848_v5  ;;  %v5015_v6 = vpop.xlane.xlu0 %5014 }
0x1d07   :  { %8434 = vrcp.f32 %v5015_v6 }
0x1d0d   :  { %v5182_v7 = vpop.xlane.xlu1 %5181 }
0x1d0e   :  { %8436 = vrcp.f32 %v5182_v7 }
0x1d10   :  { %v8433_v8 = vpop.eup %8432 }
0x1d11   :  { %v4850_v9 = vmul.f32 %v8433_v8, %v8417_v29  ;;  %v5349_v10 = vpop.xlane.xlu0 %5348  ;;  %v8435_v11 = vpop.eup %8434 }
0x1d12   :  { %8438 = vrcp.f32 %v5349_v10  ;;  %v5017_v31 = vmul.f32 %v8435_v11, %v8419_v37  ;;  %v7143_v11 = vld [vmem:[%s9611_s18 + $0x40] sm:$0xff] }
0x1d13   :  { %7842 = vmatmul.mubr.msk.f32.vlgmr.msra.gmra.mrb[54].mxu0 %vm711_vm12, %v4850_v9 }
0x1d14   :  { %7850 = vmatpush3.msra.mxu0 %v9405_v44  ;;  %7851 = vmatprep.mubr.msk.f32.mxu0 %vm8556_vm6, %v8551_v50  ;;  %v5701_v44 = vpop.permute.xlu1 %5700 }
0x1d15   :  { %7859 = vmatprep.subr.mxu0 %v8551_v50  ;;  %v5534_v22 = vpop.permute.xlu0 %5533 }
0x1d17   :  { %7852 = vmatmul.mubr.msk.f32.vlgmr.msra.gmra.mrb[56].mxu0 %vm711_vm12, %v5017_v31  ;;  %v7144_v31 = vld [vmem:[%s9611_s18 + $0x48] sm:$0xff] }
0x1d18   :  { %v8437_v12 = vpop.eup %8436  ;;  %7860 = vmatpush3.msra.mxu0 %v5186_v48  ;;  %7861 = vmatprep.mubr.msk.f32.mxu0 %vm8556_vm6, %v8551_v50 }
0x1d19   :  { %v5184_v18 = vmul.f32 %v8437_v12, %v8421_v35  ;;  %7869 = vmatprep.subr.mxu0 %v8551_v50  ;;  %v8184_v12 = vpack.c.bf16 %v7144_v31, %v7143_v11 }
0x1d1b   :  { %7862 = vmatmul.mubr.msk.f32.vlgmr.msra.gmra.mrb[58].mxu0 %vm711_vm12, %v5184_v18  ;;  %v7145_v18 = vld [vmem:[%s9611_s18 + $0x50] sm:$0xff] }
0x1d1c   :  { %v8439_v19 = vpop.eup %8438  ;;  %7870 = vmatpush3.msra.mxu0 %v5353_v3  ;;  %7871 = vmatprep.mubr.msk.f32.mxu0 %vm8556_vm6, %v8551_v50 }
0x1d1d   :  { %v5351_v21 = vmul.f32 %v8439_v19, %v9410_v41  ;;  %7879 = vmatprep.subr.mxu0 %v8551_v50  ;;  %v7146_v19 = vld [vmem:[%s9611_s18 + $0x58] sm:$0xff] }
0x1d1f   :  { %7872 = vmatmul.mubr.msk.f32.vlgmr.msra.gmra.mrb[60].mxu0 %vm711_vm12, %v5351_v21  ;;  %v8188_v21 = vpack.c.bf16 %v7146_v19, %v7145_v18  ;;  %v7157_v19 = vld [vmem:[%s9616_s2 + $0x1] ss:$0 sm:$0xff] }
0x1d20   :  { %7880 = vmatpush3.msra.mxu0 %v5534_v22  ;;  %7881 = vmatprep.mubr.msk.f32.mxu0 %vm8556_vm6, %v8551_v50  ;;  %v7147_v22 = vld [vmem:[%s9611_s18 + $0x60] sm:$0xff] }
0x1d21   :  { %7889 = vmatprep.subr.mxu0 %v8551_v50 }
0x1d42   :  { %v5530_v39 = vpop.xlane.xlu1 %5529 }
0x1d43   :  { %8440 = vrcp.f32 %v5530_v39 }
0x1d46   :  { %v5697_v23 = vpop.xlane.xlu0 %5696  ;;  %v5864_v24 = vpop.xlane.xlu1 %5863 }
0x1d47   :  { %8442 = vrcp.f32 %v5697_v23  ;;  %v7149_v23 = vld [vmem:[%s9611_s18 + $0x70] sm:$0xff] }
0x1d48   :  { %8444 = vrcp.f32 %v5864_v24  ;;  %v7150_v24 = vld [vmem:[%s9611_s18 + $0x78] sm:$0xff] }
0x1d4a   :  { %v6031_v46 = vpop.xlane.xlu1 %6030  ;;  %v5868_v25 = vpop.permute.xlu0 %5867 }
0x1d4b   :  { %8446 = vrcp.f32 %v6031_v46  ;;  %v8196_v46 = vpack.c.bf16 %v7150_v24, %v7149_v23 }
0x1d4d   :  { %v8441_v13 = vpop.eup %8440 }
0x1d4e   :  { %v5532_v26 = vmul.f32 %v8441_v13, %v8425_v60  ;;  %v6035_v27 = vpop.permute.xlu1 %6034  ;;  %v7138_v13 = vld [vmem:[%s9612_s23 + $0x1] ss:$0 sm:$0xff] }
0x1d50   :  { %7882 = vmatmul.mubr.msk.f32.vlgmr.msra.gmra.mrb[62].mxu0 %vm711_vm12, %v5532_v26 }
0x1d51   :  { %v8443_v58 = vpop.eup %8442  ;;  %7890 = vmatpush3.msra.mxu0 %v5701_v44  ;;  %7891 = vmatprep.mubr.msk.f32.mxu0 %vm8556_vm6, %v8551_v50  ;;  %v7148_v44 = vld [vmem:[%s9611_s18 + $0x68] sm:$0xff] }
0x1d52   :  { %v5699_v15 = vmul.f32 %v8443_v58, %v9418_v61  ;;  %7899 = vmatprep.subr.mxu0 %v8551_v50  ;;  %v8445_v28 = vpop.eup %8444  ;;  %v8192_v39 = vpack.c.bf16 %v7148_v44, %v7147_v22  ;;  %v7158_v22 = vld [vmem:[%s9617_s7 + $0x1] ss:$0 sm:$0xff] }
0x1d53   :  { %v5866_v36 = vmul.f32 %v8445_v28, %v9421_v63 }
0x1d54   :  { %7892 = vmatmul.mubr.msk.f32.vlgmr.msra.gmra.mrb[64].mxu0 %vm711_vm12, %v5699_v15 }
0x1d55   :  { %7900 = vmatpush3.msra.mxu0 %v5868_v25  ;;  %7901 = vmatprep.mubr.msk.f32.mxu0 %vm8556_vm6, %v8551_v50  ;;  %v8447_v29 = vpop.eup %8446 }
0x1d56   :  { %7909 = vmatprep.subr.mxu0 %v8551_v50  ;;  %v6033_v37 = vmul.f32 %v8447_v29, %v9427_v1 }
0x1d58   :  { %7902 = vmatmul.mubr.msk.f32.vlgmr.msra.gmra.mrb[66].mxu0 %vm711_vm12, %v5866_v36 }
0x1d59   :  { %7910 = vmatpush3.msra.mxu0 %v6035_v27  ;;  %7911 = vmatprep.mubr.msk.f32.mxu0 %vm8556_vm6, %v8551_v50 }
0x1d5a   :  { %8185 = vmatprep.subr.bf16.mxu0 %v8184_v12 }
0x1d5c   :  { %7912 = vmatmul.mubr.msk.f32.vlgmr.msra.gmra.mrb[68].mxu0 %vm711_vm12, %v6033_v37 }
0x1d5d   :  { %8187 = vmatpush3.bf16.msra.mxu0 %v8184_v12 }
0x1d5e   :  { %8189 = vmatprep.subr.bf16.mxu0 %v8188_v21 }
0x1d61   :  { %8191 = vmatpush3.bf16.msra.mxu0 %v8188_v21 }
0x1d62   :  { %8193 = vmatprep.subr.bf16.mxu0 %v8192_v39 }
0x1d65   :  { %8195 = vmatpush3.bf16.msra.mxu0 %v8192_v39 }
0x1d66   :  { %8197 = vmatprep.subr.bf16.mxu0 %v8196_v46 }
0x1d69   :  { %8199 = vmatpush3.bf16.msra.mxu0 %v8196_v46  ;;  %v7169_v46 = vld [vmem:[%s9615_s1 + $0x50] sm:$0xff] }
0x1de6   :  { %v4923_v32 = vpop.f32.mrb[54].mxu0 }
0x1de7   :  { %v7843_v38 = vpop.f32.mrb[55].mxu0 }
0x1dea   :  { %v5090_v35 = vpop.f32.mrb[56].mxu0 }
0x1deb   :  { %5429 = vrot.lane.b32.xlu0 %v5090_v35, %s8565_s27  ;;  %v7853_v40 = vpop.f32.mrb[57].mxu0 }
0x1dee   :  { %v5257_v41 = vpop.f32.mrb[58].mxu0 }
0x1def   :  { %5433 = vrot.lane.b32.xlu1 %v5257_v41, %s8566_s4  ;;  %v7863_v42 = vpop.f32.mrb[59].mxu0 }
0x1df0   :  { %v7152_v42 = vld [vmem:[%s9613_s22 + $0x1] ss:$0 sm:$0xff] }
0x1df2   :  { %v5424_v43 = vpop.f32.mrb[60].mxu0 }
0x1df3   :  { %5437 = vrot.lane.b32.xlu1 %v5424_v43, %s8567_s15  ;;  %v7873_v45 = vpop.f32.mrb[61].mxu0 }
0x1e23   :  { %v5605_v56 = vpop.f32.mrb[62].mxu0 }
0x1e24   :  { %v7883_v57 = vpop.f32.mrb[63].mxu0 }
0x1e27   :  { %v5772_v59 = vpop.f32.mrb[64].mxu0 }
0x1e28   :  { %6111 = vrot.lane.b32.xlu0 %v5772_v59, %s8565_s27  ;;  %v7893_v33 = vpop.f32.mrb[65].mxu0 }
0x1e2b   :  { %v5939_v60 = vpop.f32.mrb[66].mxu0 }
0x1e2c   :  { %6115 = vrot.lane.b32.xlu0 %v5939_v60, %s8566_s4  ;;  %v7903_v61 = vpop.f32.mrb[67].mxu0 }
0x1e2f   :  { %v6106_v62 = vpop.f32.mrb[68].mxu0 }
0x1e30   :  { %6119 = vrot.lane.b32.xlu1 %v6106_v62, %s8567_s15  ;;  %v7913_v63 = vpop.f32.mrb[69].mxu0 }
0x1e5d   :  { %v5430_v47 = vpop.permute.xlu0 %5429 }
0x1e5e   :  { %v5440_v1 = vsel %vm711_vm12, %v4923_v32, %v5430_v47  ;;  %v7159_v47 = vld [vmem:[%s9614_s26 + $0x20] sm:$0xff] }
0x1e61   :  { %v5434_v0 = vpop.permute.xlu1 %5433 }
0x1e62   :  { %v5441_v2 = vsel %vm621_vm11, %v5440_v1, %v5434_v0  ;;  %v7160_v0 = vld [vmem:[%s9614_s26 + $0x28] sm:$0xff] }
0x1e63   :  { %v8200_v1 = vpack.c.bf16 %v7160_v0, %v7159_v47 }
0x1e65   :  { %v5438_v3 = vpop.permute.xlu1 %5437  ;;  %8201 = vmatprep.subr.bf16.mxu1 %v8200_v1 }
0x1e66   :  { %v5442_v48 = vsel %vm3549_vm7, %v5441_v2, %v5438_v3  ;;  %v7161_v2 = vld [vmem:[%s9614_s26 + $0x30] sm:$0xff]  ;;  %v7162_v3 = vld [vmem:[%s9614_s26 + $0x38] sm:$0xff] }
0x1e67   :  { %7922 = vmatprep.mubr.msk.f32.mxu1 %vm175_vm0, %v5442_v48  ;;  %v8204_v48 = vpack.c.bf16 %v7162_v3, %v7161_v2 }
0x1e9a   :  { %v6112_v5 = vpop.permute.xlu0 %6111 }
0x1e9b   :  { %v6122_v7 = vsel %vm711_vm12, %v5605_v56, %v6112_v5  ;;  %v7167_v5 = vld [vmem:[%s9615_s1 + $0x40] sm:$0xff] }
0x1e9e   :  { %v6116_v6 = vpop.permute.xlu0 %6115 }
0x1e9f   :  { %v6123_v8 = vsel %vm621_vm11, %v6122_v7, %v6116_v6  ;;  %v7168_v6 = vld [vmem:[%s9615_s1 + $0x48] sm:$0xff] }
0x1ea0   :  { %v8208_v7 = vpack.c.bf16 %v7168_v6, %v7167_v5 }
0x1ea2   :  { %v6120_v9 = vpop.permute.xlu1 %6119 }
0x1ea3   :  { %v6124_v10 = vsel %vm3549_vm7, %v6123_v8, %v6120_v9 }
0x1ea4   :  { %7923 = vmatmul.mubr.msk.f32.vlgmr.msra.gmra.mrb[64].mxu1 %vm175_vm0, %v6124_v10 }
0x1ea5   :  { %8203 = vmatpush3.bf16.msra.mxu1 %v8200_v1 }
0x1ea6   :  { %8205 = vmatprep.subr.bf16.mxu1 %v8204_v48 }
0x1ea9   :  { %8207 = vmatpush3.bf16.msra.mxu1 %v8204_v48 }
0x1eaa   :  { %8209 = vmatprep.subr.bf16.mxu1 %v8208_v7 }
0x1f77   :  { %v7924_v26 = vpop.f32.mrb[64].mxu1 }
0x1f78   :  { %v6216_v58 = vadd.f32 %v7924_v26, %v7138_v13  ;;  %v6210_v15 = vpop.f32.mrb[65].mxu1 }
0x1f79   :  { %v6211_v28 = vadd.f32 %v7138_v13, %v6210_v15  ;;  %v7170_v13 = vld [vmem:[%s9615_s1 + $0x58] sm:$0xff] }
0x1f7a   :  { %v7142_v25 = vmul.f32 -1.442695, %v6216_v58  ;;  %v8212_v15 = vpack.c.bf16 %v7170_v13, %v7169_v46  ;;  %v6789_v46 = vld [vmem:[%s9623_s5 + $0x10] sm:$0xff]  ;;  %v6790_v13 = vld [vmem:[%s9623_s5 + $0x18] sm:$0xff] }
0x1f7b   :  { %v7141_v36 = vmul.f32 -1.442695, %v6211_v28 }
0x1f7c   :  { %8448 = vpow2.f32 %v7142_v25  ;;  %v7172_v25 = vld [vmem:[%s9615_s1 + $0x68] sm:$0xff] }
0x1f7d   :  { %8450 = vpow2.f32 %v7141_v36 }
0x1f86   :  { %v8449_v29 = vpop.eup %8448 }
0x1f87   :  { %v8451_v27 = vpop.eup %8450  ;;  %v6226_v37 = vadd.f32 1.0, %v8449_v29  ;;  %v7173_v29 = vld [vmem:[%s9615_s1 + $0x70] sm:$0xff] }
0x1f88   :  { %v6225_v32 = vadd.f32 1.0, %v8451_v27  ;;  %v7174_v27 = vld [vmem:[%s9615_s1 + $0x78] sm:$0xff] }
0x1f89   :  { %8452 = vrcp.f32 %v6226_v37  ;;  %v8220_v37 = vpack.c.bf16 %v7174_v27, %v7173_v29  ;;  %v6794_v29 = vld [vmem:[%s9623_s5 + $0x38] sm:$0xff] }
0x1f8a   :  { %8454 = vrcp.f32 %v6225_v32  ;;  %v7164_v32 = vld [vmem:[%s9618_s11 + $0x1] ss:$0 sm:$0xff] }
0x1f93   :  { %v8453_v38 = vpop.eup %8452 }
0x1f94   :  { %v8455_v35 = vpop.eup %8454  ;;  %v6232_v41 = vmul.f32 %v8453_v38, %v6216_v58 }
0x1f95   :  { %v6231_v40 = vmul.f32 %v8455_v35, %v6211_v28  ;;  %v7171_v28 = vld [vmem:[%s9615_s1 + $0x60] sm:$0xff] }
0x1f96   :  { %v8216_v36 = vpack.c.bf16 %v7172_v25, %v7171_v28  ;;  %v6792_v28 = vld [vmem:[%s9623_s5 + $0x28] sm:$0xff] }
0x1f97   :  { %7941 = vmatprep.mubr.msk.f32.mxu0 %vm4354_vm10, %v6231_v40 }
0x1f98   :  { %7942 = vmatmul.mubr.msk.f32.vlgmr.msra.gmra.mrb[70].mxu0 %vm4354_vm10, %v6232_v41 }
0x206b   :  { %v7943_v43 = vpop.f32.mrb[70].mxu0 }
0x206c   :  { %v6328_v45 = vadd.f32 %v7943_v43, %v7152_v42  ;;  %v6322_v49 = vpop.f32.mrb[71].mxu0 }
0x206d   :  { %v6323_v51 = vadd.f32 %v7152_v42, %v6322_v49 }
0x206e   :  { %v6332_v52 = vadd.f32 %v6328_v45, %v9301_v14  ;;  %v7176_v45 = vld [vmem:[%s9619_s16 + $0x1] ss:$0 sm:$0xff] }
0x206f   :  { %v6331_v53 = vadd.f32 %v6323_v51, %v9298_v20 }
0x2070   :  { %v6340_v54 = vsel %vm175_vm0, %v6332_v52, 0.0 }
0x2071   :  { %6341 = vadd.xlane.f32.xlu1 %v6340_v54  ;;  %v6337_v55 = vsel %vm175_vm0, %v6331_v53, 0.0 }
0x2072   :  { %6338 = vadd.xlane.f32.xlu0 %v6337_v55 }
0x20fe   :  { %v6342_v56 = vpop.xlane.xlu1 %6341 }
0x20ff   :  { %v6344_v57 = vmul.f32 0.03125, %v6342_v56  ;;  %v6339_v59 = vpop.xlane.xlu0 %6338 }
0x2100   :  { %v6343_v33 = vmul.f32 0.03125, %v6339_v59 }
0x2101   :  { %v6346_v60 = vsub.f32 %v6332_v52, %v6344_v57 }
0x2102   :  { %v6345_v61 = vsub.f32 %v6331_v53, %v6343_v33 }
0x2103   :  { %v6348_v14 = vmul.f32 %v6346_v60, %v6346_v60 }
0x2104   :  { %v6347_v62 = vmul.f32 %v6345_v61, %v6345_v61 }
0x2105   :  { %v6352_v63 = vsel %vm175_vm0, %v6348_v14, 0.0 }
0x2106   :  { %v6349_v20 = vsel %vm175_vm0, %v6347_v62, 0.0 }
0x2107   :  { %6350 = vadd.xlane.f32.xlu0 %v6349_v20 }
0x210b   :  { %6353 = vadd.xlane.f32.xlu0 %v6352_v63 }
0x2194   :  { %v6351_v8 = vpop.xlane.xlu0 %6350 }
0x2195   :  { %v6355_v9 = vmul.f32 0.03125, %v6351_v8 }
0x2197   :  { %v6357_v10 = vadd.f32 1e-08, %v6355_v9  ;;  %v7180_v9 = vld [vmem:[%s9622_s13] ss:$0 sm:$0xff] }
0x2198   :  { %v6354_v11 = vpop.xlane.xlu0 %6353 }
0x2199   :  { %8456 = vrsqrt.f32 %v6357_v10  ;;  %v6356_v31 = vmul.f32 0.03125, %v6354_v11 }
0x219b   :  { %v6358_v12 = vadd.f32 1e-08, %v6356_v31 }
0x219d   :  { %8458 = vrsqrt.f32 %v6358_v12 }
0x21a3   :  { %v8457_v18 = vpop.eup %8456 }
0x21a4   :  { %v6361_v21 = vmul.f32 %v8457_v18, %v6345_v61 }
0x21a6   :  { %v6369_v44 = vmul.f32 %v7157_v19, %v6361_v21  ;;  %v6787_v21 = vld [vmem:[%s9623_s5] sm:$0xff] }
0x21a7   :  { %v8459_v39 = vpop.eup %8458 }
0x21a8   :  { %v6362_v23 = vmul.f32 %v8459_v39, %v6346_v60  ;;  %v6377_v24 = vadd.f32 %v7158_v22, %v6369_v44 }
0x21aa   :  { %v6370_v26 = vmul.f32 %v7157_v19, %v6362_v23  ;;  %7952 = vmatprep.mubr.msk.f32.mxu1 %vm175_vm0, %v6377_v24  ;;  %v6620_v19 = vld [vmem:[%s9620_s6 + $0x8] sm:$0xff] }
0x21ac   :  { %v6378_v58 = vadd.f32 %v7158_v22, %v6370_v26  ;;  %v6788_v22 = vld [vmem:[%s9623_s5 + $0x8] sm:$0xff]  ;;  %v6702_v26 = vld [vmem:[%s9624_s17] sm:$0x3] }
0x21ad   :  { %v8231_v23 = vpack.c.bf16 %v6788_v22, %v6787_v21 }
0x21ae   :  { %7953 = vmatmul.mubr.msk.f32.vlgmr.msra.gmra.mrb[66].mxu1 %vm175_vm0, %v6378_v58 }
0x21af   :  { %8211 = vmatpush3.bf16.msra.mxu1 %v8208_v7  ;;  %v7179_v7 = vld [vmem:[%s9621_s0] ss:$0 sm:$0xff] }
0x21b0   :  { %8213 = vmatprep.subr.bf16.mxu1 %v8212_v15 }
0x21b3   :  { %8215 = vmatpush3.bf16.msra.mxu1 %v8212_v15  ;;  %v6791_v15 = vld [vmem:[%s9623_s5 + $0x20] sm:$0xff] }
0x21b4   :  { %8217 = vmatprep.subr.bf16.mxu1 %v8216_v36 }
0x21b7   :  { %8219 = vmatpush3.bf16.msra.mxu1 %v8216_v36  ;;  %v6793_v36 = vld [vmem:[%s9623_s5 + $0x30] sm:$0xff] }
0x21b8   :  { %8221 = vmatprep.subr.bf16.mxu1 %v8220_v37  ;;  %v8243_v27 = vpack.c.bf16 %v6794_v29, %v6793_v36 }
0x21bb   :  { %8223 = vmatpush3.bf16.msra.mxu1 %v8220_v37 }
0x2281   :  { %v7954_v38 = vpop.f32.mrb[66].mxu1 }
0x2282   :  { %v6470_v35 = vadd.f32 %v7954_v38, %v7164_v32  ;;  %v6464_v40 = vpop.f32.mrb[67].mxu1 }
0x2283   :  { %v6465_v41 = vadd.f32 %v7164_v32, %v6464_v40  ;;  %v7184_v40 = vld [vmem:[%s9625_s21] ss:$0 sm:$0xff] }
0x2284   :  { %v6474_v43 = vmax.f32 %v6470_v35, 0.0 }
0x2285   :  { %v6473_v42 = vmax.f32 %v6465_v41, 0.0 }
0x2287   :  { %7971 = vmatprep.mubr.msk.f32.mxu1 %vm4354_vm10, %v6473_v42 }
0x2288   :  { %7972 = vmatmul.mubr.msk.f32.vlgmr.msra.gmra.mrb[68].mxu1 %vm4354_vm10, %v6474_v43 }
0x235b   :  { %v7973_v49 = vpop.f32.mrb[68].mxu1 }
0x235c   :  { %v6570_v51 = vadd.f32 %v7973_v49, %v7176_v45  ;;  %v6564_v52 = vpop.f32.mrb[69].mxu1 }
0x235d   :  { %v6565_v53 = vadd.f32 %v7176_v45, %v6564_v52  ;;  %v7187_v45 = vld [vmem:[%s9626_s25] ss:$0 sm:$0xff] }
0x235e   :  { %v6574_v54 = vmul.f32 %v6570_v51, %v9053_v16  ;;  %v6619_v16 = vld [vmem:[%s9620_s6] sm:$0xff] }
0x235f   :  { %v6573_v55 = vmul.f32 %v6565_v53, %v9051_v30  ;;  %7978 = vmatprep.mubr.msk.f32.mxu0 %vm621_vm11, %v6619_v16 }
0x2360   :  { %v6580_v56 = vsel %vm175_vm0, %v6574_v54, 0.0 }
0x2361   :  { %6581 = vadd.xlane.f32.xlu0 %v6580_v56  ;;  %v6577_v57 = vsel %vm175_vm0, %v6573_v55, 0.0 }
0x2362   :  { %6578 = vadd.xlane.f32.xlu1 %v6577_v57 }
0x23ee   :  { %v6582_v59 = vpop.xlane.xlu0 %6581 }
0x23ef   :  { %v6584_v33 = vmul.f32 0.03125, %v6582_v59  ;;  %v6579_v60 = vpop.xlane.xlu1 %6578 }
0x23f0   :  { %v6583_v61 = vmul.f32 0.03125, %v6579_v60 }
0x23f1   :  { %v6586_v62 = vsub.f32 %v6574_v54, %v6584_v33 }
0x23f2   :  { %v6585_v20 = vsub.f32 %v6573_v55, %v6583_v61 }
0x23f3   :  { %v6588_v14 = vmul.f32 %v6586_v62, %v6586_v62 }
0x23f4   :  { %v6587_v63 = vmul.f32 %v6585_v20, %v6585_v20 }
0x23f5   :  { %v6592_v47 = vsel %vm175_vm0, %v6588_v14, 0.0 }
0x23f6   :  { %6593 = vadd.xlane.f32.xlu0 %v6592_v47  ;;  %v6589_v30 = vsel %vm175_vm0, %v6587_v63, 0.0 }
0x23f7   :  { %6590 = vadd.xlane.f32.xlu1 %v6589_v30 }
0x2408   :  { %6779 = vrot.lane.b32.xlu1 %v9069_v34, %s8568_s9 }
0x240c   :  { %6781 = vrot.lane.b32.xlu0 %v9067_v17, %s8568_s9 }
0x2483   :  { %v6594_v0 = vpop.xlane.xlu0 %6593 }
0x2484   :  { %v6596_v1 = vmul.f32 0.03125, %v6594_v0  ;;  %v6591_v2 = vpop.xlane.xlu1 %6590 }
0x2485   :  { %v6595_v3 = vmul.f32 0.03125, %v6591_v2 }
0x2486   :  { %v6598_v48 = vadd.f32 1e-08, %v6596_v1 }
0x2487   :  { %v6597_v5 = vadd.f32 1e-08, %v6595_v3  ;;  %v6782_v37 = vpop.permute.xlu0 %6781 }
0x2488   :  { %8460 = vrsqrt.f32 %v6598_v48  ;;  %v6780_v58 = vpop.permute.xlu1 %6779 }
0x2489   :  { %8462 = vrsqrt.f32 %v6597_v5 }
0x2492   :  { %v8461_v6 = vpop.eup %8460 }
0x2493   :  { %v8463_v8 = vpop.eup %8462  ;;  %v6602_v34 = vmul.f32 %v8461_v6, %v6586_v62 }
0x2494   :  { %v6601_v17 = vmul.f32 %v8463_v8, %v6585_v20 }
0x2495   :  { %v6610_v10 = vmul.f32 %v7179_v7, %v6602_v34 }
0x2496   :  { %v6609_v11 = vmul.f32 %v7179_v7, %v6601_v17 }
0x2497   :  { %v6618_v31 = vadd.f32 %v7180_v9, %v6610_v10 }
0x2498   :  { %v6617_v12 = vadd.f32 %v7180_v9, %v6609_v11 }
0x249a   :  { %v8224_v18 = vpack.c.bf16 %v6618_v31, %v6617_v12 }
0x249c   :  { %8225 = vmatprep.subr.bf16.mxu0 %v8224_v18 }
0x249d   :  { %8227 = vmatpush3.bf16.msra.mxu0 %v8224_v18 }
0x249e   :  { %8228 = vmatprep.subr.bf16.mxu0 %v8555_v4  ;;  %v8235_v4 = vpack.c.bf16 %v6790_v13, %v6789_v46 }
0x24a0   :  { %7979 = vmatmul.mubr.msk.f32.vlgmr.msra.gmra.mrb[72].mxu0 %vm621_vm11, %v6620_v19 }
0x24a1   :  { %7985 = vmatprep.mubr.msk.f32.mxu0 %vm8556_vm6, %v8551_v50  ;;  %v8239_v50 = vpack.c.bf16 %v6792_v28, %v6791_v15 }
0x2573   :  { %v7980_v44 = vpop.f32.mrb[72].mxu0 }
0x2574   :  { %v6693_v39 = vpop.f32.mrb[73].mxu0  ;;  %v6786_v32 = vsel %vm175_vm0, %v7980_v44, %v6782_v37 }
0x2575   :  { %v8229_v24 = vpack.c.bf16 %v7980_v44, %v6693_v39  ;;  %v6785_v25 = vsel %vm175_vm0, %v6693_v39, %v6780_v58 }
0x2577   :  { %8230 = vmatpush3.bf16.msra.mxu0 %v8229_v24 }
0x2578   :  { %8232 = vmatprep.subr.bf16.mxu0 %v8231_v23 }
0x257a   :  { %7986 = vmatmul.mubr.msk.f32.vlgmr.msra.gmra.mrb[74].mxu0 %vm621_vm11, %v6702_v26 }
0x257b   :  { %8234 = vmatpush3.bf16.msra.mxu0 %v8231_v23  ;;  %8004 = vmatprep.mubr.msk.f32.mxu0 %vm4354_vm10, %v6785_v25 }
0x257c   :  { %8236 = vmatprep.subr.bf16.mxu0 %v8235_v4 }
0x257f   :  { %8238 = vmatpush3.bf16.msra.mxu0 %v8235_v4 }
0x2580   :  { %8240 = vmatprep.subr.bf16.mxu0 %v8239_v50 }
0x2583   :  { %8242 = vmatpush3.bf16.msra.mxu0 %v8239_v50 }
0x2584   :  { %8244 = vmatprep.subr.bf16.mxu0 %v8243_v27 }
0x2587   :  { %8246 = vmatpush3.bf16.msra.mxu0 %v8243_v27 }
0x258a   :  { %8005 = vmatmul.mubr.msk.f32.vlgmr.msra.gmra.mrb[76].mxu0 %vm4354_vm10, %v6786_v32 }
0x264d   :  { %v6772_v38 = vpop.f32.mrb[74].mxu0 }
0x264e   :  { %6776 = vst.msk [vmem:[#allocation3] sm:$0x3] %vm2287_vm9, %v6772_v38  ;;  %v7987_v35 = vpop.f32.mrb[75].mxu0 }
0x265d   :  { %v8006_v41 = vpop.f32.mrb[76].mxu0 }
0x265e   :  { %v6880_v42 = vadd.f32 %v8006_v41, %v7184_v40  ;;  %v6874_v43 = vpop.f32.mrb[77].mxu0 }
0x265f   :  { %v6875_v49 = vadd.f32 %v7184_v40, %v6874_v43 }
0x2660   :  { %v6884_v51 = vmax.f32 %v6880_v42, 0.0 }
0x2661   :  { %v6883_v52 = vmax.f32 %v6875_v49, 0.0 }
0x2662   :  { %v6893_v53 = vmul.f32 %v7187_v45, %v6884_v51 }
0x2663   :  { %v6892_v54 = vmul.f32 %v7187_v45, %v6883_v52 }
0x2664   :  { %v6897_v55 = vsel %vm175_vm0, %v6893_v53, 0.0 }
0x2665   :  { %6898 = vadd.xlane.f32.xlu0 %v6897_v55  ;;  %v6894_v56 = vsel %vm175_vm0, %v6892_v54, 0.0 }
0x2666   :  { %6895 = vadd.xlane.f32.xlu1 %v6894_v56 }
0x2667   :  { %8475 = shalt.err (!%p8472_p4)
}
0x2668   :  { %s8476_s30 = scalar_lea.hbm %s8757_s28, 32 }
0x2669   :  { %p8477_p5 = scmp.ne.s32.totalorder %s8757_s28, %s8476_s30  ;;  %p8480_p6 = scmp.lt.u32.totalorder %s8476_s30, %s8757_s28 }
0x266b   :  { %p8482_p7 = pnand %p8480_p6, %p8477_p5 }
0x266d   :  { %8485 = shalt.err (!%p8482_p7)
}
0x266e   :  { %6925 = dma.vmem_to_hbm [thread:$0]  %s6923_s3, 32, %s8757_s28, [#allocation4]  }
0x266f   :  { %s8486_s12 = scalar_lea.vmem %s6933_s14, 32  ;;  %p8491_p9 = scmp.lt.s32.totalorder %s6933_s14, %s6933_s14 }
0x2670   :  { %p8487_p8 = scmp.ne.s32.totalorder %s6933_s14, %s8486_s12  ;;  %p8492_p10 = scmp.lt.s32.totalorder %s8486_s12, %s8486_s12 }
0x2672   :  { %p8493_p11 = por %p8492_p10, %p8491_p9 }
0x2674   :  { %p8494_p12 = pnand %p8493_p11, %p8487_p8 }
0x2676   :  { %8497 = shalt.err (!%p8494_p12)
}
0x2677   :  { %s8498_s20 = scalar_lea.hbm %s8762_s10, 32 }
0x2678   :  { %p8499_p13 = scmp.ne.s32.totalorder %s8762_s10, %s8498_s20  ;;  %p8502_p0 = scmp.lt.u32.totalorder %s8498_s20, %s8762_s10 }
0x267a   :  { %p8504_p1 = pnand %p8502_p0, %p8499_p13 }
0x267c   :  { %8507 = shalt.err (!%p8504_p1)
}
0x267d   :  { %6935 = dma.vmem_to_hbm [thread:$0]  %s6933_s14, 32, %s8762_s10, [#allocation6]   ;;  %v7188_v57 = vld [vmem:[#allocation2] ss:$0 sm:$0xff]  ;;  %vm6909_vm0 = vcmask 7168  }
0x26f2   :  { %v6899_v59 = vpop.xlane.xlu0 %6898 }
0x26f3   :  { %v6908_v33 = vadd.f32 %v7188_v57, %v6899_v59  ;;  %v6896_v60 = vpop.xlane.xlu1 %6895 }
0x26f4   :  { %v6907_v61 = vadd.f32 %v7188_v57, %v6896_v60 }
0x26f5   :  { %6911 = vst.msk [vmem:[%s8752_s19 + $0x8] sm:$0xff] %vm6909_vm0, %v6908_v33 }
0x26f6   :  { %6910 = vst.msk [vmem:[%s8752_s19] sm:$0xff] %vm6909_vm0, %v6907_v61 }
0x26f7   :  { %8508 = dma.done.wait [#allocation4], 32  }
0x26f8   :  { %8509 = vsyncadd [#allocation4], 4294967264 }
0x26f9   :  { %8510 = dma.done.wait [#allocation6], 32  }
0x26fa   :  { %8511 = vsyncadd [#allocation6], 4294967264 }
0x26fb   :  { %6950 = vsyncpa [#allocation4], 1 }
0x26fc   :  { %6951 = vsyncpa [#allocation6], 1 }

</bundles_post_ra>
